<compile_context>
chip_gen: v7x
topology: tpu7x:2x2x1
jax: 0.10.0
libtpu: 0.0.40
codegen_flags: <defaults>
</compile_context>

<pallas_src>
import jax
import jax.numpy as jnp
import numpy as np
from jax import lax
from jax.experimental import pallas as pl
from jax.experimental.pallas import tpu as pltpu

_HIGHEST = jax.lax.Precision.HIGHEST   # reference only
_BN_EPS = 1e-5
_TM_MAX = 256                          # M-tile; sized to fit v7x's smaller VMEM


def _round_up(n, m):
    return ((n + m - 1) // m) * m


# ---------------------------------------------------------------------------
# Pallas kernels
# ---------------------------------------------------------------------------

def _conv_pool_kernel(p_ref, w_ref, shift_ref, o_ref):
    """Fused im2col-conv + folded-BN shift + ReLU + 2x2 max-pool for one M tile.

    p_ref    : (4, TM, K) bf16 -- one im2col patch matrix per pool-window offset.
    w_ref    : (K, N)   bf16 -- conv weights with BN scale pre-folded.
    shift_ref: (1, N)   f32  -- folded conv-bias + BN shift.
    o_ref    : (TM, N)  pooled activations, rows ordered (b, ph, pw).
    """
    w = w_ref[...]
    acc = jnp.dot(p_ref[0], w, preferred_element_type=jnp.float32)
    for g in range(1, 4):                      # running max: <=2 live results
        acc = jnp.maximum(acc, jnp.dot(p_ref[g], w,
                                       preferred_element_type=jnp.float32))
    o_ref[...] = jnp.maximum(acc + shift_ref[...], 0.0).astype(o_ref.dtype)


def _conv3_se_kernel(p_ref, w_ref, shift_ref, w1_ref, w2_ref, o_ref):
    """Fused conv3 stage + SE block for one batch element.

    p_ref : (4, S, K) bf16 im2col patches (one group per pool offset).
    w_ref : (K, 128) bf16 conv weights (BN scale folded); shift_ref: (1, 128) f32.
    w1_ref: (128, 8) f32, w2_ref: (8, 128) f32 -- SE FC weights (no biases).
    o_ref : (S, 128) f32 SE-rescaled activations, rows ordered (ph, pw).
    """
    w = w_ref[...]
    acc = jnp.dot(p_ref[0], w, preferred_element_type=jnp.float32)
    for g in range(1, 4):
        acc = jnp.maximum(acc, jnp.dot(p_ref[g], w,
                                       preferred_element_type=jnp.float32))
    y = jnp.maximum(acc + shift_ref[...], 0.0)                    # (S, 128)
    gap = jnp.mean(y, axis=0, keepdims=True)                      # (1, 128)
    z = jnp.maximum(jnp.dot(gap, w1_ref[...],
                            preferred_element_type=jnp.float32), 0.0)
    s = jax.nn.sigmoid(jnp.dot(z, w2_ref[...],
                               preferred_element_type=jnp.float32))
    o_ref[...] = (y * s).astype(o_ref.dtype)


# ---------------------------------------------------------------------------
# Wrapper-side layout plumbing (im2col, BN folding) + pallas_call
# ---------------------------------------------------------------------------

def _fold_bn_into_weights(w_oihw, bias, gamma, beta, mean, var):
    """Return (w_mat_scaled, shift): im2col weight with BN scale folded in."""
    Cout = w_oihw.shape[0]
    scale = gamma / jnp.sqrt(var + _BN_EPS)
    shift = (bias - mean) * scale + beta
    w_mat = w_oihw.transpose(1, 2, 3, 0).reshape(-1, Cout) * scale[None, :]
    return w_mat, shift


def _pool_group_stack(patches, B, OH, OW, K):
    """(B, OH, OW, K) conv patches -> (4, B*PH*PW, K) grouped by 2x2 pool offset."""
    PH, PW = OH // 2, OW // 2                  # floor, as MaxPool2d
    p = patches[:, :2 * PH, :2 * PW, :].reshape(B, PH, 2, PW, 2, K)
    p = p.transpose(2, 4, 0, 1, 3, 5).reshape(4, B * PH * PW, K)
    return p, PH, PW


def _conv1_stage(x, w_oihw, bias, gamma, beta, mean, var):
    """Conv2d(1,64,k7,s7,p1)+BN+ReLU+MaxPool2d(2,2). Returns NHWC (B,PH,PW,64) bf16."""
    B, C, H, W = x.shape
    k, s, pad = 7, 7, 1
    OH = (H + 2 * pad - k) // s + 1
    OW = (W + 2 * pad - k) // s + 1
    # stride == kernel: im2col is a pure pad + crop + reshape.
    xp = jnp.pad(x, ((0, 0), (0, 0), (pad, pad), (pad, pad)))[:, :, :OH * s, :OW * s]
    patches = xp.reshape(B, C, OH, k, OW, k).transpose(0, 2, 4, 1, 3, 5)
    K = C * k * k
    patches = patches.reshape(B, OH, OW, K)                      # row order (C, kh, kw)
    p, PH, PW = _pool_group_stack(patches, B, OH, OW, K)

    M = B * PH * PW
    Cout = w_oihw.shape[0]
    Kp = _round_up(max(K, 128), 128)          # lane-align K: 49 -> 128
    Np = _round_up(Cout, 128)                 # lane-dense output: 64 -> 128
    TM = min(_TM_MAX, _round_up(M, 16))
    Mp = _round_up(M, TM)

    p = jnp.pad(p, ((0, 0), (0, Mp - M), (0, Kp - K))).astype(jnp.bfloat16)
    w_mat, shift = _fold_bn_into_weights(w_oihw, bias, gamma, beta, mean, var)
    w_mat = jnp.pad(w_mat, ((0, Kp - K), (0, Np - Cout))).astype(jnp.bfloat16)
    shift = jnp.pad(shift, (0, Np - Cout)).reshape(1, Np).astype(jnp.float32)

    out = pl.pallas_call(
        _conv_pool_kernel,
        out_shape=jax.ShapeDtypeStruct((Mp, Np), jnp.bfloat16),
        grid_spec=pltpu.PrefetchScalarGridSpec(
            num_scalar_prefetch=0,
            grid=(Mp // TM,),
            in_specs=[pl.BlockSpec((4, TM, Kp), lambda i: (0, i, 0)),
                      pl.BlockSpec((Kp, Np), lambda i: (0, 0)),
                      pl.BlockSpec((1, Np), lambda i: (0, 0))],
            out_specs=pl.BlockSpec((TM, Np), lambda i: (i, 0))),
        compiler_params=pltpu.CompilerParams(
            dimension_semantics=("parallel",)),
    )(p, w_mat, shift)
    return out[:M, :Cout].reshape(B, PH, PW, Cout)


def _conv3_se_stage(y1_nhwc, w_oihw, bias, gamma, beta, mean, var, w1, w2):
    """Conv2d(64,128,k5,s2,p1)+BN+ReLU+MaxPool2d(2,2)+SE, fused, grid over batch.

    Returns NHWC (B, PH, PW, 128) f32.
    """
    B, H, W, Cin = y1_nhwc.shape
    k, s, pad = 5, 2, 1
    x = y1_nhwc.transpose(0, 3, 1, 2)                            # NCHW
    xp = jnp.pad(x, ((0, 0), (0, 0), (pad, pad), (pad, pad)))
    OH = (H + 2 * pad - k) // s + 1
    OW = (W + 2 * pad - k) // s + 1
    cols = []
    for di in range(k):
        for dj in range(k):
            cols.append(xp[:, :,
                           di:di + (OH - 1) * s + 1:s,
                           dj:dj + (OW - 1) * s + 1:s])           # (B, Cin, OH, OW)
    pat = jnp.stack(cols, axis=2)                                 # (B, Cin, k*k, OH, OW)
    K = Cin * k * k
    pat = pat.transpose(0, 3, 4, 1, 2).reshape(B, OH, OW, K)      # row order (C, kh, kw)

    PH, PW = OH // 2, OW // 2
    S = PH * PW
    p = pat[:, :2 * PH, :2 * PW, :].reshape(B, PH, 2, PW, 2, K)
    p = p.transpose(0, 2, 4, 1, 3, 5).reshape(B, 4, S, K).astype(jnp.bfloat16)

    Cout = w_oihw.shape[0]
    w_mat, shift = _fold_bn_into_weights(w_oihw, bias, gamma, beta, mean, var)
    w_mat = w_mat.astype(jnp.bfloat16)
    shift = shift.reshape(1, Cout).astype(jnp.float32)
    w1 = w1.astype(jnp.float32)
    w2 = w2.astype(jnp.float32)
    Cr = w1.shape[1]                                              # 128 // reduction

    out = pl.pallas_call(
        _conv3_se_kernel,
        out_shape=jax.ShapeDtypeStruct((B, S, Cout), jnp.float32),
        grid_spec=pltpu.PrefetchScalarGridSpec(
            num_scalar_prefetch=0,
            grid=(B,),
            in_specs=[pl.BlockSpec((None, 4, S, K), lambda b: (b, 0, 0, 0)),
                      pl.BlockSpec((K, Cout), lambda b: (0, 0)),
                      pl.BlockSpec((1, Cout), lambda b: (0, 0)),
                      pl.BlockSpec((Cout, Cr), lambda b: (0, 0)),
                      pl.BlockSpec((Cr, Cout), lambda b: (0, 0))],
            out_specs=pl.BlockSpec((None, S, Cout), lambda b: (b, 0, 0))),
        compiler_params=pltpu.CompilerParams(
            dimension_semantics=("parallel",)),
    )(p, w_mat, shift, w1, w2)
    return out.reshape(B, PH, PW, Cout)


def cnnnet2_forward(x, params):
    """CNNnet2 forward; x is NCHW (B, 1, H, W); returns NCHW (B, 128, h, w)."""
    y1 = _conv1_stage(x, params["conv1_w"], params["conv1_b"],
                      params["bn1_gamma"], params["bn1_beta"],
                      params["bn1_mean"], params["bn1_var"])      # (B, PH1, PW1, 64)
    y3 = _conv3_se_stage(y1, params["conv3_w"], params["conv3_b"],
                         params["bn3_gamma"], params["bn3_beta"],
                         params["bn3_mean"], params["bn3_var"],
                         params["se_fc1_w"], params["se_fc2_w"])  # (B, PH2, PW2, 128)
    return y3.transpose(0, 3, 1, 2)                               # NCHW


# ---------------------------------------------------------------------------
# Pure-JAX reference (mirrors the PyTorch forward, eval-mode BN, f32 HIGHEST)
# ---------------------------------------------------------------------------

def cnnnet2_reference(x, params):
    def bn(y, gamma, beta, mean, var):
        inv = gamma / jnp.sqrt(var + _BN_EPS)
        return ((y - mean[None, :, None, None]) * inv[None, :, None, None]
                + beta[None, :, None, None])

    def maxpool2(y):
        B, C, H, W = y.shape
        y = y[:, :, :(H // 2) * 2, :(W // 2) * 2]
        return y.reshape(B, C, H // 2, 2, W // 2, 2).max(axis=(3, 5))

    def conv(y, w, b, stride, pad):
        y = lax.conv_general_dilated(
            y, w, window_strides=(stride, stride),
            padding=[(pad, pad), (pad, pad)],
            dimension_numbers=("NCHW", "OIHW", "NCHW"), precision=_HIGHEST)
        return y + b[None, :, None, None]

    y = conv(x, params["conv1_w"], params["conv1_b"], 7, 1)
    y = maxpool2(jnp.maximum(bn(y, params["bn1_gamma"], params["bn1_beta"],
                                params["bn1_mean"], params["bn1_var"]), 0.0))
    y = conv(y, params["conv3_w"], params["conv3_b"], 2, 1)
    y = maxpool2(jnp.maximum(bn(y, params["bn3_gamma"], params["bn3_beta"],
                                params["bn3_mean"], params["bn3_var"]), 0.0))
    s = y.mean(axis=(2, 3))                                       # (B, 128)
    s = jnp.maximum(jnp.dot(s, params["se_fc1_w"], precision=_HIGHEST), 0.0)
    s = jax.nn.sigmoid(jnp.dot(s, params["se_fc2_w"], precision=_HIGHEST))
    return y * s[:, :, None, None]


if __name__ == "__main__":
    # Smallest "natural" shapes for this net: 140x140 -> conv1 20x20 -> pool 10x10
    # -> conv3 4x4 -> pool 2x2 -> SE over 2x2 spatial.
    B, H, W = 2, 140, 140
    key = jax.random.PRNGKey(0)
    ks = jax.random.split(key, 16)

    x = jax.random.normal(ks[0], (B, 1, H, W), dtype=jnp.float32)

    params = {
        # conv weights are PyTorch-style OIHW; Linear weights stored as (in, out).
        "conv1_w": jax.random.normal(ks[1], (64, 1, 7, 7), jnp.float32) * 0.05,
        "conv1_b": jax.random.normal(ks[2], (64,), jnp.float32) * 0.05,
        "bn1_gamma": 1.0 + 0.1 * jax.random.normal(ks[3], (64,), jnp.float32),
        "bn1_beta": 0.1 * jax.random.normal(ks[4], (64,), jnp.float32),
        "bn1_mean": 0.1 * jax.random.normal(ks[5], (64,), jnp.float32),
        "bn1_var": 1.0 + 0.5 * jax.random.uniform(ks[6], (64,), jnp.float32),
        "conv3_w": jax.random.normal(ks[7], (128, 64, 5, 5), jnp.float32) * 0.02,
        "conv3_b": jax.random.normal(ks[8], (128,), jnp.float32) * 0.05,
        "bn3_gamma": 1.0 + 0.1 * jax.random.normal(ks[9], (128,), jnp.float32),
        "bn3_beta": 0.1 * jax.random.normal(ks[10], (128,), jnp.float32),
        "bn3_mean": 0.1 * jax.random.normal(ks[11], (128,), jnp.float32),
        "bn3_var": 1.0 + 0.5 * jax.random.uniform(ks[12], (128,), jnp.float32),
        # SE block: Linear(128 -> 8, bias=False), Linear(8 -> 128, bias=False).
        "se_fc1_w": jax.random.normal(ks[13], (128, 8), jnp.float32) * 0.1,
        "se_fc2_w": jax.random.normal(ks[14], (8, 128), jnp.float32) * 0.1,
    }

    fwd = jax.jit(cnnnet2_forward)
    y = jax.block_until_ready(fwd(x, params))
    assert y.shape == (B, 128, 2, 2), y.shape

    y_ref = jax.block_until_ready(cnnnet2_reference(x, params))
    # bf16 single-pass MXU in the kernel vs f32 HIGHEST reference -> looser tol.
    np.testing.assert_allclose(np.asarray(y), np.asarray(y_ref),
                               rtol=2e-2, atol=2e-2)

    print("KERNEL_OK")
</pallas_src>

<mosaic_0001>
module attributes {stable_mosaic.version = 11 : i64} {
  func.func @_conv_pool_kernel(%arg0: i32, %arg1: memref<4x208x128xbf16, #tpu.memory_space<vmem>>, %arg2: memref<128x128xbf16, #tpu.memory_space<vmem>>, %arg3: memref<1x128xf32, #tpu.memory_space<vmem>>, %arg4: memref<208x128xbf16, #tpu.memory_space<vmem>>) attributes {dimension_semantics = [#tpu.dimension_semantics<parallel>], iteration_bounds = array<i64: 1>, scalar_prefetch = 0 : i64, scratch_operands = 0 : i64, tpu.core_type = #tpu.core_type<tc>, window_params = [{transform_indices = @transform_0, window_bounds = array<i64: 4, 208, 128>}, {pipeline_mode = #tpu.pipeline_mode<synchronous>, transform_indices = @transform_1, window_bounds = array<i64: 128, 128>}, {pipeline_mode = #tpu.pipeline_mode<synchronous>, transform_indices = @transform_2, window_bounds = array<i64: 1, 128>}, {transform_indices = @transform_3, window_bounds = array<i64: 208, 128>}]} {
    %c0 = arith.constant 0 : index
    %c0_0 = arith.constant 0 : index
    %0 = vector.load %arg2[%c0, %c0_0] : memref<128x128xbf16, #tpu.memory_space<vmem>>, vector<128x128xbf16>
    %c0_1 = arith.constant 0 : index
    %c0_2 = arith.constant 0 : index
    %c0_3 = arith.constant 0 : index
    %1 = vector.load %arg1[%c0_1, %c0_2, %c0_3] : memref<4x208x128xbf16, #tpu.memory_space<vmem>>, vector<1x208x128xbf16>
    %2 = vector.shape_cast %1 : vector<1x208x128xbf16> to vector<208x128xbf16>
    %cst = arith.constant dense<0.000000e+00> : vector<208x128xf32>
    %3 = tpu.matmul %2, %0, %cst {dimension_numbers = #tpu.dot_dimension_numbers<[1], [0], [0], [1], [0, 0, 1, 1], [], []>} : vector<208x128xbf16>, vector<128x128xbf16>, vector<208x128xf32> -> vector<208x128xf32>
    %c1 = arith.constant 1 : index
    %c0_4 = arith.constant 0 : index
    %c0_5 = arith.constant 0 : index
    %4 = vector.load %arg1[%c1, %c0_4, %c0_5] : memref<4x208x128xbf16, #tpu.memory_space<vmem>>, vector<1x208x128xbf16>
    %5 = vector.shape_cast %4 : vector<1x208x128xbf16> to vector<208x128xbf16>
    %cst_6 = arith.constant dense<0.000000e+00> : vector<208x128xf32>
    %6 = tpu.matmul %5, %0, %cst_6 {dimension_numbers = #tpu.dot_dimension_numbers<[1], [0], [0], [1], [0, 0, 1, 1], [], []>} : vector<208x128xbf16>, vector<128x128xbf16>, vector<208x128xf32> -> vector<208x128xf32>
    %7 = arith.maximumf %3, %6 : vector<208x128xf32>
    %c2 = arith.constant 2 : index
    %c0_7 = arith.constant 0 : index
    %c0_8 = arith.constant 0 : index
    %8 = vector.load %arg1[%c2, %c0_7, %c0_8] : memref<4x208x128xbf16, #tpu.memory_space<vmem>>, vector<1x208x128xbf16>
    %9 = vector.shape_cast %8 : vector<1x208x128xbf16> to vector<208x128xbf16>
    %cst_9 = arith.constant dense<0.000000e+00> : vector<208x128xf32>
    %10 = tpu.matmul %9, %0, %cst_9 {dimension_numbers = #tpu.dot_dimension_numbers<[1], [0], [0], [1], [0, 0, 1, 1], [], []>} : vector<208x128xbf16>, vector<128x128xbf16>, vector<208x128xf32> -> vector<208x128xf32>
    %11 = arith.maximumf %7, %10 : vector<208x128xf32>
    %c3 = arith.constant 3 : index
    %c0_10 = arith.constant 0 : index
    %c0_11 = arith.constant 0 : index
    %12 = vector.load %arg1[%c3, %c0_10, %c0_11] : memref<4x208x128xbf16, #tpu.memory_space<vmem>>, vector<1x208x128xbf16>
    %13 = vector.shape_cast %12 : vector<1x208x128xbf16> to vector<208x128xbf16>
    %cst_12 = arith.constant dense<0.000000e+00> : vector<208x128xf32>
    %14 = tpu.matmul %13, %0, %cst_12 {dimension_numbers = #tpu.dot_dimension_numbers<[1], [0], [0], [1], [0, 0, 1, 1], [], []>} : vector<208x128xbf16>, vector<128x128xbf16>, vector<208x128xf32> -> vector<208x128xf32>
    %15 = arith.maximumf %11, %14 : vector<208x128xf32>
    %c0_13 = arith.constant 0 : index
    %c0_14 = arith.constant 0 : index
    %16 = vector.load %arg3[%c0_13, %c0_14] : memref<1x128xf32, #tpu.memory_space<vmem>>, vector<1x128xf32>
    %17 = vector.broadcast %16 : vector<1x128xf32> to vector<208x128xf32>
    %18 = arith.addf %15, %17 : vector<208x128xf32>
    %cst_15 = arith.constant 0.000000e+00 : f32
    %19 = vector.broadcast %cst_15 : f32 to vector<208x128xf32>
    %20 = arith.maximumf %18, %19 : vector<208x128xf32>
    %21 = arith.truncf %20 : vector<208x128xf32> to vector<208x128xbf16>
    %c0_16 = arith.constant 0 : index
    %c0_17 = arith.constant 0 : index
    %22 = vector.load %arg4[%c0_16, %c0_17] : memref<208x128xbf16, #tpu.memory_space<vmem>>, vector<208x128xbf16>
    tpu.vector_store %arg4[%c0_16, %c0_17], %21 {strides = array<i32>} : memref<208x128xbf16, #tpu.memory_space<vmem>>, vector<208x128xbf16>,
    return
  }
  func.func @transform_0(%arg0: i32) -> (i32, i32, i32) {
    %c0_i32 = arith.constant 0 : i32
    %c0_i32_0 = arith.constant 0 : i32
    %c0_i32_1 = arith.constant 0 : i32
    return %c0_i32, %arg0, %c0_i32_0 : i32, i32, i32
  }
  func.func @transform_1(%arg0: i32) -> (i32, i32) {
    %c0_i32 = arith.constant 0 : i32
    %c0_i32_0 = arith.constant 0 : i32
    %c0_i32_1 = arith.constant 0 : i32
    return %c0_i32, %c0_i32_0 : i32, i32
  }
  func.func @transform_2(%arg0: i32) -> (i32, i32) {
    %c0_i32 = arith.constant 0 : i32
    %c0_i32_0 = arith.constant 0 : i32
    %c0_i32_1 = arith.constant 0 : i32
    return %c0_i32, %c0_i32_0 : i32, i32
  }
  func.func @transform_3(%arg0: i32) -> (i32, i32) {
    %c0_i32 = arith.constant 0 : i32
    %c0_i32_0 = arith.constant 0 : i32
    return %arg0, %c0_i32 : i32, i32
  }
}

module attributes {stable_mosaic.version = 11 : i64} {
  func.func @_conv3_se_kernel(%arg0: i32, %arg1: memref<1x4x4x1600xbf16, #tpu.memory_space<vmem>>, %arg2: memref<1600x128xbf16, #tpu.memory_space<vmem>>, %arg3: memref<1x128xf32, #tpu.memory_space<vmem>>, %arg4: memref<128x8xf32, #tpu.memory_space<vmem>>, %arg5: memref<8x128xf32, #tpu.memory_space<vmem>>, %arg6: memref<1x4x128xf32, #tpu.memory_space<vmem>>) attributes {dimension_semantics = [#tpu.dimension_semantics<parallel>], iteration_bounds = array<i64: 2>, scalar_prefetch = 0 : i64, scratch_operands = 0 : i64, tpu.core_type = #tpu.core_type<tc>, window_params = [{transform_indices = @transform_0, window_bounds = array<i64: 1, 4, 4, 1600>}, {pipeline_mode = #tpu.pipeline_mode<synchronous>, transform_indices = @transform_1, window_bounds = array<i64: 1600, 128>}, {pipeline_mode = #tpu.pipeline_mode<synchronous>, transform_indices = @transform_2, window_bounds = array<i64: 1, 128>}, {pipeline_mode = #tpu.pipeline_mode<synchronous>, transform_indices = @transform_3, window_bounds = array<i64: 128, 8>}, {pipeline_mode = #tpu.pipeline_mode<synchronous>, transform_indices = @transform_4, window_bounds = array<i64: 8, 128>}, {transform_indices = @transform_5, window_bounds = array<i64: 1, 4, 128>}]} {
    %c0 = arith.constant 0 : index
    %c0_0 = arith.constant 0 : index
    %0 = vector.load %arg2[%c0, %c0_0] : memref<1600x128xbf16, #tpu.memory_space<vmem>>, vector<1600x128xbf16>
    %c0_1 = arith.constant 0 : index
    %c0_2 = arith.constant 0 : index
    %c0_3 = arith.constant 0 : index
    %c0_4 = arith.constant 0 : index
    %1 = vector.load %arg1[%c0_1, %c0_2, %c0_3, %c0_4] : memref<1x4x4x1600xbf16, #tpu.memory_space<vmem>>, vector<1x1x4x1600xbf16>
    %2 = vector.shape_cast %1 : vector<1x1x4x1600xbf16> to vector<4x1600xbf16>
    %cst = arith.constant dense<0.000000e+00> : vector<4x128xf32>
    %3 = tpu.matmul %2, %0, %cst {dimension_numbers = #tpu.dot_dimension_numbers<[1], [0], [0], [1], [0, 0, 1, 1], [], []>} : vector<4x1600xbf16>, vector<1600x128xbf16>, vector<4x128xf32> -> vector<4x128xf32>
    %c0_5 = arith.constant 0 : index
    %c1 = arith.constant 1 : index
    %c0_6 = arith.constant 0 : index
    %c0_7 = arith.constant 0 : index
    %4 = vector.load %arg1[%c0_5, %c1, %c0_6, %c0_7] : memref<1x4x4x1600xbf16, #tpu.memory_space<vmem>>, vector<1x1x4x1600xbf16>
    %5 = vector.shape_cast %4 : vector<1x1x4x1600xbf16> to vector<4x1600xbf16>
    %cst_8 = arith.constant dense<0.000000e+00> : vector<4x128xf32>
    %6 = tpu.matmul %5, %0, %cst_8 {dimension_numbers = #tpu.dot_dimension_numbers<[1], [0], [0], [1], [0, 0, 1, 1], [], []>} : vector<4x1600xbf16>, vector<1600x128xbf16>, vector<4x128xf32> -> vector<4x128xf32>
    %7 = arith.maximumf %3, %6 : vector<4x128xf32>
    %c0_9 = arith.constant 0 : index
    %c2 = arith.constant 2 : index
    %c0_10 = arith.constant 0 : index
    %c0_11 = arith.constant 0 : index
    %8 = vector.load %arg1[%c0_9, %c2, %c0_10, %c0_11] : memref<1x4x4x1600xbf16, #tpu.memory_space<vmem>>, vector<1x1x4x1600xbf16>
    %9 = vector.shape_cast %8 : vector<1x1x4x1600xbf16> to vector<4x1600xbf16>
    %cst_12 = arith.constant dense<0.000000e+00> : vector<4x128xf32>
    %10 = tpu.matmul %9, %0, %cst_12 {dimension_numbers = #tpu.dot_dimension_numbers<[1], [0], [0], [1], [0, 0, 1, 1], [], []>} : vector<4x1600xbf16>, vector<1600x128xbf16>, vector<4x128xf32> -> vector<4x128xf32>
    %11 = arith.maximumf %7, %10 : vector<4x128xf32>
    %c0_13 = arith.constant 0 : index
    %c3 = arith.constant 3 : index
    %c0_14 = arith.constant 0 : index
    %c0_15 = arith.constant 0 : index
    %12 = vector.load %arg1[%c0_13, %c3, %c0_14, %c0_15] : memref<1x4x4x1600xbf16, #tpu.memory_space<vmem>>, vector<1x1x4x1600xbf16>
    %13 = vector.shape_cast %12 : vector<1x1x4x1600xbf16> to vector<4x1600xbf16>
    %cst_16 = arith.constant dense<0.000000e+00> : vector<4x128xf32>
    %14 = tpu.matmul %13, %0, %cst_16 {dimension_numbers = #tpu.dot_dimension_numbers<[1], [0], [0], [1], [0, 0, 1, 1], [], []>} : vector<4x1600xbf16>, vector<1600x128xbf16>, vector<4x128xf32> -> vector<4x128xf32>
    %15 = arith.maximumf %11, %14 : vector<4x128xf32>
    %c0_17 = arith.constant 0 : index
    %c0_18 = arith.constant 0 : index
    %16 = vector.load %arg3[%c0_17, %c0_18] : memref<1x128xf32, #tpu.memory_space<vmem>>, vector<1x128xf32>
    %17 = vector.broadcast %16 : vector<1x128xf32> to vector<4x128xf32>
    %18 = arith.addf %15, %17 : vector<4x128xf32>
    %cst_19 = arith.constant 0.000000e+00 : f32
    %19 = vector.broadcast %cst_19 : f32 to vector<4x128xf32>
    %20 = arith.maximumf %18, %19 : vector<4x128xf32>
    %cst_20 = arith.constant dense<0.000000e+00> : vector<128xf32>
    %21 = vector.multi_reduction <add>, %20, %cst_20 [0] : vector<4x128xf32> to vector<128xf32>
    %22 = vector.shape_cast %21 : vector<128xf32> to vector<1x128xf32>
    %cst_21 = arith.constant 4.000000e+00 : f32
    %23 = vector.broadcast %cst_21 : f32 to vector<1x128xf32>
    %24 = arith.divf %22, %23 : vector<1x128xf32>
    %c0_22 = arith.constant 0 : index
    %c0_23 = arith.constant 0 : index
    %25 = vector.load %arg4[%c0_22, %c0_23] : memref<128x8xf32, #tpu.memory_space<vmem>>, vector<128x8xf32>
    %cst_24 = arith.constant dense<0.000000e+00> : vector<1x8xf32>
    %26 = tpu.matmul %24, %25, %cst_24 {dimension_numbers = #tpu.dot_dimension_numbers<[1], [0], [0], [1], [0, 0, 1, 1], [], []>} : vector<1x128xf32>, vector<128x8xf32>, vector<1x8xf32> -> vector<1x8xf32>
    %cst_25 = arith.constant 0.000000e+00 : f32
    %27 = vector.broadcast %cst_25 : f32 to vector<1x8xf32>
    %28 = arith.maximumf %26, %27 : vector<1x8xf32>
    %c0_26 = arith.constant 0 : index
    %c0_27 = arith.constant 0 : index
    %29 = vector.load %arg5[%c0_26, %c0_27] : memref<8x128xf32, #tpu.memory_space<vmem>>, vector<8x128xf32>
    %cst_28 = arith.constant dense<0.000000e+00> : vector<1x128xf32>
    %30 = tpu.matmul %28, %29, %cst_28 {dimension_numbers = #tpu.dot_dimension_numbers<[1], [0], [0], [1], [0, 0, 1, 1], [], []>} : vector<1x8xf32>, vector<8x128xf32>, vector<1x128xf32> -> vector<1x128xf32>
    %31 = arith.negf %30 : vector<1x128xf32>
    %32 = math.exp %31 : vector<1x128xf32>
    %cst_29 = arith.constant 1.000000e+00 : f32
    %33 = vector.broadcast %cst_29 : f32 to vector<1x128xf32>
    %34 = arith.addf %33, %32 : vector<1x128xf32>
    %35 = arith.divf %33, %34 : vector<1x128xf32>
    %36 = vector.broadcast %35 : vector<1x128xf32> to vector<4x128xf32>
    %37 = arith.mulf %20, %36 : vector<4x128xf32>
    %c0_30 = arith.constant 0 : index
    %c0_31 = arith.constant 0 : index
    %c0_32 = arith.constant 0 : index
    %38 = vector.load %arg6[%c0_30, %c0_31, %c0_32] : memref<1x4x128xf32, #tpu.memory_space<vmem>>, vector<1x4x128xf32>
    %39 = vector.shape_cast %38 : vector<1x4x128xf32> to vector<4x128xf32>
    %40 = vector.shape_cast %37 : vector<4x128xf32> to vector<1x4x128xf32>
    tpu.vector_store %arg6[%c0_30, %c0_31, %c0_32], %40 {strides = array<i32>} : memref<1x4x128xf32, #tpu.memory_space<vmem>>, vector<1x4x128xf32>,
    return
  }
  func.func @transform_0(%arg0: i32) -> (i32, i32, i32, i32) {
    %c0_i32 = arith.constant 0 : i32
    %c0_i32_0 = arith.constant 0 : i32
    %c0_i32_1 = arith.constant 0 : i32
    %c0_i32_2 = arith.constant 0 : i32
    return %arg0, %c0_i32, %c0_i32_0, %c0_i32_1 : i32, i32, i32, i32
  }
  func.func @transform_1(%arg0: i32) -> (i32, i32) {
    %c0_i32 = arith.constant 0 : i32
    %c0_i32_0 = arith.constant 0 : i32
    %c0_i32_1 = arith.constant 0 : i32
    return %c0_i32, %c0_i32_0 : i32, i32
  }
  func.func @transform_2(%arg0: i32) -> (i32, i32) {
    %c0_i32 = arith.constant 0 : i32
    %c0_i32_0 = arith.constant 0 : i32
    %c0_i32_1 = arith.constant 0 : i32
    return %c0_i32, %c0_i32_0 : i32, i32
  }
  func.func @transform_3(%arg0: i32) -> (i32, i32) {
    %c0_i32 = arith.constant 0 : i32
    %c0_i32_0 = arith.constant 0 : i32
    %c0_i32_1 = arith.constant 0 : i32
    return %c0_i32, %c0_i32_0 : i32, i32
  }
  func.func @transform_4(%arg0: i32) -> (i32, i32) {
    %c0_i32 = arith.constant 0 : i32
    %c0_i32_0 = arith.constant 0 : i32
    %c0_i32_1 = arith.constant 0 : i32
    return %c0_i32, %c0_i32_0 : i32, i32
  }
  func.func @transform_5(%arg0: i32) -> (i32, i32, i32) {
    %c0_i32 = arith.constant 0 : i32
    %c0_i32_0 = arith.constant 0 : i32
    %c0_i32_1 = arith.constant 0 : i32
    return %arg0, %c0_i32, %c0_i32_0 : i32, i32, i32
  }
}

</mosaic_0001>

<bundles_post_ra>
// kernel: cnnnet2_forward.2
= control target key start
LH: loop header
LB: loop body
LE: loop exit
PB: predicated region body
PF: predicated region fallthrough
CT: control target
= control target key end

     0   :  { %v2003_v0 = vmov 0.0   ;;  %vm2004_vm0 = vmmov 0   ;;  %s2645_s1 = inlined_call_operand.vmem [shape: bf16[128,128], index: 1, kind: input, shape index: {}]   ;;  %s2646_s0 = inlined_call_operand.vmem [shape: bf16[4,208,128], index: 0, kind: input, shape index: {}]   ;;  %s2647_s2 = inlined_call_operand.vmem [shape: f32[1,128], index: 2, kind: input, shape index: {}]   ;;  %s2648_s3 = inlined_call_operand.vmem [shape: bf16[208,128], index: 3, kind: output, shape index: {}]  }
   0x1   :  { %1669 = vmatprep.subr.bf16.mxu0 %v2003_v0  ;;  %1737 = vmatprep.subr.bf16.mxu1 %v2003_v0  ;;  %v1943_v1 = vld [vmem:[%s2645_s1] sm:$0xff]   ;;  %v1944_v2 = vld [vmem:[%s2645_s1 + $0x8] sm:$0xff]   ;;  %v1945_v3 = vld [vmem:[%s2645_s1 + $0x10] sm:$0xff]  }
   0x2   :  { %1685 = vmatprep.mubr.msk.bf16.mxu0 %vm2004_vm0, %v2003_v0  ;;  %1753 = vmatprep.mubr.msk.bf16.mxu1 %vm2004_vm0, %v2003_v0  ;;  %v1946_v4 = vld [vmem:[%s2645_s1 + $0x18] sm:$0xff]   ;;  %v1947_v5 = vld [vmem:[%s2645_s1 + $0x20] sm:$0xff]   ;;  %v1948_v6 = vld [vmem:[%s2645_s1 + $0x28] sm:$0xff]  }
   0x3   :  { %1670 = vmatpush3.bf16.msra.mxu0 %v1943_v1  ;;  %1738 = vmatpush3.bf16.msra.mxu1 %v1943_v1  ;;  %v1949_v7 = vld [vmem:[%s2645_s1 + $0x30] sm:$0xff]   ;;  %v1950_v8 = vld [vmem:[%s2645_s1 + $0x38] sm:$0xff]   ;;  %v1951_v9 = vld [vmem:[%s2646_s0] sm:$0xff]  }
   0x4   :  { %1671 = vmatprep.subr.bf16.mxu0 %v2003_v0  ;;  %1739 = vmatprep.subr.bf16.mxu1 %v2003_v0  ;;  %v1952_v10 = vld [vmem:[%s2646_s0 + $0x68] sm:$0xff]   ;;  %v1954_v12 = vld [vmem:[%s2646_s0 + $0x70] sm:$0xff]   ;;  %v1956_v14 = vld [vmem:[%s2646_s0 + $0x78] sm:$0xff]  }
   0x5   :  { %v1953_v11 = vld [vmem:[%s2646_s0 + $0x8] sm:$0xff]   ;;  %v1955_v13 = vld [vmem:[%s2646_s0 + $0x10] sm:$0xff]   ;;  %v1957_v15 = vld [vmem:[%s2646_s0 + $0x18] sm:$0xff]  }
   0x6   :  { %v1958_v16 = vld [vmem:[%s2646_s0 + $0x80] sm:$0xff]   ;;  %v1960_v18 = vld [vmem:[%s2646_s0 + $0x88] sm:$0xff]   ;;  %v1962_v20 = vld [vmem:[%s2646_s0 + $0x90] sm:$0xff]  }
   0x7   :  { %1672 = vmatpush3.bf16.msra.mxu0 %v1944_v2  ;;  %1740 = vmatpush3.bf16.msra.mxu1 %v1944_v2  ;;  %v1959_v17 = vld [vmem:[%s2646_s0 + $0x20] sm:$0xff]   ;;  %v1961_v19 = vld [vmem:[%s2646_s0 + $0x28] sm:$0xff]   ;;  %v1963_v21 = vld [vmem:[%s2646_s0 + $0x30] sm:$0xff]  }
   0x8   :  { %1673 = vmatprep.subr.bf16.mxu0 %v2003_v0  ;;  %1741 = vmatprep.subr.bf16.mxu1 %v2003_v0  ;;  %v1964_v22 = vld [vmem:[%s2646_s0 + $0x98] sm:$0xff]   ;;  %v1966_v24 = vld [vmem:[%s2646_s0 + $0xa0] sm:$0xff]   ;;  %v1968_v26 = vld [vmem:[%s2646_s0 + $0xa8] sm:$0xff]  }
   0x9   :  { %v1965_v23 = vld [vmem:[%s2646_s0 + $0x38] sm:$0xff]   ;;  %v1967_v25 = vld [vmem:[%s2646_s0 + $0x40] sm:$0xff]   ;;  %v1969_v27 = vld [vmem:[%s2646_s0 + $0x48] sm:$0xff]  }
   0xa   :  { %v1970_v28 = vld [vmem:[%s2646_s0 + $0xb0] sm:$0xff]   ;;  %v1972_v30 = vld [vmem:[%s2646_s0 + $0xb8] sm:$0xff]   ;;  %v1974_v32 = vld [vmem:[%s2646_s0 + $0xc0] sm:$0xff]  }
   0xb   :  { %1674 = vmatpush3.bf16.msra.mxu0 %v1945_v3  ;;  %1742 = vmatpush3.bf16.msra.mxu1 %v1945_v3  ;;  %v1971_v29 = vld [vmem:[%s2646_s0 + $0x50] sm:$0xff]   ;;  %v1973_v31 = vld [vmem:[%s2646_s0 + $0x58] sm:$0xff]   ;;  %v1975_v33 = vld [vmem:[%s2646_s0 + $0x60] sm:$0xff]  }
   0xc   :  { %1675 = vmatprep.subr.bf16.mxu0 %v2003_v0  ;;  %1743 = vmatprep.subr.bf16.mxu1 %v2003_v0  ;;  %v1976_v34 = vld [vmem:[%s2646_s0 + $0xc8] sm:$0xff]   ;;  %v1977_v35 = vld [vmem:[%s2646_s0 + $0xd0] sm:$0xff]   ;;  %v1978_v36 = vld [vmem:[%s2646_s0 + $0x138] sm:$0xff]  }
   0xd   :  { %v1979_v37 = vld [vmem:[%s2646_s0 + $0xd8] sm:$0xff]   ;;  %v1980_v38 = vld [vmem:[%s2646_s0 + $0x140] sm:$0xff]   ;;  %v1982_v40 = vld [vmem:[%s2646_s0 + $0x148] sm:$0xff]  }
   0xe   :  { %v1981_v39 = vld [vmem:[%s2646_s0 + $0xe0] sm:$0xff]   ;;  %v1983_v41 = vld [vmem:[%s2646_s0 + $0xe8] sm:$0xff]   ;;  %v1984_v42 = vld [vmem:[%s2646_s0 + $0x150] sm:$0xff]  }
   0xf   :  { %1676 = vmatpush3.bf16.msra.mxu0 %v1946_v4  ;;  %1744 = vmatpush3.bf16.msra.mxu1 %v1946_v4  ;;  %v1985_v43 = vld [vmem:[%s2646_s0 + $0xf0] sm:$0xff]   ;;  %v1986_v44 = vld [vmem:[%s2646_s0 + $0x158] sm:$0xff]   ;;  %v1988_v46 = vld [vmem:[%s2646_s0 + $0x160] sm:$0xff]  }
  0x10   :  { %1677 = vmatprep.subr.bf16.mxu0 %v2003_v0  ;;  %1745 = vmatprep.subr.bf16.mxu1 %v2003_v0  ;;  %v1987_v45 = vld [vmem:[%s2646_s0 + $0xf8] sm:$0xff]   ;;  %v1989_v47 = vld [vmem:[%s2646_s0 + $0x100] sm:$0xff]   ;;  %v1990_v48 = vld [vmem:[%s2646_s0 + $0x168] sm:$0xff]  }
  0x11   :  { %v1991_v49 = vld [vmem:[%s2646_s0 + $0x108] sm:$0xff]   ;;  %v1992_v50 = vld [vmem:[%s2646_s0 + $0x170] sm:$0xff]   ;;  %v1994_v52 = vld [vmem:[%s2646_s0 + $0x178] sm:$0xff]  }
  0x12   :  { %v1993_v51 = vld [vmem:[%s2646_s0 + $0x110] sm:$0xff]   ;;  %v1995_v53 = vld [vmem:[%s2646_s0 + $0x118] sm:$0xff]   ;;  %v1996_v54 = vld [vmem:[%s2646_s0 + $0x180] sm:$0xff]  }
  0x13   :  { %1678 = vmatpush3.bf16.msra.mxu0 %v1947_v5  ;;  %1746 = vmatpush3.bf16.msra.mxu1 %v1947_v5  ;;  %v1997_v55 = vld [vmem:[%s2646_s0 + $0x120] sm:$0xff]   ;;  %v1998_v56 = vld [vmem:[%s2646_s0 + $0x188] sm:$0xff]   ;;  %v2000_v58 = vld [vmem:[%s2646_s0 + $0x190] sm:$0xff]  }
  0x14   :  { %1679 = vmatprep.subr.bf16.mxu0 %v2003_v0  ;;  %1747 = vmatprep.subr.bf16.mxu1 %v2003_v0  ;;  %v1999_v57 = vld [vmem:[%s2646_s0 + $0x128] sm:$0xff]   ;;  %v2001_v59 = vld [vmem:[%s2646_s0 + $0x130] sm:$0xff]   ;;  %v2002_v60 = vld [vmem:[%s2646_s0 + $0x198] sm:$0xff]  }
  0x17   :  { %1680 = vmatpush3.bf16.msra.mxu0 %v1948_v6  ;;  %1748 = vmatpush3.bf16.msra.mxu1 %v1948_v6 }
  0x18   :  { %1681 = vmatprep.subr.bf16.mxu0 %v2003_v0  ;;  %1749 = vmatprep.subr.bf16.mxu1 %v2003_v0 }
  0x1b   :  { %1682 = vmatpush3.bf16.msra.mxu0 %v1949_v7  ;;  %1750 = vmatpush3.bf16.msra.mxu1 %v1949_v7 }
  0x1c   :  { %1683 = vmatprep.subr.bf16.mxu0 %v2003_v0  ;;  %1751 = vmatprep.subr.bf16.mxu1 %v2003_v0 }
  0x1f   :  { %1684 = vmatpush3.bf16.msra.mxu0 %v1950_v8  ;;  %1752 = vmatpush3.bf16.msra.mxu1 %v1950_v8 }
  0x20   :  { %1805 = vmatprep.subr.bf16.mxu0 %v2003_v0  ;;  %1873 = vmatprep.subr.bf16.mxu1 %v2003_v0 }
  0x22   :  { %1686 = vmatmul.mubr.bf16.vlgmr.msra.gmra.mrb[0].mxu0 %v1951_v9  ;;  %1754 = vmatmul.mubr.bf16.vlgmr.msra.gmra.mrb[0].mxu1 %v1952_v10 }
  0x23   :  { %1806 = vmatpush3.bf16.msra.mxu0 %v1943_v1  ;;  %1874 = vmatpush3.bf16.msra.mxu1 %v1943_v1 }
  0x24   :  { %1689 = vmatprep.mubr.msk.bf16.mxu0 %vm2004_vm0, %v2003_v0  ;;  %1757 = vmatprep.mubr.msk.bf16.mxu1 %vm2004_vm0, %v2003_v0 }
  0x25   :  { %1807 = vmatprep.subr.bf16.mxu0 %v2003_v0  ;;  %1875 = vmatprep.subr.bf16.mxu1 %v2003_v0 }
  0x27   :  { %1808 = vmatpush3.bf16.msra.mxu0 %v1944_v2  ;;  %1876 = vmatpush3.bf16.msra.mxu1 %v1944_v2 }
  0x28   :  { %1809 = vmatprep.subr.bf16.mxu0 %v2003_v0  ;;  %1877 = vmatprep.subr.bf16.mxu1 %v2003_v0 }
  0x2a   :  { %1690 = vmatmul.mubr.bf16.gmra.mrb[4].mxu0 %v1953_v11  ;;  %1758 = vmatmul.mubr.bf16.gmra.mrb[4].mxu1 %v1954_v12 }
  0x2b   :  { %1693 = vmatprep.mubr.msk.bf16.mxu0 %vm2004_vm0, %v2003_v0  ;;  %1761 = vmatprep.mubr.msk.bf16.mxu1 %vm2004_vm0, %v2003_v0 }
  0x2c   :  { %1810 = vmatpush3.bf16.msra.mxu0 %v1945_v3  ;;  %1878 = vmatpush3.bf16.msra.mxu1 %v1945_v3 }
  0x2d   :  { %1811 = vmatprep.subr.bf16.mxu0 %v2003_v0  ;;  %1879 = vmatprep.subr.bf16.mxu1 %v2003_v0 }
  0x30   :  { %1812 = vmatpush3.bf16.msra.mxu0 %v1946_v4  ;;  %1880 = vmatpush3.bf16.msra.mxu1 %v1946_v4 }
  0x31   :  { %1813 = vmatprep.subr.bf16.mxu0 %v2003_v0  ;;  %1881 = vmatprep.subr.bf16.mxu1 %v2003_v0 }
  0x32   :  { %1694 = vmatmul.mubr.bf16.gmra.mrb[8].mxu0 %v1955_v13  ;;  %1762 = vmatmul.mubr.bf16.gmra.mrb[8].mxu1 %v1956_v14 }
  0x33   :  { %1697 = vmatprep.mubr.msk.bf16.mxu0 %vm2004_vm0, %v2003_v0  ;;  %1765 = vmatprep.mubr.msk.bf16.mxu1 %vm2004_vm0, %v2003_v0 }
  0x34   :  { %1814 = vmatpush3.bf16.msra.mxu0 %v1947_v5  ;;  %1882 = vmatpush3.bf16.msra.mxu1 %v1947_v5 }
  0x35   :  { %1815 = vmatprep.subr.bf16.mxu0 %v2003_v0  ;;  %1883 = vmatprep.subr.bf16.mxu1 %v2003_v0 }
  0x38   :  { %1816 = vmatpush3.bf16.msra.mxu0 %v1948_v6  ;;  %1884 = vmatpush3.bf16.msra.mxu1 %v1948_v6 }
  0x39   :  { %1817 = vmatprep.subr.bf16.mxu0 %v2003_v0  ;;  %1885 = vmatprep.subr.bf16.mxu1 %v2003_v0 }
  0x3a   :  { %1698 = vmatmul.mubr.bf16.gmra.mrb[12].mxu0 %v1957_v15  ;;  %1766 = vmatmul.mubr.bf16.gmra.mrb[12].mxu1 %v1958_v16 }
  0x3b   :  { %1701 = vmatprep.mubr.msk.bf16.mxu0 %vm2004_vm0, %v2003_v0  ;;  %1769 = vmatprep.mubr.msk.bf16.mxu1 %vm2004_vm0, %v2003_v0 }
  0x3c   :  { %1818 = vmatpush3.bf16.msra.mxu0 %v1949_v7  ;;  %1886 = vmatpush3.bf16.msra.mxu1 %v1949_v7 }
  0x3d   :  { %1819 = vmatprep.subr.bf16.mxu0 %v2003_v0  ;;  %1887 = vmatprep.subr.bf16.mxu1 %v2003_v0 }
  0x40   :  { %1820 = vmatpush3.bf16.msra.mxu0 %v1950_v8  ;;  %1888 = vmatpush3.bf16.msra.mxu1 %v1950_v8 }
  0x42   :  { %1702 = vmatmul.mubr.bf16.gmra.mrb[16].mxu0 %v1959_v17  ;;  %1770 = vmatmul.mubr.bf16.gmra.mrb[16].mxu1 %v1960_v18 }
  0x43   :  { %1705 = vmatprep.mubr.msk.bf16.mxu0 %vm2004_vm0, %v2003_v0  ;;  %1773 = vmatprep.mubr.msk.bf16.mxu1 %vm2004_vm0, %v2003_v0 }
  0x4a   :  { %1706 = vmatmul.mubr.bf16.gmra.mrb[20].mxu0 %v1961_v19  ;;  %1774 = vmatmul.mubr.bf16.gmra.mrb[20].mxu1 %v1962_v20 }
  0x4b   :  { %1709 = vmatprep.mubr.msk.bf16.mxu0 %vm2004_vm0, %v2003_v0  ;;  %1777 = vmatprep.mubr.msk.bf16.mxu1 %vm2004_vm0, %v2003_v0 }
  0x52   :  { %1710 = vmatmul.mubr.bf16.gmra.mrb[24].mxu0 %v1963_v21  ;;  %1778 = vmatmul.mubr.bf16.gmra.mrb[24].mxu1 %v1964_v22 }
  0x53   :  { %1713 = vmatprep.mubr.msk.bf16.mxu0 %vm2004_vm0, %v2003_v0  ;;  %1781 = vmatprep.mubr.msk.bf16.mxu1 %vm2004_vm0, %v2003_v0 }
  0x5a   :  { %1714 = vmatmul.mubr.bf16.gmra.mrb[28].mxu0 %v1965_v23  ;;  %1782 = vmatmul.mubr.bf16.gmra.mrb[28].mxu1 %v1966_v24 }
  0x5b   :  { %1717 = vmatprep.mubr.msk.bf16.mxu0 %vm2004_vm0, %v2003_v0  ;;  %1785 = vmatprep.mubr.msk.bf16.mxu1 %vm2004_vm0, %v2003_v0 }
  0x62   :  { %1718 = vmatmul.mubr.bf16.gmra.mrb[32].mxu0 %v1967_v25  ;;  %1786 = vmatmul.mubr.bf16.gmra.mrb[32].mxu1 %v1968_v26 }
  0x63   :  { %1721 = vmatprep.mubr.msk.bf16.mxu0 %vm2004_vm0, %v2003_v0  ;;  %1789 = vmatprep.mubr.msk.bf16.mxu1 %vm2004_vm0, %v2003_v0 }
  0x6a   :  { %1722 = vmatmul.mubr.bf16.gmra.mrb[36].mxu0 %v1969_v27  ;;  %1790 = vmatmul.mubr.bf16.gmra.mrb[36].mxu1 %v1970_v28 }
  0x6b   :  { %1725 = vmatprep.mubr.msk.bf16.mxu0 %vm2004_vm0, %v2003_v0  ;;  %1793 = vmatprep.mubr.msk.bf16.mxu1 %vm2004_vm0, %v2003_v0 }
  0x72   :  { %1726 = vmatmul.mubr.bf16.gmra.mrb[40].mxu0 %v1971_v29  ;;  %1794 = vmatmul.mubr.bf16.gmra.mrb[40].mxu1 %v1972_v30 }
  0x73   :  { %1729 = vmatprep.mubr.msk.bf16.mxu0 %vm2004_vm0, %v2003_v0  ;;  %1797 = vmatprep.mubr.msk.bf16.mxu1 %vm2004_vm0, %v2003_v0 }
  0x7a   :  { %1730 = vmatmul.mubr.bf16.gmra.mrb[44].mxu0 %v1973_v31  ;;  %1798 = vmatmul.mubr.bf16.gmra.mrb[44].mxu1 %v1974_v32 }
  0x7b   :  { %1733 = vmatprep.mubr.msk.bf16.mxu0 %vm2004_vm0, %v2003_v0  ;;  %1801 = vmatprep.mubr.msk.bf16.mxu1 %vm2004_vm0, %v2003_v0 }
  0x82   :  { %1734 = vmatmul.mubr.bf16.gmra.mrb[48].mxu0 %v1975_v33  ;;  %1802 = vmatmul.mubr.bf16.gmra.mrb[48].mxu1 %v1976_v34 }
  0x83   :  { %1821 = vmatprep.mubr.msk.bf16.mxu0 %vm2004_vm0, %v2003_v0  ;;  %1889 = vmatprep.mubr.msk.bf16.mxu1 %vm2004_vm0, %v2003_v0 }
  0x8a   :  { %1822 = vmatmul.mubr.bf16.vlgmr.msra.gmra.mrb[52].mxu0 %v1977_v35  ;;  %1890 = vmatmul.mubr.bf16.vlgmr.msra.gmra.mrb[52].mxu1 %v1978_v36 }
  0x8b   :  { %1825 = vmatprep.mubr.msk.bf16.mxu0 %vm2004_vm0, %v2003_v0  ;;  %1893 = vmatprep.mubr.msk.bf16.mxu1 %vm2004_vm0, %v2003_v0 }
  0x92   :  { %1826 = vmatmul.mubr.bf16.gmra.mrb[56].mxu0 %v1979_v37  ;;  %1894 = vmatmul.mubr.bf16.gmra.mrb[56].mxu1 %v1980_v38 }
  0x93   :  { %1829 = vmatprep.mubr.msk.bf16.mxu0 %vm2004_vm0, %v2003_v0  ;;  %1897 = vmatprep.mubr.msk.bf16.mxu1 %vm2004_vm0, %v2003_v0 }
  0x9a   :  { %1830 = vmatmul.mubr.bf16.gmra.mrb[60].mxu0 %v1981_v39  ;;  %1898 = vmatmul.mubr.bf16.gmra.mrb[60].mxu1 %v1982_v40 }
  0x9b   :  { %1833 = vmatprep.mubr.msk.bf16.mxu0 %vm2004_vm0, %v2003_v0  ;;  %1901 = vmatprep.mubr.msk.bf16.mxu1 %vm2004_vm0, %v2003_v0 }
  0xa2   :  { %1834 = vmatmul.mubr.bf16.gmra.mrb[64].mxu0 %v1983_v41  ;;  %1902 = vmatmul.mubr.bf16.gmra.mrb[64].mxu1 %v1984_v42 }
  0xa3   :  { %1837 = vmatprep.mubr.msk.bf16.mxu0 %vm2004_vm0, %v2003_v0  ;;  %1905 = vmatprep.mubr.msk.bf16.mxu1 %vm2004_vm0, %v2003_v0 }
  0xaa   :  { %1838 = vmatmul.mubr.bf16.gmra.mrb[68].mxu0 %v1985_v43  ;;  %1906 = vmatmul.mubr.bf16.gmra.mrb[68].mxu1 %v1986_v44 }
  0xab   :  { %1841 = vmatprep.mubr.msk.bf16.mxu0 %vm2004_vm0, %v2003_v0  ;;  %1909 = vmatprep.mubr.msk.bf16.mxu1 %vm2004_vm0, %v2003_v0 }
  0xb2   :  { %1842 = vmatmul.mubr.bf16.gmra.mrb[72].mxu0 %v1987_v45  ;;  %1910 = vmatmul.mubr.bf16.gmra.mrb[72].mxu1 %v1988_v46 }
  0xb3   :  { %1845 = vmatprep.mubr.msk.bf16.mxu0 %vm2004_vm0, %v2003_v0  ;;  %1913 = vmatprep.mubr.msk.bf16.mxu1 %vm2004_vm0, %v2003_v0 }
  0xba   :  { %1846 = vmatmul.mubr.bf16.gmra.mrb[76].mxu0 %v1989_v47  ;;  %1914 = vmatmul.mubr.bf16.gmra.mrb[76].mxu1 %v1990_v48 }
  0xbb   :  { %1849 = vmatprep.mubr.msk.bf16.mxu0 %vm2004_vm0, %v2003_v0  ;;  %1917 = vmatprep.mubr.msk.bf16.mxu1 %vm2004_vm0, %v2003_v0 }
  0xc2   :  { %1850 = vmatmul.mubr.bf16.gmra.mrb[80].mxu0 %v1991_v49  ;;  %1918 = vmatmul.mubr.bf16.gmra.mrb[80].mxu1 %v1992_v50 }
  0xc3   :  { %1853 = vmatprep.mubr.msk.bf16.mxu0 %vm2004_vm0, %v2003_v0  ;;  %1921 = vmatprep.mubr.msk.bf16.mxu1 %vm2004_vm0, %v2003_v0 }
  0xca   :  { %1854 = vmatmul.mubr.bf16.gmra.mrb[84].mxu0 %v1993_v51  ;;  %1922 = vmatmul.mubr.bf16.gmra.mrb[84].mxu1 %v1994_v52 }
  0xcb   :  { %1857 = vmatprep.mubr.msk.bf16.mxu0 %vm2004_vm0, %v2003_v0  ;;  %1925 = vmatprep.mubr.msk.bf16.mxu1 %vm2004_vm0, %v2003_v0 }
  0xd2   :  { %1858 = vmatmul.mubr.bf16.gmra.mrb[88].mxu0 %v1995_v53  ;;  %1926 = vmatmul.mubr.bf16.gmra.mrb[88].mxu1 %v1996_v54 }
  0xd3   :  { %1861 = vmatprep.mubr.msk.bf16.mxu0 %vm2004_vm0, %v2003_v0  ;;  %1929 = vmatprep.mubr.msk.bf16.mxu1 %vm2004_vm0, %v2003_v0 }
  0xda   :  { %1862 = vmatmul.mubr.bf16.gmra.mrb[92].mxu0 %v1997_v55  ;;  %1930 = vmatmul.mubr.bf16.gmra.mrb[92].mxu1 %v1998_v56 }
  0xdb   :  { %1865 = vmatprep.mubr.msk.bf16.mxu0 %vm2004_vm0, %v2003_v0  ;;  %1933 = vmatprep.mubr.msk.bf16.mxu1 %vm2004_vm0, %v2003_v0 }
  0xe2   :  { %1866 = vmatmul.mubr.bf16.gmra.mrb[96].mxu0 %v1999_v57  ;;  %1934 = vmatmul.mubr.bf16.gmra.mrb[96].mxu1 %v2000_v58 }
  0xe3   :  { %1869 = vmatprep.mubr.msk.bf16.mxu0 %vm2004_vm0, %v2003_v0  ;;  %1937 = vmatprep.mubr.msk.bf16.mxu1 %vm2004_vm0, %v2003_v0 }
  0xea   :  { %1870 = vmatmul.mubr.bf16.gmra.mrb[100].mxu0 %v2001_v59  ;;  %1938 = vmatmul.mubr.bf16.gmra.mrb[100].mxu1 %v2002_v60 }
  0xf5   :  { %v2341_v61 = vpop.f32.mrb[0].mxu0  ;;  %v2343_v62 = vpop.f32.mrb[0].mxu1 }
  0xf6   :  { %v562_v63 = vmax.f32 %v2341_v61, %v2343_v62  ;;  %v1687_v1 = vpop.f32.mrb[1].mxu0  ;;  %v1755_v2 = vpop.f32.mrb[1].mxu1 }
  0xf7   :  { %v2347_v0 = vpop.f32.mrb[2].mxu0  ;;  %v2349_v3 = vpop.f32.mrb[2].mxu1 }
  0xf8   :  { %v1688_v5 = vpop.f32.mrb[3].mxu0  ;;  %v1756_v6 = vpop.f32.mrb[3].mxu1 }
  0xfd   :  { %v2353_v7 = vpop.f32.mrb[4].mxu0  ;;  %v2355_v8 = vpop.f32.mrb[4].mxu1 }
  0xfe   :  { %v1691_v10 = vpop.f32.mrb[5].mxu0  ;;  %v1759_v11 = vpop.f32.mrb[5].mxu1 }
  0xff   :  { %v2359_v12 = vpop.f32.mrb[6].mxu0  ;;  %v2361_v13 = vpop.f32.mrb[6].mxu1 }
 0x100   :  { %v1692_v15 = vpop.f32.mrb[7].mxu0  ;;  %v1760_v16 = vpop.f32.mrb[7].mxu1 }
 0x105   :  { %v2365_v17 = vpop.f32.mrb[8].mxu0  ;;  %v2367_v18 = vpop.f32.mrb[8].mxu1 }
 0x106   :  { %v1695_v20 = vpop.f32.mrb[9].mxu0  ;;  %v1763_v21 = vpop.f32.mrb[9].mxu1 }
 0x107   :  { %v2371_v22 = vpop.f32.mrb[10].mxu0  ;;  %v2373_v23 = vpop.f32.mrb[10].mxu1 }
 0x108   :  { %v1696_v25 = vpop.f32.mrb[11].mxu0  ;;  %v1764_v26 = vpop.f32.mrb[11].mxu1 }
 0x10d   :  { %v2377_v27 = vpop.f32.mrb[12].mxu0  ;;  %v2379_v28 = vpop.f32.mrb[12].mxu1 }
 0x10e   :  { %v1699_v30 = vpop.f32.mrb[13].mxu0  ;;  %v1767_v31 = vpop.f32.mrb[13].mxu1 }
 0x10f   :  { %v2383_v32 = vpop.f32.mrb[14].mxu0  ;;  %v2385_v33 = vpop.f32.mrb[14].mxu1 }
 0x110   :  { %v1700_v35 = vpop.f32.mrb[15].mxu0  ;;  %v1768_v36 = vpop.f32.mrb[15].mxu1 }
 0x115   :  { %v2389_v37 = vpop.f32.mrb[16].mxu0  ;;  %v2391_v38 = vpop.f32.mrb[16].mxu1 }
 0x116   :  { %v1703_v40 = vpop.f32.mrb[17].mxu0  ;;  %v1771_v41 = vpop.f32.mrb[17].mxu1 }
 0x117   :  { %v2395_v42 = vpop.f32.mrb[18].mxu0  ;;  %v2397_v43 = vpop.f32.mrb[18].mxu1 }
 0x118   :  { %v1704_v45 = vpop.f32.mrb[19].mxu0  ;;  %v1772_v46 = vpop.f32.mrb[19].mxu1 }
 0x11d   :  { %v2401_v47 = vpop.f32.mrb[20].mxu0  ;;  %v2403_v48 = vpop.f32.mrb[20].mxu1 }
 0x11e   :  { %v1707_v50 = vpop.f32.mrb[21].mxu0  ;;  %v1775_v51 = vpop.f32.mrb[21].mxu1 }
 0x11f   :  { %v2407_v52 = vpop.f32.mrb[22].mxu0  ;;  %v2409_v53 = vpop.f32.mrb[22].mxu1 }
 0x120   :  { %v1708_v55 = vpop.f32.mrb[23].mxu0  ;;  %v1776_v56 = vpop.f32.mrb[23].mxu1 }
 0x125   :  { %v2413_v57 = vpop.f32.mrb[24].mxu0  ;;  %v2415_v58 = vpop.f32.mrb[24].mxu1 }
 0x126   :  { %v1711_v60 = vpop.f32.mrb[25].mxu0  ;;  %v1779_v1 = vpop.f32.mrb[25].mxu1 }
 0x127   :  { %v2419_v2 = vpop.f32.mrb[26].mxu0  ;;  %v2421_v5 = vpop.f32.mrb[26].mxu1 }
 0x128   :  { %v1712_v10 = vpop.f32.mrb[27].mxu0  ;;  %v1780_v11 = vpop.f32.mrb[27].mxu1 }
 0x12d   :  { %v2425_v15 = vpop.f32.mrb[28].mxu0  ;;  %v2427_v16 = vpop.f32.mrb[28].mxu1 }
 0x12e   :  { %v1715_v21 = vpop.f32.mrb[29].mxu0  ;;  %v1783_v25 = vpop.f32.mrb[29].mxu1 }
 0x12f   :  { %v2431_v26 = vpop.f32.mrb[30].mxu0  ;;  %v2433_v30 = vpop.f32.mrb[30].mxu1 }
 0x130   :  { %v1716_v35 = vpop.f32.mrb[31].mxu0  ;;  %v1784_v36 = vpop.f32.mrb[31].mxu1 }
 0x135   :  { %v2437_v40 = vpop.f32.mrb[32].mxu0  ;;  %v2439_v41 = vpop.f32.mrb[32].mxu1 }
 0x136   :  { %v1719_v46 = vpop.f32.mrb[33].mxu0  ;;  %v1787_v50 = vpop.f32.mrb[33].mxu1 }
 0x137   :  { %v2443_v51 = vpop.f32.mrb[34].mxu0  ;;  %v2445_v55 = vpop.f32.mrb[34].mxu1 }
 0x138   :  { %v1720_v60 = vpop.f32.mrb[35].mxu0  ;;  %v1788_v1 = vpop.f32.mrb[35].mxu1 }
 0x13d   :  { %v2449_v10 = vpop.f32.mrb[36].mxu0  ;;  %v2451_v11 = vpop.f32.mrb[36].mxu1 }
 0x13e   :  { %v1723_v25 = vpop.f32.mrb[37].mxu0  ;;  %v1791_v35 = vpop.f32.mrb[37].mxu1 }
 0x13f   :  { %v2455_v36 = vpop.f32.mrb[38].mxu0  ;;  %v2457_v46 = vpop.f32.mrb[38].mxu1 }
 0x140   :  { %v1724_v45 = vpop.f32.mrb[39].mxu0  ;;  %v1792_v56 = vpop.f32.mrb[39].mxu1 }
 0x145   :  { %v2461_v60 = vpop.f32.mrb[40].mxu0  ;;  %v2463_v1 = vpop.f32.mrb[40].mxu1 }
 0x146   :  { %v1727_v20 = vpop.f32.mrb[41].mxu0  ;;  %v1795_v21 = vpop.f32.mrb[41].mxu1 }
 0x147   :  { %v2467_v25 = vpop.f32.mrb[42].mxu0  ;;  %v2469_v35 = vpop.f32.mrb[42].mxu1 }
 0x148   :  { %v1728_v59 = vpop.f32.mrb[43].mxu0  ;;  %v1796_v50 = vpop.f32.mrb[43].mxu1 }
 0x14d   :  { %v2473_v45 = vpop.f32.mrb[44].mxu0  ;;  %v2475_v56 = vpop.f32.mrb[44].mxu1 }
 0x14e   :  { %v1731_v49 = vpop.f32.mrb[45].mxu0  ;;  %v1799_v31 = vpop.f32.mrb[45].mxu1 }
 0x14f   :  { %v2479_v20 = vpop.f32.mrb[46].mxu0  ;;  %v2481_v21 = vpop.f32.mrb[46].mxu1 }
 0x150   :  { %2655 = vst [vmem:[#allocation2_spill] sm:$0xff] %v2479_v20  ;;  %2656 = vst [vmem:[#allocation3_spill] sm:$0xff] %v2481_v21  ;;  %v1732_v39 = vpop.f32.mrb[47].mxu0  ;;  %v1800_v6 = vpop.f32.mrb[47].mxu1 }
 0x155   :  { %v2485_v59 = vpop.f32.mrb[48].mxu0  ;;  %v2487_v50 = vpop.f32.mrb[48].mxu1 }
 0x156   :  { %2657 = vst [vmem:[#allocation4_spill] sm:$0xff] %v2485_v59  ;;  %2658 = vst [vmem:[#allocation5_spill] sm:$0xff] %v2487_v50  ;;  %v1735_v29 = vpop.f32.mrb[49].mxu0  ;;  %v1803_v54 = vpop.f32.mrb[49].mxu1  ;;  %v2662_v59 = vmax.f32 %v2353_v7, %v2355_v8 }
 0x157   :  { %v2491_v49 = vpop.f32.mrb[50].mxu0  ;;  %v2493_v31 = vpop.f32.mrb[50].mxu1  ;;  %v2503_v29 = vld [vmem:[%s2647_s2] ss:$0 sm:$0xff] }
 0x158   :  { %2659 = vst [vmem:[#allocation6_spill] sm:$0xff] %v2491_v49  ;;  %2660 = vst [vmem:[#allocation7_spill] sm:$0xff] %v2493_v31  ;;  %v1736_v19 = vpop.f32.mrb[51].mxu0  ;;  %v1804_v44 = vpop.f32.mrb[51].mxu1 }
 0x159   :  { %v2661_v19 = vmax.f32 %v2347_v0, %v2349_v3 }
 0x15d   :  { %v727_v39 = vpop.f32.mrb[52].mxu0  ;;  %v995_v6 = vpop.f32.mrb[52].mxu1 }
 0x15e   :  { %v830_v14 = vmax.f32 %v562_v63, %v727_v39  ;;  %v1823_v9 = vpop.f32.mrb[53].mxu0  ;;  %v1891_v4 = vpop.f32.mrb[53].mxu1 }
 0x15f   :  { %v730_v54 = vpop.f32.mrb[54].mxu0  ;;  %v998_v34 = vpop.f32.mrb[54].mxu1 }
 0x160   :  { %v1098_v50 = vmax.f32 %v830_v14, %v995_v6  ;;  %v831_v44 = vmax.f32 %v2661_v19, %v730_v54  ;;  %v1824_v24 = vpop.f32.mrb[55].mxu0  ;;  %v1892_v31 = vpop.f32.mrb[55].mxu1 }
 0x162   :  { %v1131_v49 = vadd.f32 %v2503_v29, %v1098_v50  ;;  %v1099_v61 = vmax.f32 %v831_v44, %v998_v34  ;;  %v2663_v50 = vmax.f32 %v2359_v12, %v2361_v13 }
 0x164   :  { %v1132_v62 = vadd.f32 %v2503_v29, %v1099_v61  ;;  %v1157_v9 = vmax.f32 %v1131_v49, 0.0 }
 0x165   :  { %v735_v63 = vpop.f32.mrb[56].mxu0  ;;  %v1003_v4 = vpop.f32.mrb[56].mxu1 }
 0x166   :  { %v1158_v39 = vmax.f32 %v1132_v62, 0.0  ;;  %v832_v21 = vmax.f32 %v2662_v59, %v735_v63  ;;  %v1827_v14 = vpop.f32.mrb[57].mxu0  ;;  %v1895_v6 = vpop.f32.mrb[57].mxu1 }
 0x167   :  { %v738_v20 = vpop.f32.mrb[58].mxu0  ;;  %v1006_v0 = vpop.f32.mrb[58].mxu1 }
 0x168   :  { %v1511_v3 = vpack.c.bf16 %v1158_v39, %v1157_v9  ;;  %v1100_v24 = vmax.f32 %v832_v21, %v1003_v4  ;;  %v833_v34 = vmax.f32 %v2663_v50, %v738_v20  ;;  %v1828_v31 = vpop.f32.mrb[59].mxu0  ;;  %v1896_v54 = vpop.f32.mrb[59].mxu1  ;;  %v2664_v21 = vmax.f32 %v2365_v17, %v2367_v18 }
 0x169   :  { %v2665_v39 = vmax.f32 %v2371_v22, %v2373_v23  ;;  %v2666_v54 = vmax.f32 %v2377_v27, %v2379_v28 }
 0x16a   :  { %1512 = vst [vmem:[%s2648_s3] sm:$0xff] %v1511_v3   ;;  %v1133_v49 = vadd.f32 %v2503_v29, %v1100_v24  ;;  %v1101_v7 = vmax.f32 %v833_v34, %v1006_v0 }
 0x16c   :  { %v1134_v8 = vadd.f32 %v2503_v29, %v1101_v7  ;;  %v1159_v44 = vmax.f32 %v1133_v49, 0.0 }
 0x16d   :  { %v743_v59 = vpop.f32.mrb[60].mxu0  ;;  %v1011_v19 = vpop.f32.mrb[60].mxu1 }
 0x16e   :  { %v1160_v61 = vmax.f32 %v1134_v8, 0.0  ;;  %v834_v12 = vmax.f32 %v2664_v21, %v743_v59  ;;  %v1831_v13 = vpop.f32.mrb[61].mxu0  ;;  %v1899_v20 = vpop.f32.mrb[61].mxu1 }
 0x16f   :  { %v746_v62 = vpop.f32.mrb[62].mxu0  ;;  %v1014_v63 = vpop.f32.mrb[62].mxu1 }
 0x170   :  { %v1516_v4 = vpack.c.bf16 %v1160_v61, %v1159_v44  ;;  %v1102_v9 = vmax.f32 %v834_v12, %v1011_v19  ;;  %v835_v14 = vmax.f32 %v2665_v39, %v746_v62  ;;  %v1832_v6 = vpop.f32.mrb[63].mxu0  ;;  %v1900_v0 = vpop.f32.mrb[63].mxu1  ;;  %v2667_v44 = vmax.f32 %v2383_v32, %v2385_v33 }
 0x172   :  { %1573 = vst [vmem:[%s2648_s3 + $0x8] sm:$0xff] %v1516_v4   ;;  %v1135_v3 = vadd.f32 %v2503_v29, %v1102_v9  ;;  %v1103_v17 = vmax.f32 %v835_v14, %v1014_v63  ;;  %v2668_v9 = vmax.f32 %v2389_v37, %v2391_v38 }
 0x174   :  { %v1136_v18 = vadd.f32 %v2503_v29, %v1103_v17  ;;  %v1161_v34 = vmax.f32 %v1135_v3, 0.0  ;;  %v2669_v17 = vmax.f32 %v2395_v42, %v2397_v43 }
 0x175   :  { %v751_v24 = vpop.f32.mrb[64].mxu0  ;;  %v1019_v50 = vpop.f32.mrb[64].mxu1 }
 0x176   :  { %v1162_v31 = vmax.f32 %v1136_v18, 0.0  ;;  %v836_v22 = vmax.f32 %v2666_v54, %v751_v24  ;;  %v1835_v23 = vpop.f32.mrb[65].mxu0  ;;  %v1903_v49 = vpop.f32.mrb[65].mxu1 }
 0x177   :  { %v754_v7 = vpop.f32.mrb[66].mxu0  ;;  %v1022_v8 = vpop.f32.mrb[66].mxu1  ;;  %v2670_v49 = vmax.f32 %v2401_v47, %v2403_v48 }
 0x178   :  { %v1521_v59 = vpack.c.bf16 %v1162_v31, %v1161_v34  ;;  %v1104_v19 = vmax.f32 %v836_v22, %v1019_v50  ;;  %v837_v61 = vmax.f32 %v2667_v44, %v754_v7  ;;  %v1836_v21 = vpop.f32.mrb[67].mxu0  ;;  %v1904_v12 = vpop.f32.mrb[67].mxu1 }
 0x17a   :  { %1574 = vst [vmem:[%s2648_s3 + $0x10] sm:$0xff] %v1521_v59   ;;  %v1137_v13 = vadd.f32 %v2503_v29, %v1104_v19  ;;  %v1105_v27 = vmax.f32 %v837_v61, %v1022_v8  ;;  %v2671_v61 = vmax.f32 %v2407_v52, %v2409_v53 }
 0x17c   :  { %v1138_v28 = vadd.f32 %v2503_v29, %v1105_v27  ;;  %v1163_v63 = vmax.f32 %v1137_v13, 0.0 }
 0x17d   :  { %v759_v20 = vpop.f32.mrb[68].mxu0  ;;  %v1027_v62 = vpop.f32.mrb[68].mxu1 }
 0x17e   :  { %v1164_v4 = vmax.f32 %v1138_v28, 0.0  ;;  %v838_v32 = vmax.f32 %v2668_v9, %v759_v20  ;;  %v1839_v33 = vpop.f32.mrb[69].mxu0  ;;  %v1907_v39 = vpop.f32.mrb[69].mxu1 }
 0x17f   :  { %v762_v14 = vpop.f32.mrb[70].mxu0  ;;  %v1030_v6 = vpop.f32.mrb[70].mxu1 }
 0x180   :  { %v1526_v0 = vpack.c.bf16 %v1164_v4, %v1163_v63  ;;  %v1106_v3 = vmax.f32 %v838_v32, %v1027_v62  ;;  %v839_v18 = vmax.f32 %v2669_v17, %v762_v14  ;;  %v1840_v24 = vpop.f32.mrb[71].mxu0  ;;  %v1908_v50 = vpop.f32.mrb[71].mxu1  ;;  %v2672_v4 = vmax.f32 %v2413_v57, %v2415_v58 }
 0x182   :  { %1575 = vst [vmem:[%s2648_s3 + $0x18] sm:$0xff] %v1526_v0   ;;  %v1139_v34 = vadd.f32 %v2503_v29, %v1106_v3  ;;  %v1107_v37 = vmax.f32 %v839_v18, %v1030_v6  ;;  %v2673_v6 = vmax.f32 %v2419_v2, %v2421_v5 }
 0x184   :  { %v1140_v38 = vadd.f32 %v2503_v29, %v1107_v37  ;;  %v1165_v22 = vmax.f32 %v1139_v34, 0.0 }
 0x185   :  { %v767_v31 = vpop.f32.mrb[72].mxu0  ;;  %v1035_v54 = vpop.f32.mrb[72].mxu1 }
 0x186   :  { %v1166_v23 = vmax.f32 %v1140_v38, 0.0  ;;  %v840_v42 = vmax.f32 %v2670_v49, %v767_v31  ;;  %v1843_v43 = vpop.f32.mrb[73].mxu0  ;;  %v1911_v7 = vpop.f32.mrb[73].mxu1  ;;  %v2674_v38 = vmax.f32 %v2425_v15, %v2427_v16 }
 0x187   :  { %v770_v8 = vpop.f32.mrb[74].mxu0  ;;  %v1038_v59 = vpop.f32.mrb[74].mxu1 }
 0x188   :  { %v1531_v19 = vpack.c.bf16 %v1166_v23, %v1165_v22  ;;  %v1108_v44 = vmax.f32 %v840_v42, %v1035_v54  ;;  %v841_v21 = vmax.f32 %v2671_v61, %v770_v8  ;;  %v1844_v12 = vpop.f32.mrb[75].mxu0  ;;  %v1912_v13 = vpop.f32.mrb[75].mxu1  ;;  %v2675_v42 = vmax.f32 %v2431_v26, %v2433_v30 }
 0x189   :  { %v2676_v12 = vmax.f32 %v2437_v40, %v2439_v41 }
 0x18a   :  { %1576 = vst [vmem:[%s2648_s3 + $0x20] sm:$0xff] %v1531_v19   ;;  %v1141_v27 = vadd.f32 %v2503_v29, %v1108_v44  ;;  %v1109_v47 = vmax.f32 %v841_v21, %v1038_v59 }
 0x18c   :  { %v1142_v48 = vadd.f32 %v2503_v29, %v1109_v47  ;;  %v1167_v62 = vmax.f32 %v1141_v27, 0.0 }
 0x18d   :  { %v775_v28 = vpop.f32.mrb[76].mxu0  ;;  %v1043_v20 = vpop.f32.mrb[76].mxu1 }
 0x18e   :  { %v1168_v63 = vmax.f32 %v1142_v48, 0.0  ;;  %v842_v52 = vmax.f32 %v2672_v4, %v775_v28  ;;  %v1847_v53 = vpop.f32.mrb[77].mxu0  ;;  %v1915_v9 = vpop.f32.mrb[77].mxu1 }
 0x18f   :  { %v778_v32 = vpop.f32.mrb[78].mxu0  ;;  %v1046_v33 = vpop.f32.mrb[78].mxu1 }
 0x190   :  { %v1536_v39 = vpack.c.bf16 %v1168_v63, %v1167_v62  ;;  %v1110_v14 = vmax.f32 %v842_v52, %v1043_v20  ;;  %v843_v0 = vmax.f32 %v2673_v6, %v778_v32  ;;  %v1848_v3 = vpop.f32.mrb[79].mxu0  ;;  %v1916_v17 = vpop.f32.mrb[79].mxu1  ;;  %v2677_v20 = vmax.f32 %v2443_v51, %v2445_v55 }
 0x192   :  { %1577 = vst [vmem:[%s2648_s3 + $0x28] sm:$0xff] %v1536_v39   ;;  %v1143_v18 = vadd.f32 %v2503_v29, %v1110_v14  ;;  %v1111_v57 = vmax.f32 %v843_v0, %v1046_v33  ;;  %v2678_v39 = vmax.f32 %v2449_v10, %v2451_v11 }
 0x194   :  { %v1144_v58 = vadd.f32 %v2503_v29, %v1111_v57  ;;  %v1169_v34 = vmax.f32 %v1143_v18, 0.0  ;;  %v2679_v18 = vmax.f32 %v2455_v36, %v2457_v46 }
 0x195   :  { %v783_v24 = vpop.f32.mrb[80].mxu0  ;;  %v1051_v50 = vpop.f32.mrb[80].mxu1 }
 0x196   :  { %v1170_v37 = vmax.f32 %v1144_v58, 0.0  ;;  %v844_v2 = vmax.f32 %v2674_v38, %v783_v24  ;;  %v1851_v5 = vpop.f32.mrb[81].mxu0  ;;  %v1919_v31 = vpop.f32.mrb[81].mxu1 }
 0x197   :  { %v786_v54 = vpop.f32.mrb[82].mxu0  ;;  %v1054_v22 = vpop.f32.mrb[82].mxu1  ;;  %v2680_v5 = vmax.f32 %v2461_v60, %v2463_v1 }
 0x198   :  { %v1541_v23 = vpack.c.bf16 %v1170_v37, %v1169_v34  ;;  %v1112_v49 = vmax.f32 %v844_v2, %v1051_v50  ;;  %v845_v43 = vmax.f32 %v2675_v42, %v786_v54  ;;  %v1852_v7 = vpop.f32.mrb[83].mxu0  ;;  %v1920_v8 = vpop.f32.mrb[83].mxu1  ;;  %v2681_v42 = vmax.f32 %v2467_v25, %v2469_v35 }
 0x19a   :  { %1578 = vst [vmem:[%s2648_s3 + $0x30] sm:$0xff] %v1541_v23   ;;  %v1145_v59 = vadd.f32 %v2503_v29, %v1112_v49  ;;  %v1113_v15 = vmax.f32 %v845_v43, %v1054_v22 }
 0x19c   :  { %v1146_v16 = vadd.f32 %v2503_v29, %v1113_v15  ;;  %v1171_v61 = vmax.f32 %v1145_v59, 0.0 }
 0x19d   :  { %v791_v19 = vpop.f32.mrb[84].mxu0  ;;  %v1059_v44 = vpop.f32.mrb[84].mxu1 }
 0x19e   :  { %v1172_v21 = vmax.f32 %v1146_v16, 0.0  ;;  %v846_v26 = vmax.f32 %v2676_v12, %v791_v19  ;;  %v1855_v30 = vpop.f32.mrb[85].mxu0  ;;  %v1923_v13 = vpop.f32.mrb[85].mxu1 }
 0x19f   :  { %v794_v27 = vpop.f32.mrb[86].mxu0  ;;  %v1062_v47 = vpop.f32.mrb[86].mxu1 }
 0x1a0   :  { %v1546_v48 = vpack.c.bf16 %v1172_v21, %v1171_v61  ;;  %v1114_v28 = vmax.f32 %v846_v26, %v1059_v44  ;;  %v847_v62 = vmax.f32 %v2677_v20, %v794_v27  ;;  %v1856_v63 = vpop.f32.mrb[87].mxu0  ;;  %v1924_v4 = vpop.f32.mrb[87].mxu1  ;;  %v2682_v61 = vmax.f32 %v2473_v45, %v2475_v56  ;;  %v2683_v27 = vld [vmem:[#allocation2_spill] sm:$0xff] }
 0x1a2   :  { %1579 = vst [vmem:[%s2648_s3 + $0x38] sm:$0xff] %v1546_v48   ;;  %v1147_v52 = vadd.f32 %v2503_v29, %v1114_v28  ;;  %v1115_v40 = vmax.f32 %v847_v62, %v1062_v47  ;;  %v2684_v47 = vld [vmem:[#allocation3_spill] sm:$0xff] }
 0x1a3   :  { %v2685_v48 = vmax.f32 %v2683_v27, %v2684_v47 }
 0x1a4   :  { %v1148_v41 = vadd.f32 %v2503_v29, %v1115_v40  ;;  %v1173_v32 = vmax.f32 %v1147_v52, 0.0 }
 0x1a5   :  { %v799_v53 = vpop.f32.mrb[88].mxu0  ;;  %v1067_v9 = vpop.f32.mrb[88].mxu1 }
 0x1a6   :  { %v1174_v33 = vmax.f32 %v1148_v41, 0.0  ;;  %v848_v51 = vmax.f32 %v2678_v39, %v799_v53  ;;  %v1859_v55 = vpop.f32.mrb[89].mxu0  ;;  %v1927_v14 = vpop.f32.mrb[89].mxu1  ;;  %v2686_v53 = vld [vmem:[#allocation4_spill] sm:$0xff] }
 0x1a7   :  { %v802_v6 = vpop.f32.mrb[90].mxu0  ;;  %v1070_v0 = vpop.f32.mrb[90].mxu1 }
 0x1a8   :  { %v1551_v3 = vpack.c.bf16 %v1174_v33, %v1173_v32  ;;  %v1116_v17 = vmax.f32 %v848_v51, %v1067_v9  ;;  %v849_v57 = vmax.f32 %v2679_v18, %v802_v6  ;;  %v1860_v58 = vpop.f32.mrb[91].mxu0  ;;  %v1928_v24 = vpop.f32.mrb[91].mxu1  ;;  %v2687_v9 = vld [vmem:[#allocation5_spill] sm:$0xff] }
 0x1a9   :  { %v2688_v32 = vmax.f32 %v2686_v53, %v2687_v9 }
 0x1aa   :  { %1580 = vst [vmem:[%s2648_s3 + $0x40] sm:$0xff] %v1551_v3   ;;  %v1149_v50 = vadd.f32 %v2503_v29, %v1116_v17  ;;  %v1117_v10 = vmax.f32 %v849_v57, %v1070_v0  ;;  %v2689_v3 = vld [vmem:[#allocation6_spill] sm:$0xff]  ;;  %v2690_v17 = vld [vmem:[#allocation7_spill] sm:$0xff] }
 0x1ab   :  { %v2691_v18 = vmax.f32 %v2689_v3, %v2690_v17 }
 0x1ac   :  { %v1150_v11 = vadd.f32 %v2503_v29, %v1117_v10  ;;  %v1175_v38 = vmax.f32 %v1149_v50, 0.0 }
 0x1ad   :  { %v807_v34 = vpop.f32.mrb[92].mxu0  ;;  %v1075_v37 = vpop.f32.mrb[92].mxu1 }
 0x1ae   :  { %v1176_v2 = vmax.f32 %v1150_v11, 0.0  ;;  %v850_v36 = vmax.f32 %v2680_v5, %v807_v34  ;;  %v1863_v46 = vpop.f32.mrb[93].mxu0  ;;  %v1931_v31 = vpop.f32.mrb[93].mxu1 }
 0x1af   :  { %v810_v54 = vpop.f32.mrb[94].mxu0  ;;  %v1078_v22 = vpop.f32.mrb[94].mxu1 }
 0x1b0   :  { %v1556_v23 = vpack.c.bf16 %v1176_v2, %v1175_v38  ;;  %v1118_v49 = vmax.f32 %v850_v36, %v1075_v37  ;;  %v851_v43 = vmax.f32 %v2681_v42, %v810_v54  ;;  %v1864_v7 = vpop.f32.mrb[95].mxu0  ;;  %v1932_v8 = vpop.f32.mrb[95].mxu1 }
 0x1b2   :  { %1581 = vst [vmem:[%s2648_s3 + $0x48] sm:$0xff] %v1556_v23   ;;  %v1151_v59 = vadd.f32 %v2503_v29, %v1118_v49  ;;  %v1119_v60 = vmax.f32 %v851_v43, %v1078_v22 }
 0x1b4   :  { %v1152_v1 = vadd.f32 %v2503_v29, %v1119_v60  ;;  %v1177_v19 = vmax.f32 %v1151_v59, 0.0 }
 0x1b5   :  { %v815_v15 = vpop.f32.mrb[96].mxu0  ;;  %v1083_v16 = vpop.f32.mrb[96].mxu1 }
 0x1b6   :  { %v1178_v44 = vmax.f32 %v1152_v1, 0.0  ;;  %v852_v25 = vmax.f32 %v2682_v61, %v815_v15  ;;  %v1867_v35 = vpop.f32.mrb[97].mxu0  ;;  %v1935_v21 = vpop.f32.mrb[97].mxu1 }
 0x1b7   :  { %v818_v12 = vpop.f32.mrb[98].mxu0  ;;  %v1086_v26 = vpop.f32.mrb[98].mxu1 }
 0x1b8   :  { %v1561_v30 = vpack.c.bf16 %v1178_v44, %v1177_v19  ;;  %v1120_v13 = vmax.f32 %v852_v25, %v1083_v16  ;;  %v853_v28 = vmax.f32 %v2685_v48, %v818_v12  ;;  %v1868_v20 = vpop.f32.mrb[99].mxu0  ;;  %v1936_v62 = vpop.f32.mrb[99].mxu1 }
 0x1ba   :  { %1582 = vst [vmem:[%s2648_s3 + $0x50] sm:$0xff] %v1561_v30   ;;  %v1153_v63 = vadd.f32 %v2503_v29, %v1120_v13  ;;  %v1121_v45 = vmax.f32 %v853_v28, %v1086_v26 }
 0x1bc   :  { %v1154_v56 = vadd.f32 %v2503_v29, %v1121_v45  ;;  %v1179_v40 = vmax.f32 %v1153_v63, 0.0 }
 0x1bd   :  { %v823_v4 = vpop.f32.mrb[100].mxu0  ;;  %v1091_v52 = vpop.f32.mrb[100].mxu1 }
 0x1be   :  { %v1180_v41 = vmax.f32 %v1154_v56, 0.0  ;;  %v854_v33 = vmax.f32 %v2688_v32, %v823_v4  ;;  %v1871_v39 = vpop.f32.mrb[101].mxu0  ;;  %v1939_v51 = vpop.f32.mrb[101].mxu1 }
 0x1bf   :  { %v826_v55 = vpop.f32.mrb[102].mxu0  ;;  %v1094_v14 = vpop.f32.mrb[102].mxu1 }
 0x1c0   :  { %v1566_v6 = vpack.c.bf16 %v1180_v41, %v1179_v40  ;;  %v1122_v0 = vmax.f32 %v854_v33, %v1091_v52  ;;  %v855_v57 = vmax.f32 %v2691_v18, %v826_v55  ;;  %v1872_v58 = vpop.f32.mrb[103].mxu0  ;;  %v1940_v24 = vpop.f32.mrb[103].mxu1 }
 0x1c2   :  { %1583 = vst [vmem:[%s2648_s3 + $0x58] sm:$0xff] %v1566_v6   ;;  %v1155_v50 = vadd.f32 %v2503_v29, %v1122_v0  ;;  %v1123_v10 = vmax.f32 %v855_v57, %v1094_v14 }
 0x1c4   :  { %v1156_v11 = vadd.f32 %v2503_v29, %v1123_v10  ;;  %v1181_v34 = vmax.f32 %v1155_v50, 0.0 }
 0x1c6   :  { %v1182_v37 = vmax.f32 %v1156_v11, 0.0 }
 0x1c8   :  { %v1571_v38 = vpack.c.bf16 %v1182_v37, %v1181_v34 }
 0x1ca   :  { %1584 = vst [vmem:[%s2648_s3 + $0x60] sm:$0xff] %v1571_v38  }

// kernel: cnnnet2_forward.3
= control target key start
LH: loop header
LB: loop body
LE: loop exit
PB: predicated region body
PF: predicated region fallthrough
CT: control target
= control target key end

     0   :  { %10 = vsyncpa [#allocation3], 0  ;;  %s5367_s0 = inlined_call_operand.vmem [shape: bf16[2,4,4,1600], index: 0, kind: input, shape index: {}]   ;;  %s5368_s1 = inlined_call_operand.vmem [shape: bf16[1600,128], index: 1, kind: input, shape index: {}]   ;;  %s5369_s2 = inlined_call_operand.vmem [shape: f32[1,128], index: 2, kind: input, shape index: {}]   ;;  %s5370_s3 = inlined_call_operand.vmem [shape: f32[128,8], index: 3, kind: input, shape index: {}]   ;;  %s5371_s4 = inlined_call_operand.vmem [shape: f32[8,128], index: 4, kind: input, shape index: {}]   ;;  %s5372_s5 = inlined_call_operand.hbm [shape: f32[2,4,128], index: 5, kind: output, shape index: {}]  }
   0x1   :  { %12 = vsyncpa [#allocation3 + $0x1], 0  ;;  %s3901_s18 = smov 0   ;;  %s3903_s19 = smov 0  }
   0x2   :  { %s3905_s20 = smov 0   ;;  %s3907_s21 = smov 0  }
   0x3 LB: > { %s3922_s22 = sadd.s32 4294967295, %s3864_s21   ;;  %s2741_s23 = sadd.s32 4294967294, %s3864_s21   ;;  %s3864_s21 = sphi %s3907_s21, %s5615_s21   ;;  %s3860_s20 = sphi %s3905_s20, %s5614_s20   ;;  %s3856_s19 = sphi %s3903_s19, %s5613_s19   ;;  %s3852_s18 = sphi %s3901_s18, %s5612_s18  }
   0x4   : > { %s3926_s24 = sadd.s32 1, %s3864_s21   ;;  %s135_s25 = sadd.s32 1, %s3860_s20 }
   0x5   : > { %s132_s26 = ssub.s32 %s3864_s21, %s3926_s24  ;;  %p145_p0 = scmp.ne.s32.totalorder %s3860_s20, %s3856_s19 }
   0x6   : > { %p133_p1 = scmp.eq.s32.totalorder %s132_s26, 0  ;;  %p146_p2 = scmp.eq.s32.totalorder %s3922_s22, 1 }
   0x7   : > { %p151_p3 = scmp.ne.s32.totalorder %s3856_s19, %s3852_s18  ;;  %p152_p4 = scmp.eq.s32.totalorder %s2741_s23, 1 }
   0x8   : > { %s3937_s27 = scalar_select %p133_p1, %s3860_s20, %s135_s25  }
   0x9   : > { %p3939_p5 = por %p146_p2, %p145_p0  ;;  %p3943_p6 = por %p152_p4, %p151_p3 }
   0xa   : > { %p2744_p7 = scmp.ge.s32.totalorder %s3864_s21, 1  ;;  %p190_p8 = scmp.lt.s32.totalorder %s3864_s21, 3 }
   0xc   : > { %p191_p9 = pnand %p2744_p7, %p190_p8 }
   0xe   : > { %194 = sbr.rel (%p191_p9) target bundleno = 1161 (0x489), region = 40 }
  0x15   : > { %v3952_v0 = vld [vmem:[%s5368_s1 + $0x40] sm:$0xff]   ;;  %v3975_v4 = vld [vmem:[%s5368_s1 + $0x48] sm:$0xff]   ;;  %v3999_v8 = vld [vmem:[%s5368_s1 + $0x50] sm:$0xff]   ;;  %p218_p10 = scmp.lt.s32.totalorder %s3922_s22, 1  ;;  %v436_v28 = vlaneseq  ;;  %v3866_v36 = vmov 1983009808  }
  0x16   : > { %v3957_v1 = vld [vmem:[%s5368_s1 + $0xc0] sm:$0xff]   ;;  %2874 = vmatprep.subr.bf16.mxu0 %v3952_v0  ;;  %v3981_v5 = vld [vmem:[%s5368_s1 + $0xc8] sm:$0xff]   ;;  %v4005_v9 = vld [vmem:[%s5368_s1 + $0xd0] sm:$0xff]   ;;  %v434_v37 = vunpack.c.l.s4 %v3866_v36  ;;  %vm3868_vm0 = vmmov 0   ;;  %vm1102_vm1 = vcmask 523264   ;;  %vm2484_vm2 = vcmask 1043456  }
  0x17   : > { %v3963_v2 = vld [vmem:[%s5368_s1] sm:$0xff]   ;;  %2896 = vmatprep.subr.bf16.mxu1 %v3957_v1  ;;  %v3987_v6 = vld [vmem:[%s5368_s1 + $0x8] sm:$0xff]   ;;  %v4011_v10 = vld [vmem:[%s5368_s1 + $0x10] sm:$0xff]   ;;  %s219_s17 = scalar_select %p218_p10, %s3922_s22, 1  ;;  %v4146_v33 = vshrl.u32 %v436_v28, 7  ;;  %vm2582_vm3 = vcmask 64512  }
  0x18   : > { %v3969_v3 = vld [vmem:[%s5368_s1 + $0x80] sm:$0xff]   ;;  %2875 = vmatpush3.bf16.msra.mxu0 %v3963_v2  ;;  %v3993_v7 = vld [vmem:[%s5368_s1 + $0x88] sm:$0xff]   ;;  %v4017_v11 = vld [vmem:[%s5368_s1 + $0x90] sm:$0xff]   ;;  %v435_v39 = vunpack.c.0.s8 %v434_v37  ;;  %s215_s12 = sand.u32 1, %s3856_s19   ;;  %s2871_s14 = sshll.u32 %s3922_s22, 6 }
  0x19   : > { %2897 = vmatpush3.bf16.msra.mxu1 %v3969_v3  ;;  %2876 = vmatprep.subr.bf16.mxu0 %v3975_v4  ;;  %v4023_v12 = vld [vmem:[%s5368_s1 + $0x58] sm:$0xff]   ;;  %v4047_v16 = vld [vmem:[%s5368_s1 + $0x60] sm:$0xff]   ;;  %v4072_v20 = vld [vmem:[%s5368_s1 + $0x68] sm:$0xff]   ;;  %s3553_s10 = smul.u32 104, %s219_s17  ;;  %5480 = vst [vmem:[#allocation5_spill] sm:$0xff] %v4146_v33  ;;  %s2745_s13 = sshll.u32 %s215_s12, 2 }
  0x1a   : > { %2898 = vmatprep.subr.bf16.mxu1 %v3981_v5  ;;  %v4029_v13 = vld [vmem:[%s5368_s1 + $0xd8] sm:$0xff]   ;;  %v4053_v17 = vld [vmem:[%s5368_s1 + $0xe0] sm:$0xff]   ;;  %v4078_v21 = vld [vmem:[%s5368_s1 + $0xe8] sm:$0xff]   ;;  %v4164_v41 = vsub.s32 %v435_v39, %v4146_v33  ;;  %s217_s15 = scalar_lea.vmem [#allocation2], %s2745_s13  ;;  %s5325_s25 = scalar_lea.hbm %s5372_s5, %s2871_s14 }
  0x1b   : > { %v4035_v14 = vld [vmem:[%s5368_s1 + $0x18] sm:$0xff]   ;;  %v4060_v18 = vld [vmem:[%s5368_s1 + $0x20] sm:$0xff]   ;;  %v4085_v22 = vld [vmem:[%s5368_s1 + $0x28] sm:$0xff]   ;;  %s4132_s30 = scalar_lea.vmem %s5367_s0, %s3553_s10  ;;  %s2682_s16 = sshll.u32 %s217_s15, 4  ;;  %s5327_s16 = int_to_ptr.vmem [resolvable:$true] %s2682_s16 }
  0x1c   : > { %2877 = vmatpush3.bf16.msra.mxu0 %v3987_v6  ;;  %v4041_v15 = vld [vmem:[%s5368_s1 + $0x98] sm:$0xff]   ;;  %v4066_v19 = vld [vmem:[%s5368_s1 + $0xa0] sm:$0xff]   ;;  %v4091_v23 = vld [vmem:[%s5368_s1 + $0xa8] sm:$0xff]   ;;  %s2669_s26 = scalar_lea.sflag [#allocation3], %s215_s12  ;;  %s3802_s6 = scalar_lea.vmem %s5327_s16, 64 }
  0x1d   : > { %2899 = vmatpush3.bf16.msra.mxu1 %v3993_v7  ;;  %2878 = vmatprep.subr.bf16.mxu0 %v3999_v8  ;;  %v4097_v24 = vld [vmem:[%s5368_s1 + $0x70] sm:$0xff]   ;;  %v4121_v29 = vld [vmem:[%s5368_s1 + $0x78] sm:$0xff]   ;;  %v424_v34 = vld [vmem:[%s4132_s30] sm:$0xff]  ;;  %p3803_p11 = scmp.ne.s32.totalorder %s5327_s16, %s3802_s6  ;;  %s3870_s22 = smov [#allocation2]  }
  0x1e   : > { %2900 = vmatprep.subr.bf16.mxu1 %v4005_v9  ;;  %v4103_v25 = vld [vmem:[%s5368_s1 + $0xf0] sm:$0xff]   ;;  %v4127_v30 = vld [vmem:[%s5368_s1 + $0xf8] sm:$0xff]   ;;  %v4153_v35 = vld [vmem:[%s5368_s1 + $0x140] sm:$0xff]   ;;  %v432_v40 = vcombine.high %v424_v34, %v424_v34  ;;  %v439_v42 = vrot.slane %v424_v34, %v4164_v41  ;;  %s3806_s7 = sshll.u32 %s3870_s22, 4  ;;  %s3807_s7 = int_to_ptr.vmem [resolvable:$false] %s3806_s7 }
  0x1f   : > { %v4109_v26 = vld [vmem:[%s5368_s1 + $0x30] sm:$0xff]   ;;  %v4138_v31 = vld [vmem:[%s5368_s1 + $0x38] sm:$0xff]   ;;  %v4160_v38 = vld [vmem:[%s5368_s1 + $0x1c0] sm:$0xff]   ;;  %p3804_p12 = pnand %p3803_p11, %p3939_p5  ;;  %s3808_s8 = scalar_lea.vmem %s3807_s7, 128 }
  0x20   : > { %2879 = vmatpush3.bf16.msra.mxu0 %v4011_v10  ;;  %v4115_v27 = vld [vmem:[%s5368_s1 + $0xb0] sm:$0xff]   ;;  %v4144_v32 = vld [vmem:[%s5368_s1 + $0xb8] sm:$0xff]   ;;  %v446_v43 = vrot.slane %v432_v40, %v4164_v41  ;;  %v4171_v44 = vld [vmem:[%s5368_s1 + $0x100] sm:$0xff]   ;;  %v447_v46 = vcombine.high %v439_v42, %v439_v42  ;;  %p3809_p0 = scmp.lt.s32.totalorder %s5327_s16, %s3807_s7  ;;  %p3810_p1 = scmp.lt.s32.totalorder %s3808_s8, %s3802_s6 }
  0x21   : > { %2901 = vmatpush3.bf16.msra.mxu1 %v4017_v11  ;;  %2880 = vmatprep.subr.bf16.mxu0 %v4023_v12  ;;  %v4176_v45 = vld [vmem:[%s5368_s1 + $0x180] sm:$0xff]   ;;  %v4181_v48 = vld [vmem:[%s5368_s1 + $0x148] sm:$0xff]   ;;  %v4203_v52 = vld [vmem:[%s5368_s1 + $0x150] sm:$0xff]   ;;  %p3805_p13 = pneg %p3804_p12 }
  0x22   : > { %2902 = vmatprep.subr.bf16.mxu1 %v4029_v13  ;;  %v448_v47 = vcombine.high %v446_v43, %v446_v43  ;;  %v4186_v49 = vld [vmem:[%s5368_s1 + $0x1c8] sm:$0xff]   ;;  %1138 = vmatprep.mubr.bf16.mxu0 %v447_v46  ;;  %v4210_v53 = vld [vmem:[%s5368_s1 + $0x1d0] sm:$0xff]   ;;  %v4227_v56 = vld [vmem:[%s5368_s1 + $0x158] sm:$0xff]   ;;  %p3811_p2 = por %p3810_p1, %p3809_p0 }
  0x23   : > { %v4191_v50 = vld [vmem:[%s5368_s1 + $0x108] sm:$0xff]   ;;  %v4215_v54 = vld [vmem:[%s5368_s1 + $0x110] sm:$0xff]   ;;  %5482 = vst [vmem:[#allocation7_spill] sm:$0xff] %v4227_v56  ;;  %v4234_v57 = vld [vmem:[%s5368_s1 + $0x1d8] sm:$0xff]  }
  0x24   : > { %2881 = vmatpush3.bf16.msra.mxu0 %v4035_v14  ;;  %1178 = vmatprep.mubr.bf16.mxu1 %v448_v47  ;;  %v4196_v51 = vld [vmem:[%s5368_s1 + $0x188] sm:$0xff]   ;;  %5481 = vst [vmem:[#allocation6_spill] sm:$0xff] %v4215_v54  ;;  %v4220_v55 = vld [vmem:[%s5368_s1 + $0x190] sm:$0xff]   ;;  %v4239_v58 = vld [vmem:[%s5368_s1 + $0x118] sm:$0xff]   ;;  %p3812_p3 = pnand %p3811_p2, %p3805_p13 }
  0x25   : > { %2903 = vmatpush3.bf16.msra.mxu1 %v4041_v15  ;;  %2882 = vmatprep.subr.bf16.mxu0 %v4047_v16  ;;  %5483 = vst [vmem:[#allocation8_spill] sm:$0xff] %v4239_v58  ;;  %v4244_v59 = vld [vmem:[%s5368_s1 + $0x198] sm:$0xff]   ;;  %v4251_v60 = vld [vmem:[%s5368_s1 + $0x160] sm:$0xff]   ;;  %v4275_v28 = vld [vmem:[%s5368_s1 + $0x168] sm:$0xff]  }
  0x26   : > { %2904 = vmatprep.subr.bf16.mxu1 %v4053_v17  ;;  %5484 = vst [vmem:[#allocation9_spill] sm:$0xff] %v4251_v60  ;;  %v4258_v61 = vld [vmem:[%s5368_s1 + $0x1e0] sm:$0xff]   ;;  %5486 = vst [vmem:[#allocation11_spill] sm:$0xff] %v4275_v28  ;;  %v4282_v34 = vld [vmem:[%s5368_s1 + $0x1e8] sm:$0xff]  }
  0x27   : > { %v4263_v62 = vld [vmem:[%s5368_s1 + $0x120] sm:$0xff]   ;;  %v4287_v36 = vld [vmem:[%s5368_s1 + $0x128] sm:$0xff]   ;;  %v4299_v39 = vld [vmem:[%s5368_s1 + $0x170] sm:$0xff]  }
  0x28   : > { %2883 = vmatpush3.bf16.msra.mxu0 %v4060_v18  ;;  %5485 = vst [vmem:[#allocation10_spill] sm:$0xff] %v4263_v62  ;;  %v4268_v63 = vld [vmem:[%s5368_s1 + $0x1a0] sm:$0xff]   ;;  %5487 = vst [vmem:[#allocation12_spill] sm:$0xff] %v4287_v36  ;;  %v4292_v37 = vld [vmem:[%s5368_s1 + $0x1a8] sm:$0xff]  }
  0x29   : > { %2905 = vmatpush3.bf16.msra.mxu1 %v4066_v19  ;;  %2884 = vmatprep.subr.bf16.mxu0 %v4072_v20  ;;  %5488 = vst [vmem:[#allocation13_spill] sm:$0xff] %v4299_v39  ;;  %v4306_v40 = vld [vmem:[%s5368_s1 + $0x1f0] sm:$0xff]   ;;  %v425_v46 = vld [vmem:[%s4132_s30 + $0x8] sm:$0xff]  ;;  %v4324_v47 = vld [vmem:[%s5368_s1 + $0x178] sm:$0xff]  }
  0x2a   : > { %2906 = vmatprep.subr.bf16.mxu1 %v4078_v21  ;;  %5491 = vst [vmem:[#allocation16_spill] sm:$0xff] %v4324_v47  ;;  %v456_v33 = vrot.slane %v425_v46, %v4164_v41 }
  0x2c   : > { %2885 = vmatpush3.bf16.msra.mxu0 %v4085_v22 }
  0x2d   : > { %2907 = vmatpush3.bf16.msra.mxu1 %v4091_v23  ;;  %2886 = vmatprep.subr.bf16.mxu0 %v4097_v24 }
  0x2e   : > { %2908 = vmatprep.subr.bf16.mxu1 %v4103_v25 }
  0x30   : > { %2887 = vmatpush3.bf16.msra.mxu0 %v4109_v26 }
  0x31   : > { %2909 = vmatpush3.bf16.msra.mxu1 %v4115_v27  ;;  %2888 = vmatprep.subr.bf16.mxu0 %v4121_v29 }
  0x32   : > { %2910 = vmatprep.subr.bf16.mxu1 %v4127_v30 }
  0x34   : > { %2889 = vmatpush3.bf16.msra.mxu0 %v4138_v31 }
  0x35   : > { %2911 = vmatpush3.bf16.msra.mxu1 %v4144_v32  ;;  %2918 = vmatprep.subr.bf16.mxu0 %v4153_v35 }
  0x36   : > { %2940 = vmatprep.subr.bf16.mxu1 %v4160_v38 }
  0x37   : > { %1139 = vmatmul.mubr.bf16.vlgmr.msra.gmra.mrb[0].mxu0 %v439_v42  ;;  %v4311_v42 = vld [vmem:[%s5368_s1 + $0x130] sm:$0xff]  }
  0x38   : > { %1179 = vmatmul.mubr.bf16.vlgmr.msra.gmra.mrb[0].mxu1 %v446_v43  ;;  %2919 = vmatpush3.bf16.msra.mxu0 %v4171_v44  ;;  %5489 = vst [vmem:[#allocation14_spill] sm:$0xff] %v4311_v42  ;;  %v4316_v43 = vld [vmem:[%s5368_s1 + $0x1b0] sm:$0xff]  }
  0x39   : > { %2941 = vmatpush3.bf16.msra.mxu1 %v4176_v45  ;;  %2920 = vmatprep.subr.bf16.mxu0 %v4181_v48  ;;  %5490 = vst [vmem:[#allocation15_spill] sm:$0xff] %v4316_v43 }
  0x3a   : > { %2942 = vmatprep.subr.bf16.mxu1 %v4186_v49 }
  0x3c   : > { %2921 = vmatpush3.bf16.msra.mxu0 %v4191_v50 }
  0x3d   : > { %2943 = vmatpush3.bf16.msra.mxu1 %v4196_v51  ;;  %2922 = vmatprep.subr.bf16.mxu0 %v4203_v52 }
  0x3e   : > { %2944 = vmatprep.subr.bf16.mxu1 %v4210_v53 }
  0x40   : > { %2923 = vmatpush3.bf16.msra.mxu0 %v4215_v54  ;;  %v5460_v54 = vmov 0.0  }
  0x41   : > { %2945 = vmatpush3.bf16.msra.mxu1 %v4220_v55  ;;  %2924 = vmatprep.subr.bf16.mxu0 %v4227_v56  ;;  %v4350_v56 = vld [vmem:[%s5368_s1 + $0x240] sm:$0xff]  }
  0x42   : > { %2946 = vmatprep.subr.bf16.mxu1 %v4234_v57  ;;  %5495 = vst [vmem:[#allocation20_spill] sm:$0xff] %v4350_v56 }
  0x44   : > { %2925 = vmatpush3.bf16.msra.mxu0 %v4239_v58 }
  0x45   : > { %2947 = vmatpush3.bf16.msra.mxu1 %v4244_v59  ;;  %2926 = vmatprep.subr.bf16.mxu0 %v4251_v60  ;;  %v464_v60 = vcombine.high %v456_v33, %v456_v33 }
  0x46   : > { %2948 = vmatprep.subr.bf16.mxu1 %v4258_v61 }
  0x47   : > { %1218 = vmatprep.mubr.bf16.mxu0 %v464_v60  ;;  %v4381_v60 = vld [vmem:[%s5368_s1 + $0x2c8] sm:$0xff]  }
  0x48   : > { %2927 = vmatpush3.bf16.msra.mxu0 %v4263_v62  ;;  %v4332_v62 = vld [vmem:[%s5368_s1 + $0x1f8] sm:$0xff]   ;;  %5500 = vst [vmem:[#allocation25_spill] sm:$0xff] %v4381_v60 }
  0x49   : > { %2949 = vmatpush3.bf16.msra.mxu1 %v4268_v63  ;;  %2928 = vmatprep.subr.bf16.mxu0 %v4275_v28  ;;  %v449_v28 = vcombine.high %v425_v46, %v425_v46  ;;  %5492 = vst [vmem:[#allocation17_spill] sm:$0xff] %v4332_v62  ;;  %v4343_v46 = vld [vmem:[%s5368_s1 + $0x1b8] sm:$0xff]  }
  0x4a   : > { %2950 = vmatprep.subr.bf16.mxu1 %v4282_v34  ;;  %5494 = vst [vmem:[#allocation19_spill] sm:$0xff] %v4343_v46 }
  0x4b   : > { %v463_v58 = vrot.slane %v449_v28, %v4164_v41  ;;  %v4357_v28 = vld [vmem:[%s5368_s1 + $0x2c0] sm:$0xff]  }
  0x4c   : > { %2929 = vmatpush3.bf16.msra.mxu0 %v4287_v36  ;;  %v4337_v36 = vld [vmem:[%s5368_s1 + $0x138] sm:$0xff]   ;;  %5496 = vst [vmem:[#allocation21_spill] sm:$0xff] %v4357_v28 }
  0x4d   : > { %2951 = vmatpush3.bf16.msra.mxu1 %v4292_v37  ;;  %2930 = vmatprep.subr.bf16.mxu0 %v4299_v39  ;;  %5493 = vst [vmem:[#allocation18_spill] sm:$0xff] %v4337_v36  ;;  %v465_v39 = vcombine.high %v463_v58, %v463_v58 }
  0x4e   : > { %2952 = vmatprep.subr.bf16.mxu1 %v4306_v40 }
  0x4f   : > { %1258 = vmatprep.mubr.bf16.mxu1 %v465_v39  ;;  %v4386_v39 = vld [vmem:[%s5368_s1 + $0x208] sm:$0xff]  }
  0x50   : > { %2931 = vmatpush3.bf16.msra.mxu0 %v4311_v42  ;;  %v4362_v42 = vld [vmem:[%s5368_s1 + $0x200] sm:$0xff]   ;;  %5501 = vst [vmem:[#allocation26_spill] sm:$0xff] %v4386_v39 }
  0x51   : > { %2953 = vmatpush3.bf16.msra.mxu1 %v4316_v43  ;;  %2932 = vmatprep.subr.bf16.mxu0 %v4324_v47  ;;  %5497 = vst [vmem:[#allocation22_spill] sm:$0xff] %v4362_v42  ;;  %v4367_v43 = vld [vmem:[%s5368_s1 + $0x280] sm:$0xff]   ;;  %v4374_v47 = vld [vmem:[%s5368_s1 + $0x248] sm:$0xff]  }
  0x52   : > { %2954 = vmatprep.subr.bf16.mxu1 %v4332_v62  ;;  %5498 = vst [vmem:[#allocation23_spill] sm:$0xff] %v4367_v43  ;;  %5499 = vst [vmem:[#allocation24_spill] sm:$0xff] %v4374_v47  ;;  %v2849_v62 = vld [vmem:[%s4132_s30 + $0x1a] sm:$0xff] }
  0x54   : > { %2933 = vmatpush3.bf16.msra.mxu0 %v4337_v36  ;;  %v4391_v36 = vld [vmem:[%s5368_s1 + $0x288] sm:$0xff]  }
  0x55   : > { %2955 = vmatpush3.bf16.msra.mxu1 %v4343_v46  ;;  %2962 = vmatprep.subr.bf16.mxu0 %v4350_v56  ;;  %5502 = vst [vmem:[#allocation27_spill] sm:$0xff] %v4391_v36  ;;  %v4398_v56 = vld [vmem:[%s5368_s1 + $0x250] sm:$0xff]   ;;  %v4527_v46 = vld [vmem:[%s5368_s1 + $0x2f8] sm:$0xff]  }
  0x56   : > { %2984 = vmatprep.subr.bf16.mxu1 %v4357_v28  ;;  %5503 = vst [vmem:[#allocation28_spill] sm:$0xff] %v4398_v56  ;;  %5524 = vst [vmem:[#allocation49_spill] sm:$0xff] %v4527_v46 }
  0x57   : > { %1219 = vmatmul.mubr.bf16.vlgmr.msra.gmra.mrb[4].mxu0 %v456_v33  ;;  %v4405_v33 = vld [vmem:[%s5368_s1 + $0x2d0] sm:$0xff]  }
  0x58   : > { %1259 = vmatmul.mubr.bf16.vlgmr.msra.gmra.mrb[4].mxu1 %v463_v58  ;;  %2963 = vmatpush3.bf16.msra.mxu0 %v4362_v42  ;;  %5504 = vst [vmem:[#allocation29_spill] sm:$0xff] %v4405_v33  ;;  %v4410_v58 = vld [vmem:[%s5368_s1 + $0x210] sm:$0xff]  }
  0x59   : > { %2985 = vmatpush3.bf16.msra.mxu1 %v4367_v43  ;;  %2964 = vmatprep.subr.bf16.mxu0 %v4374_v47  ;;  %5505 = vst [vmem:[#allocation30_spill] sm:$0xff] %v4410_v58  ;;  %v4415_v42 = vld [vmem:[%s5368_s1 + $0x290] sm:$0xff]   ;;  %v4422_v47 = vld [vmem:[%s5368_s1 + $0x258] sm:$0xff]  }
  0x5a   : > { %2986 = vmatprep.subr.bf16.mxu1 %v4381_v60  ;;  %5506 = vst [vmem:[#allocation31_spill] sm:$0xff] %v4415_v42  ;;  %5507 = vst [vmem:[#allocation32_spill] sm:$0xff] %v4422_v47  ;;  %v4429_v60 = vld [vmem:[%s5368_s1 + $0x2d8] sm:$0xff]   ;;  %v426_v43 = vld [vmem:[%s4132_s30 + $0x10] sm:$0xff] }
  0x5b   : > { %5508 = vst [vmem:[#allocation33_spill] sm:$0xff] %v4429_v60  ;;  %v466_v28 = vcombine.high %v426_v43, %v426_v43 }
  0x5c   : > { %2965 = vmatpush3.bf16.msra.mxu0 %v4386_v39  ;;  %v4434_v39 = vld [vmem:[%s5368_s1 + $0x218] sm:$0xff]  }
  0x5d   : > { %2987 = vmatpush3.bf16.msra.mxu1 %v4391_v36  ;;  %2966 = vmatprep.subr.bf16.mxu0 %v4398_v56  ;;  %5509 = vst [vmem:[#allocation34_spill] sm:$0xff] %v4434_v39  ;;  %v4439_v36 = vld [vmem:[%s5368_s1 + $0x298] sm:$0xff]   ;;  %v4446_v56 = vld [vmem:[%s5368_s1 + $0x260] sm:$0xff]  }
  0x5e   : > { %2988 = vmatprep.subr.bf16.mxu1 %v4405_v33  ;;  %5510 = vst [vmem:[#allocation35_spill] sm:$0xff] %v4439_v36  ;;  %5511 = vst [vmem:[#allocation36_spill] sm:$0xff] %v4446_v56  ;;  %v4453_v33 = vld [vmem:[%s5368_s1 + $0x2e0] sm:$0xff]  }
  0x5f   : > { %5512 = vst [vmem:[#allocation37_spill] sm:$0xff] %v4453_v33 }
  0x60   : > { %2967 = vmatpush3.bf16.msra.mxu0 %v4410_v58  ;;  %v4458_v58 = vld [vmem:[%s5368_s1 + $0x220] sm:$0xff]  }
  0x61   : > { %2989 = vmatpush3.bf16.msra.mxu1 %v4415_v42  ;;  %2968 = vmatprep.subr.bf16.mxu0 %v4422_v47  ;;  %5513 = vst [vmem:[#allocation38_spill] sm:$0xff] %v4458_v58  ;;  %v4463_v42 = vld [vmem:[%s5368_s1 + $0x2a0] sm:$0xff]   ;;  %v4470_v47 = vld [vmem:[%s5368_s1 + $0x268] sm:$0xff]  }
  0x62   : > { %2990 = vmatprep.subr.bf16.mxu1 %v4429_v60  ;;  %5514 = vst [vmem:[#allocation39_spill] sm:$0xff] %v4463_v42  ;;  %5515 = vst [vmem:[#allocation40_spill] sm:$0xff] %v4470_v47  ;;  %v4477_v60 = vld [vmem:[%s5368_s1 + $0x2e8] sm:$0xff]  }
  0x63   : > { %5516 = vst [vmem:[#allocation41_spill] sm:$0xff] %v4477_v60 }
  0x64   : > { %2969 = vmatpush3.bf16.msra.mxu0 %v4434_v39  ;;  %v4482_v39 = vld [vmem:[%s5368_s1 + $0x228] sm:$0xff]  }
  0x65   : > { %2991 = vmatpush3.bf16.msra.mxu1 %v4439_v36  ;;  %2970 = vmatprep.subr.bf16.mxu0 %v4446_v56  ;;  %5517 = vst [vmem:[#allocation42_spill] sm:$0xff] %v4482_v39  ;;  %v4487_v36 = vld [vmem:[%s5368_s1 + $0x2a8] sm:$0xff]   ;;  %v4494_v56 = vld [vmem:[%s5368_s1 + $0x270] sm:$0xff]  }
  0x66   : > { %2992 = vmatprep.subr.bf16.mxu1 %v4453_v33  ;;  %5518 = vst [vmem:[#allocation43_spill] sm:$0xff] %v4487_v36  ;;  %5519 = vst [vmem:[#allocation44_spill] sm:$0xff] %v4494_v56  ;;  %v4501_v33 = vld [vmem:[%s5368_s1 + $0x2f0] sm:$0xff]  }
  0x67   : > { %5520 = vst [vmem:[#allocation45_spill] sm:$0xff] %v4501_v33 }
  0x68   : > { %2971 = vmatpush3.bf16.msra.mxu0 %v4458_v58  ;;  %v4506_v58 = vld [vmem:[%s5368_s1 + $0x230] sm:$0xff]  }
  0x69   : > { %2993 = vmatpush3.bf16.msra.mxu1 %v4463_v42  ;;  %2972 = vmatprep.subr.bf16.mxu0 %v4470_v47  ;;  %5521 = vst [vmem:[#allocation46_spill] sm:$0xff] %v4506_v58  ;;  %v4511_v42 = vld [vmem:[%s5368_s1 + $0x2b0] sm:$0xff]   ;;  %v4519_v47 = vld [vmem:[%s5368_s1 + $0x278] sm:$0xff]  }
  0x6a   : > { %2994 = vmatprep.subr.bf16.mxu1 %v4477_v60  ;;  %5522 = vst [vmem:[#allocation47_spill] sm:$0xff] %v4511_v42  ;;  %5523 = vst [vmem:[#allocation48_spill] sm:$0xff] %v4519_v47  ;;  %v473_v60 = vrot.slane %v426_v43, %v4164_v41  ;;  %v4535_v43 = vld [vmem:[%s5368_s1 + $0x238] sm:$0xff]  }
  0x6c   : > { %2973 = vmatpush3.bf16.msra.mxu0 %v4482_v39  ;;  %v481_v39 = vcombine.high %v473_v60, %v473_v60 }
  0x6d   : > { %2995 = vmatpush3.bf16.msra.mxu1 %v4487_v36  ;;  %2974 = vmatprep.subr.bf16.mxu0 %v4494_v56  ;;  %v480_v36 = vrot.slane %v466_v28, %v4164_v41  ;;  %v4540_v56 = vld [vmem:[%s5368_s1 + $0x2b8] sm:$0xff]   ;;  %v1395_v28 = vcombine.high %v2849_v62, %v2849_v62 }
  0x6e   : > { %2996 = vmatprep.subr.bf16.mxu1 %v4501_v33  ;;  %5525 = vst [vmem:[#allocation50_spill] sm:$0xff] %v4540_v56  ;;  %1298 = vmatprep.mubr.bf16.mxu0 %v481_v39  ;;  %v4560_v39 = vld [vmem:[%s5368_s1 + $0x308] sm:$0xff]  }
  0x6f   : > { %v482_v33 = vcombine.high %v480_v36, %v480_v36 }
  0x70   : > { %2975 = vmatpush3.bf16.msra.mxu0 %v4506_v58  ;;  %v1409_v58 = vrot.slane %v1395_v28, %v4164_v41  ;;  %v5544_v28 = vld [vmem:[#allocation16_spill] sm:$0xff] }
  0x71   : > { %2997 = vmatpush3.bf16.msra.mxu1 %v4511_v42  ;;  %2976 = vmatprep.subr.bf16.mxu0 %v4519_v47  ;;  %v4551_v42 = vld [vmem:[%s5368_s1 + $0x300] sm:$0xff]  }
  0x72   : > { %2998 = vmatprep.subr.bf16.mxu1 %v4527_v46  ;;  %1338 = vmatprep.mubr.bf16.mxu1 %v482_v33  ;;  %v1411_v47 = vcombine.high %v1409_v58, %v1409_v58  ;;  %v5542_v33 = vld [vmem:[#allocation14_spill] sm:$0xff] }
  0x74   : > { %2977 = vmatpush3.bf16.msra.mxu0 %v4535_v43 }
  0x75   : > { %2999 = vmatpush3.bf16.msra.mxu1 %v4540_v56  ;;  %3033 = vmatprep.subr.bf16.mxu0 %v3957_v1  ;;  %v4571_v1 = vld [vmem:[%s5368_s1 + $0x310] sm:$0xff]  }
  0x76   : > { %3441 = vmatprep.subr.bf16.mxu1 %v5460_v54 }
  0x77   : > { %1299 = vmatmul.mubr.bf16.vlgmr.msra.gmra.mrb[8].mxu0 %v473_v60  ;;  %v5541_v60 = vld [vmem:[#allocation29_spill] sm:$0xff] }
  0x78   : > { %1339 = vmatmul.mubr.bf16.vlgmr.msra.gmra.mrb[8].mxu1 %v480_v36  ;;  %3034 = vmatpush3.bf16.msra.mxu0 %v3969_v3  ;;  %v4580_v3 = vld [vmem:[%s5368_s1 + $0x318] sm:$0xff]  }
  0x79   : > { %3442 = vmatpush3.bf16.msra.mxu1 %v4551_v42  ;;  %3035 = vmatprep.subr.bf16.mxu0 %v3981_v5  ;;  %v1402_v5 = vrot.slane %v2849_v62, %v4164_v41  ;;  %v5538_v62 = vld [vmem:[#allocation12_spill] sm:$0xff]  ;;  %v5539_v36 = vld [vmem:[#allocation27_spill] sm:$0xff] }
  0x7a   : > { %3443 = vmatprep.subr.bf16.mxu1 %v5460_v54  ;;  %3449 = vmatprep.mubr.msk.bf16.mxu1 %vm3868_vm0, %v5460_v54 }
  0x7b   : > { %1540 = vmatprep.mubr.bf16.mxu0 %v1411_v47  ;;  %v5540_v47 = vld [vmem:[#allocation13_spill] sm:$0xff] }
  0x7c   : > { %3036 = vmatpush3.bf16.msra.mxu0 %v3993_v7  ;;  %v2747_v7 = vld.sshfl [vmem:[%s4132_s30 + $0x18] sm:$0x3 pattern:$0x76325410] }
  0x7d   : > { %3444 = vmatpush3.bf16.msra.mxu1 %v4560_v39  ;;  %3037 = vmatprep.subr.bf16.mxu0 %v4005_v9  ;;  %v1410_v9 = vcombine.high %v1402_v5, %v1402_v5 }
  0x7e   : > { %3445 = vmatprep.subr.bf16.mxu1 %v5460_v54 }
  0x80   : > { %3038 = vmatpush3.bf16.msra.mxu0 %v4017_v11  ;;  %v2850_v11 = vld [vmem:[%s4132_s30 + $0x22] sm:$0xff] }
  0x81   : > { %3446 = vmatpush3.bf16.msra.mxu1 %v4571_v1  ;;  %3039 = vmatprep.subr.bf16.mxu0 %v4029_v13  ;;  %v5526_v13 = vld [vmem:[#allocation6_spill] sm:$0xff] }
  0x82   : > { %3447 = vmatprep.subr.bf16.mxu1 %v5460_v54  ;;  %v5553_v54 = vld [vmem:[#allocation41_spill] sm:$0xff] }
  0x84   : > { %3040 = vmatpush3.bf16.msra.mxu0 %v4041_v15  ;;  %v5528_v15 = vld [vmem:[#allocation7_spill] sm:$0xff] }
  0x85   : > { %3448 = vmatpush3.bf16.msra.mxu1 %v4580_v3  ;;  %3041 = vmatprep.subr.bf16.mxu0 %v4053_v17 }
  0x86   : > { %3011 = vmatprep.subr.bf16.mxu1 %v3952_v0  ;;  %v1412_v0 = vcombine.high %v2850_v11, %v2850_v11 }
  0x88   : > { %3450 = vmatmul.mubr.msk.bf16.vlgmr.msra.gmra.mrb[12].mxu1 %vm1102_vm1, %v2747_v7  ;;  %3042 = vmatpush3.bf16.msra.mxu0 %v4066_v19  ;;  %v5531_v19 = vld [vmem:[#allocation19_spill] sm:$0xff] }
  0x89   : > { %3012 = vmatpush3.bf16.msra.mxu1 %v3963_v2  ;;  %3043 = vmatprep.subr.bf16.mxu0 %v4078_v21  ;;  %v1426_v2 = vrot.slane %v1412_v0, %v4164_v41  ;;  %v5532_v21 = vld [vmem:[#allocation9_spill] sm:$0xff]  ;;  %v5548_v0 = vld [vmem:[#allocation20_spill] sm:$0xff] }
  0x8a   : > { %3013 = vmatprep.subr.bf16.mxu1 %v3975_v4  ;;  %1500 = vmatprep.mubr.bf16.mxu1 %v1410_v9  ;;  %v5546_v9 = vld [vmem:[#allocation18_spill] sm:$0xff] }
  0x8b   : > { %v1428_v4 = vcombine.high %v1426_v2, %v1426_v2 }
  0x8c   : > { %3044 = vmatpush3.bf16.msra.mxu0 %v4091_v23  ;;  %v5533_v23 = vld [vmem:[#allocation21_spill] sm:$0xff] }
  0x8d   : > { %3014 = vmatpush3.bf16.msra.mxu1 %v3987_v6  ;;  %3045 = vmatprep.subr.bf16.mxu0 %v4103_v25  ;;  %v1419_v6 = vrot.slane %v2850_v11, %v4164_v41  ;;  %v5547_v11 = vld [vmem:[#allocation35_spill] sm:$0xff] }
  0x8e   : > { %3015 = vmatprep.subr.bf16.mxu1 %v3999_v8 }
  0x8f   : > { %v1427_v8 = vcombine.high %v1419_v6, %v1419_v6 }
  0x90   : > { %3046 = vmatpush3.bf16.msra.mxu0 %v4115_v27  ;;  %v5534_v27 = vld [vmem:[#allocation10_spill] sm:$0xff] }
  0x91   : > { %3016 = vmatpush3.bf16.msra.mxu1 %v4011_v10  ;;  %3047 = vmatprep.subr.bf16.mxu0 %v4127_v30  ;;  %v2851_v10 = vld [vmem:[%s4132_s30 + $0x2a] sm:$0xff]  ;;  %v5535_v30 = vld [vmem:[#allocation23_spill] sm:$0xff] }
  0x92   : > { %3017 = vmatprep.subr.bf16.mxu1 %v4023_v12  ;;  %v1429_v12 = vcombine.high %v2851_v10, %v2851_v10  ;;  %v1436_v7 = vrot.slane %v2851_v10, %v4164_v41  ;;  %v5554_v10 = vld [vmem:[#allocation26_spill] sm:$0xff] }
  0x94   : > { %3048 = vmatpush3.bf16.msra.mxu0 %v4144_v32  ;;  %v1443_v17 = vrot.slane %v1429_v12, %v4164_v41  ;;  %v5536_v32 = vld [vmem:[#allocation11_spill] sm:$0xff] }
  0x95   : > { %3018 = vmatpush3.bf16.msra.mxu1 %v4035_v14  ;;  %3077 = vmatprep.subr.bf16.mxu0 %v4160_v38  ;;  %v5527_v14 = vld [vmem:[#allocation15_spill] sm:$0xff]  ;;  %v5537_v38 = vld [vmem:[#allocation25_spill] sm:$0xff] }
  0x96   : > { %3019 = vmatprep.subr.bf16.mxu1 %v4047_v16  ;;  %v5529_v16 = vld [vmem:[#allocation17_spill] sm:$0xff]  ;;  %v1445_v25 = vcombine.high %v1443_v17, %v1443_v17  ;;  %v5551_v12 = vld [vmem:[#allocation39_spill] sm:$0xff] }
  0x97   : > { %1541 = vmatmul.mubr.bf16.vlgmr.msra.gmra.mrb[12].mxu0 %v1409_v58  ;;  %v5543_v58 = vld [vmem:[#allocation31_spill] sm:$0xff] }
  0x98   : > { %3078 = vmatpush3.bf16.msra.mxu0 %v4176_v45  ;;  %1620 = vmatprep.mubr.bf16.mxu0 %v1428_v4  ;;  %v1444_v4 = vcombine.high %v1436_v7, %v1436_v7 }
  0x99   : > { %3020 = vmatpush3.bf16.msra.mxu1 %v4060_v18  ;;  %3079 = vmatprep.subr.bf16.mxu0 %v4186_v49  ;;  %v5530_v18 = vld [vmem:[#allocation8_spill] sm:$0xff] }
  0x9a   : > { %3021 = vmatprep.subr.bf16.mxu1 %v4072_v20 }
  0x9c   : > { %3080 = vmatpush3.bf16.msra.mxu0 %v4196_v51 }
  0x9d   : > { %3022 = vmatpush3.bf16.msra.mxu1 %v4085_v22  ;;  %3081 = vmatprep.subr.bf16.mxu0 %v4210_v53 }
  0x9e   : > { %3023 = vmatprep.subr.bf16.mxu1 %v4097_v24 }
  0xa0   : > { %3082 = vmatpush3.bf16.msra.mxu0 %v4220_v55 }
  0xa1   : > { %3024 = vmatpush3.bf16.msra.mxu1 %v4109_v26  ;;  %3083 = vmatprep.subr.bf16.mxu0 %v4234_v57 }
  0xa2   : > { %3025 = vmatprep.subr.bf16.mxu1 %v4121_v29 }
  0xa4   : > { %3084 = vmatpush3.bf16.msra.mxu0 %v4244_v59 }
  0xa5   : > { %3026 = vmatpush3.bf16.msra.mxu1 %v4138_v31  ;;  %3085 = vmatprep.subr.bf16.mxu0 %v4258_v61 }
  0xa6   : > { %3055 = vmatprep.subr.bf16.mxu1 %v4153_v35 }
  0xa8   : > { %1501 = vmatmul.mubr.bf16.vlgmr.msra.gmra.mrb[16].mxu1 %v1402_v5  ;;  %3086 = vmatpush3.bf16.msra.mxu0 %v4268_v63  ;;  %v5545_v5 = vld [vmem:[#allocation33_spill] sm:$0xff] }
  0xa9   : > { %3056 = vmatpush3.bf16.msra.mxu1 %v4171_v44  ;;  %3087 = vmatprep.subr.bf16.mxu0 %v4282_v34 }
  0xaa   : > { %3057 = vmatprep.subr.bf16.mxu1 %v4181_v48  ;;  %1580 = vmatprep.mubr.bf16.mxu1 %v1427_v8  ;;  %v5550_v8 = vld [vmem:[#allocation22_spill] sm:$0xff] }
  0xac   : > { %3088 = vmatpush3.bf16.msra.mxu0 %v4292_v37 }
  0xad   : > { %3058 = vmatpush3.bf16.msra.mxu1 %v4191_v50  ;;  %3089 = vmatprep.subr.bf16.mxu0 %v4306_v40 }
  0xae   : > { %3059 = vmatprep.subr.bf16.mxu1 %v4203_v52 }
  0xb0   : > { %3090 = vmatpush3.bf16.msra.mxu0 %v5527_v14 }
  0xb1   : > { %3060 = vmatpush3.bf16.msra.mxu1 %v5526_v13  ;;  %3091 = vmatprep.subr.bf16.mxu0 %v5529_v16 }
  0xb2   : > { %3061 = vmatprep.subr.bf16.mxu1 %v5528_v15 }
  0xb4   : > { %3092 = vmatpush3.bf16.msra.mxu0 %v5531_v19  ;;  %v5577_v19 = vmov 0.0  }
  0xb5   : > { %3062 = vmatpush3.bf16.msra.mxu1 %v5530_v18  ;;  %3121 = vmatprep.subr.bf16.mxu0 %v5533_v23  ;;  %v5574_v23 = vld [vmem:[#allocation48_spill] sm:$0xff] }
  0xb6   : > { %3063 = vmatprep.subr.bf16.mxu1 %v5532_v21 }
  0xb7   : > { %1621 = vmatmul.mubr.bf16.vlgmr.msra.gmra.mrb[16].mxu0 %v1426_v2  ;;  %v5549_v2 = vld [vmem:[#allocation37_spill] sm:$0xff] }
  0xb8   : > { %3122 = vmatpush3.bf16.msra.mxu0 %v5535_v30  ;;  %1700 = vmatprep.mubr.bf16.mxu0 %v1445_v25  ;;  %v5552_v25 = vld [vmem:[#allocation24_spill] sm:$0xff]  ;;  %v4709_v30 = vld [vmem:[%s5368_s1 + $0x50] sm:$0xff]  }
  0xb9   : > { %3064 = vmatpush3.bf16.msra.mxu1 %v5534_v27  ;;  %3123 = vmatprep.subr.bf16.mxu0 %v5537_v38  ;;  %v4695_v38 = vld [vmem:[%s5368_s1 + $0x48] sm:$0xff]   ;;  %5571 = vst [vmem:[#allocation8_spill] sm:$0xff] %v4709_v30 }
  0xba   : > { %3065 = vmatprep.subr.bf16.mxu1 %v5536_v32  ;;  %5567 = vst [vmem:[#allocation7_spill] sm:$0xff] %v4695_v38 }
  0xbc   : > { %3124 = vmatpush3.bf16.msra.mxu0 %v5539_v36  ;;  %v5560_v36 = vld [vmem:[#allocation32_spill] sm:$0xff] }
  0xbd   : > { %3066 = vmatpush3.bf16.msra.mxu1 %v5538_v62  ;;  %3125 = vmatprep.subr.bf16.mxu0 %v5541_v60  ;;  %v5558_v60 = vld [vmem:[#allocation30_spill] sm:$0xff] }
  0xbe   : > { %3067 = vmatprep.subr.bf16.mxu1 %v5540_v47 }
  0xc0   : > { %3126 = vmatpush3.bf16.msra.mxu0 %v5543_v58  ;;  %v5557_v58 = vld [vmem:[#allocation45_spill] sm:$0xff] }
  0xc1   : > { %3068 = vmatpush3.bf16.msra.mxu1 %v5542_v33  ;;  %3127 = vmatprep.subr.bf16.mxu0 %v5545_v5  ;;  %v5555_v5 = vld [vmem:[#allocation43_spill] sm:$0xff] }
  0xc2   : > { %3069 = vmatprep.subr.bf16.mxu1 %v5544_v28 }
  0xc4   : > { %3128 = vmatpush3.bf16.msra.mxu0 %v5547_v11  ;;  %v5556_v11 = vld [vmem:[#allocation28_spill] sm:$0xff] }
  0xc5   : > { %3070 = vmatpush3.bf16.msra.mxu1 %v5546_v9  ;;  %3129 = vmatprep.subr.bf16.mxu0 %v5549_v2  ;;  %v2855_v2 = vld [vmem:[%s4132_s30 + $0x34] sm:$0xff] }
  0xc6   : > { %3099 = vmatprep.subr.bf16.mxu1 %v5548_v0 }
  0xc8   : > { %1581 = vmatmul.mubr.bf16.vlgmr.msra.gmra.mrb[20].mxu1 %v1419_v6  ;;  %3130 = vmatpush3.bf16.msra.mxu0 %v5551_v12  ;;  %v5559_v6 = vld [vmem:[#allocation47_spill] sm:$0xff]  ;;  %v5564_v12 = vld [vmem:[#allocation38_spill] sm:$0xff] }
  0xc9   : > { %3100 = vmatpush3.bf16.msra.mxu1 %v5550_v8  ;;  %3131 = vmatprep.subr.bf16.mxu0 %v5553_v54  ;;  %v1765_v54 = vrot.slane %v2855_v2, %v4164_v41 }
  0xca   : > { %3101 = vmatprep.subr.bf16.mxu1 %v5552_v25  ;;  %1660 = vmatprep.mubr.bf16.mxu1 %v1444_v4  ;;  %v5561_v4 = vld [vmem:[#allocation34_spill] sm:$0xff] }
  0xcc   : > { %3132 = vmatpush3.bf16.msra.mxu0 %v5555_v5  ;;  %v5562_v5 = vld [vmem:[#allocation36_spill] sm:$0xff] }
  0xcd   : > { %3102 = vmatpush3.bf16.msra.mxu1 %v5554_v10  ;;  %3133 = vmatprep.subr.bf16.mxu0 %v5557_v58  ;;  %v4681_v58 = vld [vmem:[%s5368_s1 + $0x40] sm:$0xff]  }
  0xce   : > { %3103 = vmatprep.subr.bf16.mxu1 %v5556_v11  ;;  %5563 = vst [vmem:[#allocation6_spill] sm:$0xff] %v4681_v58 }
  0xd0   : > { %3134 = vmatpush3.bf16.msra.mxu0 %v5559_v6  ;;  %v1773_v6 = vcombine.high %v1765_v54, %v1765_v54 }
  0xd1   : > { %3104 = vmatpush3.bf16.msra.mxu1 %v5558_v60  ;;  %3135 = vmatprep.subr.bf16.mxu0 %v4527_v46  ;;  %v4688_v46 = vld [vmem:[%s5368_s1] sm:$0xff]  }
  0xd2   : > { %3105 = vmatprep.subr.bf16.mxu1 %v5560_v36  ;;  %5565 = vst [vmem:[#allocation15_spill] sm:$0xff] %v4688_v46 }
  0xd4   : > { %3136 = vmatpush3.bf16.msra.mxu0 %v4540_v56  ;;  %v5566_v56 = vld [vmem:[#allocation40_spill] sm:$0xff] }
  0xd5   : > { %3106 = vmatpush3.bf16.msra.mxu1 %v5561_v4  ;;  %3148 = vmatprep.subr.bf16.mxu0 %v4681_v58  ;;  %v4702_v58 = vld [vmem:[%s5368_s1 + $0x8] sm:$0xff]  }
  0xd6   : > { %3107 = vmatprep.subr.bf16.mxu1 %v5562_v5  ;;  %5569 = vst [vmem:[#allocation17_spill] sm:$0xff] %v4702_v58 }
  0xd7   : > { %1701 = vmatmul.mubr.bf16.vlgmr.msra.gmra.mrb[20].mxu0 %v1443_v17  ;;  %v5568_v17 = vld [vmem:[#allocation42_spill] sm:$0xff] }
  0xd8   : > { %3149 = vmatpush3.bf16.msra.mxu0 %v4688_v46  ;;  %1863 = vmatprep.mubr.bf16.mxu0 %v1773_v6  ;;  %v5570_v46 = vld [vmem:[#allocation44_spill] sm:$0xff]  ;;  %v4716_v6 = vld [vmem:[%s5368_s1 + $0x10] sm:$0xff]  }
  0xd9   : > { %3108 = vmatpush3.bf16.msra.mxu1 %v5564_v12  ;;  %3150 = vmatprep.subr.bf16.mxu0 %v4695_v38  ;;  %v5572_v38 = vld [vmem:[#allocation46_spill] sm:$0xff]  ;;  %5573 = vst [vmem:[#allocation9_spill] sm:$0xff] %v4716_v6 }
  0xda   : > { %3109 = vmatprep.subr.bf16.mxu1 %v5566_v56 }
  0xdc   : > { %3151 = vmatpush3.bf16.msra.mxu0 %v4702_v58  ;;  %v4723_v58 = vld [vmem:[%s5368_s1 + $0x58] sm:$0xff]  }
  0xdd   : > { %3110 = vmatpush3.bf16.msra.mxu1 %v5568_v17  ;;  %3152 = vmatprep.subr.bf16.mxu0 %v4709_v30  ;;  %5575 = vst [vmem:[#allocation10_spill] sm:$0xff] %v4723_v58  ;;  %v4730_v30 = vld [vmem:[%s5368_s1 + $0x18] sm:$0xff]  }
  0xde   : > { %3111 = vmatprep.subr.bf16.mxu1 %v5570_v46  ;;  %5576 = vst [vmem:[#allocation11_spill] sm:$0xff] %v4730_v30 }
  0xe0   : > { %3153 = vmatpush3.bf16.msra.mxu0 %v4716_v6  ;;  %v4737_v6 = vld [vmem:[%s5368_s1 + $0x60] sm:$0xff]  }
  0xe1   : > { %3112 = vmatpush3.bf16.msra.mxu1 %v5572_v38  ;;  %3154 = vmatprep.subr.bf16.mxu0 %v4723_v58  ;;  %5578 = vst [vmem:[#allocation12_spill] sm:$0xff] %v4737_v6  ;;  %v4744_v58 = vld [vmem:[%s5368_s1 + $0x20] sm:$0xff]  }
  0xe2   : > { %3113 = vmatprep.subr.bf16.mxu1 %v5574_v23  ;;  %5579 = vst [vmem:[#allocation13_spill] sm:$0xff] %v4744_v58 }
  0xe4   : > { %3155 = vmatpush3.bf16.msra.mxu0 %v4730_v30 }
  0xe5   : > { %3114 = vmatpush3.bf16.msra.mxu1 %v4535_v43  ;;  %3156 = vmatprep.subr.bf16.mxu0 %v4737_v6  ;;  %v4756_v6 = vld [vmem:[%s4132_s30 + $0x3c] sm:$0xff] }
  0xe6   : > { %3453 = vmatprep.subr.bf16.mxu1 %v5577_v19 }
  0xe8   : > { %1661 = vmatmul.mubr.bf16.vlgmr.msra.gmra.mrb[24].mxu1 %v1436_v7  ;;  %3157 = vmatpush3.bf16.msra.mxu0 %v4744_v58  ;;  %v1758_v7 = vcombine.high %v2855_v2, %v2855_v2 }
  0xe9   : > { %3454 = vmatpush3.bf16.msra.mxu1 %v4551_v42  ;;  %3158 = vmatprep.subr.bf16.mxu0 %v4072_v20 }
  0xea   : > { %3455 = vmatprep.subr.bf16.mxu1 %v5577_v19  ;;  %3461 = vmatprep.mubr.msk.bf16.mxu1 %vm3868_vm0, %v5577_v19  ;;  %v4763_v20 = vrot.slane %v1758_v7, %v4164_v41 }
  0xec   : > { %3159 = vmatpush3.bf16.msra.mxu0 %v4085_v22  ;;  %v4767_v22 = vrot.slane %v4756_v6, %v4164_v41 }
  0xed   : > { %3456 = vmatpush3.bf16.msra.mxu1 %v4560_v39  ;;  %3160 = vmatprep.subr.bf16.mxu0 %v4097_v24  ;;  %v2853_v24 = vld.sshfl [vmem:[%s4132_s30 + $0x32] sm:$0x3 pattern:$0x76325410] }
  0xee   : > { %3457 = vmatprep.subr.bf16.mxu1 %v5577_v19  ;;  %v1790_v2 = vcombine.high %v4767_v22, %v4767_v22 }
  0xf0   : > { %3161 = vmatpush3.bf16.msra.mxu0 %v4109_v26  ;;  %v4775_v26 = vld [vmem:[%s5368_s1 + $0xc0] sm:$0xff]  }
  0xf1   : > { %3458 = vmatpush3.bf16.msra.mxu1 %v4571_v1  ;;  %3162 = vmatprep.subr.bf16.mxu0 %v4121_v29  ;;  %v1774_v29 = vcombine.high %v4763_v20, %v4763_v20 }
  0xf2   : > { %3459 = vmatprep.subr.bf16.mxu1 %v5577_v19 }
  0xf4   : > { %3163 = vmatpush3.bf16.msra.mxu0 %v4138_v31  ;;  %v4787_v31 = vld [vmem:[%s5368_s1 + $0x80] sm:$0xff]  }
  0xf5   : > { %3460 = vmatpush3.bf16.msra.mxu1 %v4580_v3  ;;  %3192 = vmatprep.subr.bf16.mxu0 %v4153_v35  ;;  %v4794_v35 = vld [vmem:[%s5368_s1 + $0xc8] sm:$0xff]  }
  0xf6   : > { %3170 = vmatprep.subr.bf16.mxu1 %v4775_v26 }
  0xf7   : > { %1864 = vmatmul.mubr.bf16.vlgmr.msra.gmra.mrb[24].mxu0 %v1765_v54  ;;  %v4801_v54 = vld [vmem:[%s5368_s1 + $0x88] sm:$0xff]  }
  0xf8   : > { %3462 = vmatmul.mubr.msk.bf16.vlgmr.msra.gmra.mrb[28].mxu1 %vm1102_vm1, %v2853_v24  ;;  %3193 = vmatpush3.bf16.msra.mxu0 %v4171_v44  ;;  %v4808_v44 = vld [vmem:[%s5368_s1 + $0xd0] sm:$0xff]  }
  0xf9   : > { %3171 = vmatpush3.bf16.msra.mxu1 %v4787_v31  ;;  %3194 = vmatprep.subr.bf16.mxu0 %v4181_v48  ;;  %v4815_v48 = vld [vmem:[%s5368_s1 + $0x90] sm:$0xff]  }
  0xfa   : > { %3172 = vmatprep.subr.bf16.mxu1 %v4794_v35  ;;  %1903 = vmatprep.mubr.bf16.mxu1 %v1774_v29 }
  0xfb   : > { %1943 = vmatprep.mubr.bf16.mxu0 %v1790_v2 }
  0xfc   : > { %3195 = vmatpush3.bf16.msra.mxu0 %v4191_v50  ;;  %v4822_v50 = vld [vmem:[%s5368_s1 + $0xd8] sm:$0xff]  }
  0xfd   : > { %3173 = vmatpush3.bf16.msra.mxu1 %v4801_v54  ;;  %3196 = vmatprep.subr.bf16.mxu0 %v4203_v52  ;;  %v4829_v52 = vld [vmem:[%s5368_s1 + $0x98] sm:$0xff]  }
  0xfe   : > { %3174 = vmatprep.subr.bf16.mxu1 %v4808_v44 }
 0x100   : > { %3197 = vmatpush3.bf16.msra.mxu0 %v5526_v13  ;;  %v4836_v13 = vld [vmem:[%s5368_s1 + $0xe0] sm:$0xff]  }
 0x101   : > { %3175 = vmatpush3.bf16.msra.mxu1 %v4815_v48  ;;  %3198 = vmatprep.subr.bf16.mxu0 %v5528_v15  ;;  %v4843_v15 = vld [vmem:[%s5368_s1 + $0xa0] sm:$0xff]  }
 0x102   : > { %3176 = vmatprep.subr.bf16.mxu1 %v4822_v50  ;;  %5580 = vst [vmem:[#allocation14_spill] sm:$0xff] %v4843_v15 }
 0x104   : > { %3199 = vmatpush3.bf16.msra.mxu0 %v5530_v18  ;;  %v4850_v18 = vld [vmem:[%s5368_s1 + $0xe8] sm:$0xff]  }
 0x105   : > { %3177 = vmatpush3.bf16.msra.mxu1 %v4829_v52  ;;  %3200 = vmatprep.subr.bf16.mxu0 %v5532_v21  ;;  %5581 = vst [vmem:[#allocation16_spill] sm:$0xff] %v4850_v18 }
 0x106   : > { %3178 = vmatprep.subr.bf16.mxu1 %v4836_v13 }
 0x108   : > { %3201 = vmatpush3.bf16.msra.mxu0 %v5534_v27  ;;  %v4857_v27 = vld [vmem:[%s5368_s1 + $0xa8] sm:$0xff]  }
 0x109   : > { %3179 = vmatpush3.bf16.msra.mxu1 %v4843_v15  ;;  %3202 = vmatprep.subr.bf16.mxu0 %v5536_v32  ;;  %v4864_v32 = vld [vmem:[%s5368_s1 + $0xf0] sm:$0xff]  }
 0x10a   : > { %3180 = vmatprep.subr.bf16.mxu1 %v4850_v18  ;;  %v2890_v7 = vpop.f32.mrb[0].mxu0 }
 0x10b   : > { %v2912_v21 = vpop.f32.mrb[0].mxu1  ;;  %v2891_v24 = vpop.f32.mrb[1].mxu0 }
 0x10c   : > { %v2913_v29 = vpop.f32.mrb[1].mxu1  ;;  %v2892_v2 = vadd.f32 %v2891_v24, %v2890_v7  ;;  %3203 = vmatpush3.bf16.msra.mxu0 %v5538_v62  ;;  %v2893_v18 = vpop.f32.mrb[2].mxu0  ;;  %v4871_v24 = vld [vmem:[%s4132_s30 + $0x44] sm:$0xff]  ;;  %v4876_v62 = vld [vmem:[%s5368_s1 + $0xb0] sm:$0xff]  }
 0x10d   : > { %v2914_v58 = vadd.f32 %v2913_v29, %v2912_v21  ;;  %v2915_v30 = vpop.f32.mrb[2].mxu1  ;;  %3181 = vmatpush3.bf16.msra.mxu1 %v4857_v27  ;;  %3204 = vmatprep.subr.bf16.mxu0 %v5540_v47  ;;  %v1775_v21 = vcombine.high %v4756_v6, %v4756_v6  ;;  %v4883_v47 = vld [vmem:[%s5368_s1 + $0xf8] sm:$0xff]   ;;  %v1799_v6 = vrot.slane %v4871_v24, %v4164_v41 }
 0x10e   : > { %v2916_v15 = vpop.f32.mrb[3].mxu1  ;;  %3182 = vmatprep.subr.bf16.mxu1 %v4864_v32  ;;  %v2894_v30 = vpop.f32.mrb[3].mxu0 }
 0x10f   : > { %v1181_v7 = vadd.f32 %v2914_v58, %v2892_v2  ;;  %v1789_v58 = vrot.slane %v1775_v21, %v4164_v41  ;;  %v4893_v15 = vld [vmem:[%s5368_s1 + $0xb8] sm:$0xff]   ;;  %v1807_v18 = vcombine.high %v1799_v6, %v1799_v6 }
 0x110   : > { %3205 = vmatpush3.bf16.msra.mxu0 %v5542_v33  ;;  %v4900_v33 = vld [vmem:[%s5368_s1 + $0x1c0] sm:$0xff]  }
 0x111   : > { %3183 = vmatpush3.bf16.msra.mxu1 %v4876_v62  ;;  %3206 = vmatprep.subr.bf16.mxu0 %v5544_v28  ;;  %v1791_v28 = vcombine.high %v1789_v58, %v1789_v58 }
 0x112   : > { %3184 = vmatprep.subr.bf16.mxu1 %v4883_v47 }
 0x114   : > { %3207 = vmatpush3.bf16.msra.mxu0 %v5546_v9  ;;  %v5587_v9 = vld [vmem:[#allocation29_spill] sm:$0xff] }
 0x115   : > { %3185 = vmatpush3.bf16.msra.mxu1 %v4893_v15  ;;  %3236 = vmatprep.subr.bf16.mxu0 %v5548_v0  ;;  %v5588_v0 = vld [vmem:[#allocation31_spill] sm:$0xff] }
 0x116   : > { %3214 = vmatprep.subr.bf16.mxu1 %v4900_v33 }
 0x117   : > { %1944 = vmatmul.mubr.bf16.vlgmr.msra.gmra.mrb[28].mxu0 %v4767_v22  ;;  %v5593_v22 = vld [vmem:[#allocation41_spill] sm:$0xff] }
 0x118   : > { %1904 = vmatmul.mubr.bf16.vlgmr.msra.gmra.mrb[32].mxu1 %v4763_v20  ;;  %3237 = vmatpush3.bf16.msra.mxu0 %v5550_v8  ;;  %v5589_v8 = vld [vmem:[#allocation33_spill] sm:$0xff]  ;;  %v5592_v20 = vld [vmem:[#allocation39_spill] sm:$0xff] }
 0x119   : > { %3215 = vmatpush3.bf16.msra.mxu1 %v4176_v45  ;;  %3238 = vmatprep.subr.bf16.mxu0 %v5552_v25  ;;  %v5590_v25 = vld [vmem:[#allocation35_spill] sm:$0xff] }
 0x11a   : > { %3216 = vmatprep.subr.bf16.mxu1 %v4186_v49  ;;  %1983 = vmatprep.mubr.bf16.mxu1 %v1791_v28 }
 0x11b   : > { %2023 = vmatprep.mubr.bf16.mxu0 %v1807_v18  ;;  %v5595_v18 = vld [vmem:[#allocation45_spill] sm:$0xff] }
 0x11c   : > { %3239 = vmatpush3.bf16.msra.mxu0 %v5554_v10  ;;  %v2859_v10 = vld.sshfl [vmem:[%s4132_s30 + $0x4c] sm:$0x3 pattern:$0x76325410] }
 0x11d   : > { %3217 = vmatpush3.bf16.msra.mxu1 %v4196_v51  ;;  %3240 = vmatprep.subr.bf16.mxu0 %v5556_v11 }
 0x11e   : > { %3218 = vmatprep.subr.bf16.mxu1 %v4210_v53 }
 0x120   : > { %3241 = vmatpush3.bf16.msra.mxu0 %v5558_v60 }
 0x121   : > { %3219 = vmatpush3.bf16.msra.mxu1 %v4220_v55  ;;  %3242 = vmatprep.subr.bf16.mxu0 %v5560_v36 }
 0x122   : > { %3220 = vmatprep.subr.bf16.mxu1 %v4234_v57 }
 0x124   : > { %3243 = vmatpush3.bf16.msra.mxu0 %v5561_v4  ;;  %v5591_v4 = vld [vmem:[#allocation37_spill] sm:$0xff] }
 0x125   : > { %3221 = vmatpush3.bf16.msra.mxu1 %v4244_v59  ;;  %3244 = vmatprep.subr.bf16.mxu0 %v5562_v5  ;;  %v5586_v5 = vld [vmem:[#allocation27_spill] sm:$0xff] }
 0x126   : > { %3222 = vmatprep.subr.bf16.mxu1 %v4258_v61 }
 0x128   : > { %3245 = vmatpush3.bf16.msra.mxu0 %v5564_v12 }
 0x129   : > { %3223 = vmatpush3.bf16.msra.mxu1 %v4268_v63  ;;  %3246 = vmatprep.subr.bf16.mxu0 %v5566_v56  ;;  %v1792_v56 = vcombine.high %v4871_v24, %v4871_v24 }
 0x12a   : > { %3224 = vmatprep.subr.bf16.mxu1 %v4282_v34  ;;  %v2934_v45 = vpop.f32.mrb[4].mxu0 }
 0x12b   : > { %v2956_v49 = vpop.f32.mrb[4].mxu1  ;;  %v2935_v51 = vpop.f32.mrb[5].mxu0 }
 0x12c   : > { %v2957_v53 = vpop.f32.mrb[5].mxu1  ;;  %v2936_v55 = vadd.f32 %v2935_v51, %v2934_v45  ;;  %3247 = vmatpush3.bf16.msra.mxu0 %v5568_v17  ;;  %v2937_v61 = vpop.f32.mrb[6].mxu0  ;;  %v5596_v45 = vld [vmem:[#allocation47_spill] sm:$0xff]  ;;  %v5597_v51 = vld [vmem:[#allocation49_spill] sm:$0xff] }
 0x12d   : > { %v2958_v57 = vadd.f32 %v2957_v53, %v2956_v49  ;;  %v2959_v59 = vpop.f32.mrb[6].mxu1  ;;  %3225 = vmatpush3.bf16.msra.mxu1 %v4292_v37  ;;  %3248 = vmatprep.subr.bf16.mxu0 %v5570_v46  ;;  %v2938_v63 = vpop.f32.mrb[7].mxu0  ;;  %v4937_v37 = vrot.slane %v1792_v56, %v4164_v41  ;;  %v5583_v46 = vld [vmem:[#allocation21_spill] sm:$0xff]  ;;  %v5598_v53 = vld [vmem:[#allocation50_spill] sm:$0xff] }
 0x12e   : > { %v2960_v36 = vpop.f32.mrb[7].mxu1  ;;  %3226 = vmatprep.subr.bf16.mxu1 %v4306_v40  ;;  %v1221_v34 = vadd.f32 %v2936_v55, %v1181_v7  ;;  %v5582_v40 = vld [vmem:[#allocation19_spill] sm:$0xff]  ;;  %v5603_v59 = vld [vmem:[#allocation16_spill] sm:$0xff] }
 0x12f   : > { %v2862_v63 = vld [vmem:[%s4132_s30 + $0x56] sm:$0xff] }
 0x130   : > { %v1261_v60 = vadd.f32 %v2958_v57, %v1221_v34  ;;  %3249 = vmatpush3.bf16.msra.mxu0 %v5572_v38  ;;  %v2861_v38 = vld [vmem:[%s4132_s30 + $0x4e] sm:$0xff]  ;;  %v5602_v57 = vld [vmem:[#allocation7_spill] sm:$0xff] }
 0x131   : > { %3227 = vmatpush3.bf16.msra.mxu1 %v5527_v14  ;;  %3250 = vmatprep.subr.bf16.mxu0 %v5574_v23  ;;  %v1808_v14 = vcombine.high %v4937_v37, %v4937_v37  ;;  %v5585_v23 = vld [vmem:[#allocation25_spill] sm:$0xff]  ;;  %v2121_v11 = vcombine.high %v2861_v38, %v2861_v38 }
 0x132   : > { %3228 = vmatprep.subr.bf16.mxu1 %v5529_v16  ;;  %v5584_v16 = vld [vmem:[#allocation23_spill] sm:$0xff]  ;;  %v5604_v34 = vld [vmem:[#allocation17_spill] sm:$0xff] }
 0x133   : > { %v4961_v12 = vrot.slane %v2121_v11, %v4164_v41  ;;  %v3744_v11 = vld [vmem:[%s5368_s1 + $0x188] sm:$0xff]  }
 0x134   : > { %3251 = vmatpush3.bf16.msra.mxu0 %v4535_v43 }
 0x135   : > { %3229 = vmatpush3.bf16.msra.mxu1 %v5582_v40  ;;  %3465 = vmatprep.subr.bf16.mxu0 %v5577_v19  ;;  %v2137_v17 = vcombine.high %v4961_v12, %v4961_v12  ;;  %v5606_v40 = vld [vmem:[#allocation9_spill] sm:$0xff] }
 0x136   : > { %3258 = vmatprep.subr.bf16.mxu1 %v5583_v46  ;;  %v5607_v46 = vld [vmem:[#allocation10_spill] sm:$0xff] }
 0x137   : > { %2024 = vmatmul.mubr.bf16.vlgmr.msra.gmra.mrb[32].mxu0 %v1799_v6 }
 0x138   : > { %1984 = vmatmul.mubr.bf16.vlgmr.msra.gmra.mrb[36].mxu1 %v1789_v58  ;;  %3466 = vmatpush3.bf16.msra.mxu0 %v4551_v42  ;;  %v5594_v58 = vld [vmem:[#allocation43_spill] sm:$0xff] }
 0x139   : > { %3259 = vmatpush3.bf16.msra.mxu1 %v5584_v16  ;;  %3467 = vmatprep.subr.bf16.mxu0 %v5577_v19  ;;  %v5608_v16 = vld [vmem:[#allocation11_spill] sm:$0xff] }
 0x13a   : > { %3260 = vmatprep.subr.bf16.mxu1 %v5585_v23  ;;  %2063 = vmatprep.mubr.bf16.mxu1 %v1808_v14 }
 0x13b   : > { %3473 = vmatprep.mubr.msk.bf16.mxu0 %vm3868_vm0, %v5577_v19 }
 0x13c   : > { %3468 = vmatpush3.bf16.msra.mxu0 %v4560_v39 }
 0x13d   : > { %3261 = vmatpush3.bf16.msra.mxu1 %v5586_v5  ;;  %3469 = vmatprep.subr.bf16.mxu0 %v5577_v19  ;;  %v3743_v5 = vld [vmem:[%s5368_s1 + $0x28] sm:$0xff]  }
 0x13e   : > { %3262 = vmatprep.subr.bf16.mxu1 %v5587_v9 }
 0x140   : > { %3470 = vmatpush3.bf16.msra.mxu0 %v4571_v1 }
 0x141   : > { %3263 = vmatpush3.bf16.msra.mxu1 %v5588_v0  ;;  %3471 = vmatprep.subr.bf16.mxu0 %v5577_v19 }
 0x142   : > { %3264 = vmatprep.subr.bf16.mxu1 %v5589_v8  ;;  %v3745_v8 = vld [vmem:[%s5368_s1 + $0x70] sm:$0xff]  }
 0x144   : > { %3472 = vmatpush3.bf16.msra.mxu0 %v4580_v3 }
 0x145   : > { %3265 = vmatpush3.bf16.msra.mxu1 %v5590_v25  ;;  %3307 = vmatprep.subr.bf16.mxu0 %v4775_v26 }
 0x146   : > { %3266 = vmatprep.subr.bf16.mxu1 %v5591_v4  ;;  %v3748_v4 = vld [vmem:[%s5368_s1 + $0x190] sm:$0xff]  }
 0x147   : > { %3474 = vmatmul.mubr.msk.bf16.vlgmr.msra.gmra.mrb[36].mxu0 %vm1102_vm1, %v2859_v10  ;;  %v3747_v10 = vld [vmem:[%s5368_s1 + $0x30] sm:$0xff]  }
 0x148   : > { %3308 = vmatpush3.bf16.msra.mxu0 %v4787_v31  ;;  %2266 = vmatprep.mubr.bf16.mxu0 %v2137_v17  ;;  %v3749_v17 = vld [vmem:[%s5368_s1 + $0x78] sm:$0xff]  }
 0x149   : > { %3267 = vmatpush3.bf16.msra.mxu1 %v5592_v20  ;;  %3309 = vmatprep.subr.bf16.mxu0 %v4794_v35  ;;  %v3750_v20 = vld [vmem:[%s5368_s1 + $0x1d8] sm:$0xff]  }
 0x14a   : > { %3268 = vmatprep.subr.bf16.mxu1 %v5593_v22  ;;  %v2978_v29 = vpop.f32.mrb[8].mxu0 }
 0x14b   : > { %v3000_v2 = vpop.f32.mrb[8].mxu1  ;;  %v2979_v30 = vpop.f32.mrb[9].mxu0 }
 0x14c   : > { %v3001_v7 = vpop.f32.mrb[9].mxu1  ;;  %v2980_v21 = vadd.f32 %v2979_v30, %v2978_v29  ;;  %3310 = vmatpush3.bf16.msra.mxu0 %v4801_v54  ;;  %v2981_v6 = vpop.f32.mrb[10].mxu0  ;;  %v4984_v54 = vrot.slane %v2861_v38, %v4164_v41  ;;  %v5053_v29 = vrot.slane %v2862_v63, %v4164_v41  ;;  %v3752_v30 = vld [vmem:[%s5368_s1 + $0x198] sm:$0xff]  }
 0x14d   : > { %v3002_v26 = vadd.f32 %v3001_v7, %v3000_v2  ;;  %v3003_v24 = vpop.f32.mrb[10].mxu1  ;;  %3269 = vmatpush3.bf16.msra.mxu1 %v5594_v58  ;;  %3311 = vmatprep.subr.bf16.mxu0 %v4808_v44  ;;  %v2982_v31 = vpop.f32.mrb[11].mxu0  ;;  %v5599_v44 = vld [vmem:[#allocation6_spill] sm:$0xff]  ;;  %v3751_v2 = vld [vmem:[%s5368_s1 + $0x38] sm:$0xff]   ;;  %v3753_v7 = vld [vmem:[%s5368_s1 + $0x140] sm:$0xff]  }
 0x14e   : > { %v3004_v28 = vpop.f32.mrb[11].mxu1  ;;  %3270 = vmatprep.subr.bf16.mxu1 %v5595_v18  ;;  %v1301_v35 = vadd.f32 %v2980_v21, %v1261_v60  ;;  %v2136_v55 = vcombine.high %v4984_v54, %v4984_v54  ;;  %v5605_v60 = vld [vmem:[#allocation8_spill] sm:$0xff]  ;;  %v3758_v31 = vld [vmem:[%s5368_s1 + $0x1e8] sm:$0xff]  }
 0x14f   : > { %v3754_v21 = vld [vmem:[%s5368_s1 + $0x1e0] sm:$0xff]   ;;  %v3757_v28 = vld [vmem:[%s5368_s1 + $0x148] sm:$0xff]  }
 0x150   : > { %v1341_v49 = vadd.f32 %v3002_v26, %v1301_v35  ;;  %3312 = vmatpush3.bf16.msra.mxu0 %v4815_v48  ;;  %v5600_v48 = vld [vmem:[#allocation15_spill] sm:$0xff]  ;;  %v2153_v26 = vcombine.high %v5053_v29, %v5053_v29  ;;  %v3755_v24 = vld [vmem:[%s5368_s1 + $0x100] sm:$0xff]  }
 0x151   : > { %3271 = vmatpush3.bf16.msra.mxu1 %v5596_v45  ;;  %3313 = vmatprep.subr.bf16.mxu0 %v4822_v50  ;;  %v5601_v50 = vld [vmem:[#allocation14_spill] sm:$0xff]  ;;  %v3756_v6 = vld [vmem:[%s5368_s1 + $0x1a0] sm:$0xff]  }
 0x152   : > { %3272 = vmatprep.subr.bf16.mxu1 %v5597_v51 }
 0x154   : > { %3314 = vmatpush3.bf16.msra.mxu0 %v4829_v52 }
 0x155   : > { %3273 = vmatpush3.bf16.msra.mxu1 %v5598_v53  ;;  %3315 = vmatprep.subr.bf16.mxu0 %v4836_v13 }
 0x156   : > { %3285 = vmatprep.subr.bf16.mxu1 %v5599_v44 }
 0x158   : > { %2064 = vmatmul.mubr.bf16.vlgmr.msra.gmra.mrb[40].mxu1 %v4937_v37  ;;  %3316 = vmatpush3.bf16.msra.mxu0 %v5601_v50  ;;  %v2138_v37 = vcombine.high %v2862_v63, %v2862_v63  ;;  %v3760_v50 = vld [vmem:[%s5368_s1 + $0x1a8] sm:$0xff]  }
 0x159   : > { %3286 = vmatpush3.bf16.msra.mxu1 %v5600_v48  ;;  %3317 = vmatprep.subr.bf16.mxu0 %v5603_v59  ;;  %v3759_v48 = vld [vmem:[%s5368_s1 + $0x108] sm:$0xff]   ;;  %v3761_v59 = vld [vmem:[%s5368_s1 + $0x150] sm:$0xff]  }
 0x15a   : > { %3287 = vmatprep.subr.bf16.mxu1 %v5602_v57  ;;  %2226 = vmatprep.mubr.bf16.mxu1 %v2136_v55  ;;  %v5009_v14 = vrot.slane %v2138_v37, %v4164_v41 }
 0x15b   : > { %v1380_v61 = vpop.f32.mrb[12].mxu1 }
 0x15c   : > { %v4997_v52 = vadd.f32 %v1380_v61, %v1341_v49  ;;  %v3451_v36 = vpop.f32.mrb[13].mxu1  ;;  %3318 = vmatpush3.bf16.msra.mxu0 %v4857_v27  ;;  %v5609_v27 = vld [vmem:[#allocation12_spill] sm:$0xff]  ;;  %v3762_v61 = vld [vmem:[%s5368_s1 + $0x1f0] sm:$0xff]  }
 0x15d   : > { %v1383_v13 = vpop.f32.mrb[14].mxu1  ;;  %3288 = vmatpush3.bf16.msra.mxu1 %v5604_v34  ;;  %3319 = vmatprep.subr.bf16.mxu0 %v4864_v32  ;;  %v2154_v32 = vcombine.high %v5009_v14, %v5009_v14  ;;  %v3764_v34 = vld [vmem:[%s5368_s1 + $0x1b0] sm:$0xff]  }
 0x15e   : > { %v3452_v56 = vpop.f32.mrb[15].mxu1  ;;  %3289 = vmatprep.subr.bf16.mxu1 %v5605_v60  ;;  %v3763_v13 = vld [vmem:[%s5368_s1 + $0x110] sm:$0xff]   ;;  %v3766_v60 = vld [vmem:[%s5368_s1 + $0x1f8] sm:$0xff]  }
 0x15f   : > { %v3765_v56 = vld [vmem:[%s5368_s1 + $0x158] sm:$0xff]  }
 0x160   : > { %3320 = vmatpush3.bf16.msra.mxu0 %v4876_v62  ;;  %v5610_v62 = vld [vmem:[#allocation13_spill] sm:$0xff] }
 0x161   : > { %3290 = vmatpush3.bf16.msra.mxu1 %v5606_v40  ;;  %3321 = vmatprep.subr.bf16.mxu0 %v4883_v47  ;;  %v3740_v47 = vld [vmem:[%s5368_s1 + $0x180] sm:$0xff]   ;;  %v3767_v40 = vld [vmem:[%s5368_s1 + $0x118] sm:$0xff]  }
 0x162   : > { %3291 = vmatprep.subr.bf16.mxu1 %v5607_v46  ;;  %v3768_v46 = vld [vmem:[%s5368_s1 + $0x1b8] sm:$0xff]  }
 0x164   : > { %3322 = vmatpush3.bf16.msra.mxu0 %v4893_v15  ;;  %v3741_v15 = vld [vmem:[%s5368_s1 + $0x68] sm:$0xff]  }
 0x165   : > { %3292 = vmatpush3.bf16.msra.mxu1 %v5608_v16  ;;  %3351 = vmatprep.subr.bf16.mxu0 %v4900_v33  ;;  %v3742_v33 = vld [vmem:[%s5368_s1 + $0x1c8] sm:$0xff]   ;;  %v3769_v16 = vld [vmem:[%s5368_s1 + $0x160] sm:$0xff]  }
 0x166   : > { %3293 = vmatprep.subr.bf16.mxu1 %v5609_v27  ;;  %v3770_v27 = vld [vmem:[%s5368_s1 + $0x2c0] sm:$0xff]  }
 0x167   : > { %2267 = vmatmul.mubr.bf16.vlgmr.msra.gmra.mrb[40].mxu0 %v4961_v12  ;;  %v3746_v12 = vld [vmem:[%s5368_s1 + $0x1d0] sm:$0xff]  }
 0x168   : > { %3352 = vmatpush3.bf16.msra.mxu0 %v3740_v47  ;;  %2346 = vmatprep.mubr.bf16.mxu0 %v2154_v32  ;;  %v3772_v47 = vld [vmem:[%s5368_s1 + $0x280] sm:$0xff]  }
 0x169   : > { %3294 = vmatpush3.bf16.msra.mxu1 %v5610_v62  ;;  %3353 = vmatprep.subr.bf16.mxu0 %v3742_v33  ;;  %v3771_v62 = vld [vmem:[%s5368_s1 + $0x120] sm:$0xff]   ;;  %v3774_v33 = vld [vmem:[%s5368_s1 + $0x2c8] sm:$0xff]  }
 0x16a   : > { %3295 = vmatprep.subr.bf16.mxu1 %v3741_v15  ;;  %v3049_v23 = vpop.f32.mrb[12].mxu0  ;;  %v3773_v15 = vld [vmem:[%s5368_s1 + $0x168] sm:$0xff]  }
 0x16b   : > { %v3050_v38 = vpop.f32.mrb[13].mxu0 }
 0x16c   : > { %v3051_v9 = vadd.f32 %v3050_v38, %v3049_v23  ;;  %3354 = vmatpush3.bf16.msra.mxu0 %v3744_v11  ;;  %v3052_v0 = vpop.f32.mrb[14].mxu0  ;;  %v3775_v38 = vld [vmem:[%s5368_s1 + $0x128] sm:$0xff]  }
 0x16d   : > { %3296 = vmatpush3.bf16.msra.mxu1 %v3743_v5  ;;  %3355 = vmatprep.subr.bf16.mxu0 %v3746_v12  ;;  %v3053_v25 = vpop.f32.mrb[15].mxu0  ;;  %v3777_v0 = vld [vmem:[%s5368_s1 + $0x170] sm:$0xff]  }
 0x16e   : > { %3297 = vmatprep.subr.bf16.mxu1 %v3745_v8  ;;  %v3778_v8 = vld [vmem:[%s5368_s1 + $0x2d0] sm:$0xff]  }
 0x16f   : > { %v3779_v25 = vld [vmem:[%s5368_s1 + $0x130] sm:$0xff]  }
 0x170   : > { %3356 = vmatpush3.bf16.msra.mxu0 %v3748_v4  ;;  %v3781_v4 = vld [vmem:[%s5368_s1 + $0x178] sm:$0xff]  }
 0x171   : > { %3298 = vmatpush3.bf16.msra.mxu1 %v3747_v10  ;;  %3357 = vmatprep.subr.bf16.mxu0 %v3750_v20  ;;  %v3780_v10 = vld [vmem:[%s5368_s1 + $0x290] sm:$0xff]  }
 0x172   : > { %3299 = vmatprep.subr.bf16.mxu1 %v3749_v17  ;;  %v3782_v17 = vld [vmem:[%s5368_s1 + $0x2d8] sm:$0xff]  }
 0x174   : > { %3358 = vmatpush3.bf16.msra.mxu0 %v3752_v30  ;;  %v3784_v30 = vld [vmem:[%s5368_s1 + $0x298] sm:$0xff]  }
 0x175   : > { %3300 = vmatpush3.bf16.msra.mxu1 %v3751_v2  ;;  %3359 = vmatprep.subr.bf16.mxu0 %v3754_v21  ;;  %v3783_v2 = vld [vmem:[%s5368_s1 + $0x138] sm:$0xff]  }
 0x176   : > { %3329 = vmatprep.subr.bf16.mxu1 %v3753_v7  ;;  %v3785_v7 = vld [vmem:[%s5368_s1 + $0x240] sm:$0xff]  }
 0x178   : > { %2227 = vmatmul.mubr.bf16.vlgmr.msra.gmra.mrb[44].mxu1 %v4984_v54  ;;  %3360 = vmatpush3.bf16.msra.mxu0 %v3756_v6  ;;  %v5083_v54 = vld [vmem:[%s4132_s30 + $0x5e] sm:$0xff]  ;;  %v3789_v6 = vld [vmem:[%s5368_s1 + $0x248] sm:$0xff]  }
 0x179   : > { %3330 = vmatpush3.bf16.msra.mxu1 %v3755_v24  ;;  %3361 = vmatprep.subr.bf16.mxu0 %v3758_v31  ;;  %v2155_v63 = vcombine.high %v5083_v54, %v5083_v54  ;;  %v5169_v20 = vrot.slane %v5083_v54, %v4164_v41  ;;  %v3788_v24 = vld [vmem:[%s5368_s1 + $0x2a0] sm:$0xff]  }
 0x17a   : > { %3331 = vmatprep.subr.bf16.mxu1 %v3757_v28  ;;  %2306 = vmatprep.mubr.bf16.mxu1 %v2153_v26  ;;  %v3787_v26 = vld [vmem:[%s5368_s1 + $0x200] sm:$0xff]  }
 0x17b   : > { %v3027_v35 = vpop.f32.mrb[16].mxu1  ;;  %v5114_v37 = vrot.slane %v2155_v63, %v4164_v41  ;;  %v3786_v41 = vld [vmem:[%s5368_s1 + $0x2e0] sm:$0xff]   ;;  %v2170_v21 = vcombine.high %v5169_v20, %v5169_v20  ;;  %v3799_v63 = vld [vmem:[%s5368_s1 + $0x270] sm:$0xff]  }
 0x17c   : > { %v3028_v49 = vpop.f32.mrb[17].mxu1  ;;  %3362 = vmatpush3.bf16.msra.mxu0 %v3760_v50  ;;  %v3795_v50 = vld [vmem:[%s5368_s1 + $0x260] sm:$0xff]  }
 0x17d   : > { %v3029_v44 = vadd.f32 %v3028_v49, %v3027_v35  ;;  %v3030_v55 = vpop.f32.mrb[18].mxu1  ;;  %3332 = vmatpush3.bf16.msra.mxu1 %v3759_v48  ;;  %3363 = vmatprep.subr.bf16.mxu0 %v3762_v61  ;;  %v2171_v32 = vcombine.high %v5114_v37, %v5114_v37  ;;  %v3790_v49 = vld [vmem:[%s5368_s1 + $0x208] sm:$0xff]   ;;  %v3792_v48 = vld [vmem:[%s5368_s1 + $0x210] sm:$0xff]  }
 0x17e   : > { %v3031_v57 = vpop.f32.mrb[19].mxu1  ;;  %3333 = vmatprep.subr.bf16.mxu1 %v3761_v59  ;;  %v3798_v59 = vld [vmem:[%s5368_s1 + $0x228] sm:$0xff]  }
 0x17f   : > { %v5097_v36 = vadd.f32 %v3051_v9, %v3029_v44  ;;  %v3776_v9 = vld [vmem:[%s5368_s1 + $0x288] sm:$0xff]   ;;  %v3791_v44 = vld [vmem:[%s5368_s1 + $0x250] sm:$0xff]  }
 0x180   : > { %3364 = vmatpush3.bf16.msra.mxu0 %v3764_v34  ;;  %v3800_v34 = vld [vmem:[%s5368_s1 + $0x230] sm:$0xff]  }
 0x181   : > { %3334 = vmatpush3.bf16.msra.mxu1 %v3763_v13  ;;  %3365 = vmatprep.subr.bf16.mxu0 %v3766_v60 }
 0x182   : > { %3335 = vmatprep.subr.bf16.mxu1 %v3765_v56  ;;  %v3801_v56 = vld [vmem:[%s5368_s1 + $0x278] sm:$0xff]  }
 0x184   : > { %3366 = vmatpush3.bf16.msra.mxu0 %v3768_v46 }
 0x185   : > { %3336 = vmatpush3.bf16.msra.mxu1 %v3767_v40  ;;  %3395 = vmatprep.subr.bf16.mxu0 %v3770_v27 }
 0x186   : > { %3337 = vmatprep.subr.bf16.mxu1 %v3769_v16 }
 0x187   : > { %2347 = vmatmul.mubr.bf16.vlgmr.msra.gmra.mrb[44].mxu0 %v5009_v14 }
 0x188   : > { %3396 = vmatpush3.bf16.msra.mxu0 %v3772_v47  ;;  %2426 = vmatprep.mubr.bf16.mxu0 %v2171_v32 }
 0x189   : > { %3338 = vmatpush3.bf16.msra.mxu1 %v3771_v62  ;;  %3397 = vmatprep.subr.bf16.mxu0 %v3774_v33 }
 0x18a   : > { %3339 = vmatprep.subr.bf16.mxu1 %v3773_v15  ;;  %v3093_v14 = vpop.f32.mrb[16].mxu0 }
 0x18b   : > { %v3094_v23 = vpop.f32.mrb[17].mxu0 }
 0x18c   : > { %v3095_v5 = vadd.f32 %v3094_v23, %v3093_v14  ;;  %3398 = vmatpush3.bf16.msra.mxu0 %v3776_v9  ;;  %v3096_v11 = vpop.f32.mrb[18].mxu0 }
 0x18d   : > { %3340 = vmatpush3.bf16.msra.mxu1 %v3775_v38  ;;  %3399 = vmatprep.subr.bf16.mxu0 %v3778_v8  ;;  %v3097_v12 = vpop.f32.mrb[19].mxu0 }
 0x18e   : > { %3341 = vmatprep.subr.bf16.mxu1 %v3777_v0 }
 0x190   : > { %3400 = vmatpush3.bf16.msra.mxu0 %v3780_v10 }
 0x191   : > { %3342 = vmatpush3.bf16.msra.mxu1 %v3779_v25  ;;  %3401 = vmatprep.subr.bf16.mxu0 %v3782_v17 }
 0x192   : > { %3343 = vmatprep.subr.bf16.mxu1 %v3781_v4 }
 0x194   : > { %3402 = vmatpush3.bf16.msra.mxu0 %v3784_v30 }
 0x195   : > { %3344 = vmatpush3.bf16.msra.mxu1 %v3783_v2  ;;  %3403 = vmatprep.subr.bf16.mxu0 %v3786_v41 }
 0x196   : > { %3373 = vmatprep.subr.bf16.mxu1 %v3785_v7 }
 0x198   : > { %2307 = vmatmul.mubr.bf16.vlgmr.msra.gmra.mrb[48].mxu1 %v5053_v29  ;;  %3404 = vmatpush3.bf16.msra.mxu0 %v3788_v24 }
 0x199   : > { %3374 = vmatpush3.bf16.msra.mxu1 %v3787_v26  ;;  %3405 = vmatprep.subr.bf16.mxu0 %v5593_v22 }
 0x19a   : > { %3375 = vmatprep.subr.bf16.mxu1 %v3789_v6  ;;  %2386 = vmatprep.mubr.bf16.mxu1 %v2170_v21 }
 0x19b   : > { %v3071_v28 = vpop.f32.mrb[20].mxu1 }
 0x19c   : > { %v3072_v29 = vpop.f32.mrb[21].mxu1  ;;  %3406 = vmatpush3.bf16.msra.mxu0 %v5594_v58  ;;  %v3793_v58 = vld [vmem:[%s5368_s1 + $0x258] sm:$0xff]  }
 0x19d   : > { %v3073_v31 = vadd.f32 %v3072_v29, %v3071_v28  ;;  %v3074_v35 = vpop.f32.mrb[22].mxu1  ;;  %3376 = vmatpush3.bf16.msra.mxu1 %v3790_v49  ;;  %3407 = vmatprep.subr.bf16.mxu0 %v5595_v18  ;;  %v3794_v18 = vld [vmem:[%s5368_s1 + $0x218] sm:$0xff]   ;;  %v2494_v49 = vld [vmem:[%s5370_s3] sm:$0xff] }
 0x19e   : > { %v3075_v54 = vpop.f32.mrb[23].mxu1  ;;  %3377 = vmatprep.subr.bf16.mxu1 %v3791_v44  ;;  %v2496_v44 = vld [vmem:[%s5370_s3 + $0x10] sm:$0xff] }
 0x19f   : > { %v1583_v22 = vadd.f32 %v3073_v31, %v5097_v36  ;;  %v2495_v54 = vld [vmem:[%s5370_s3 + $0x8] sm:$0xff] }
 0x1a0   : > { %3408 = vmatpush3.bf16.msra.mxu0 %v5596_v45  ;;  %v3796_v45 = vld [vmem:[%s5368_s1 + $0x220] sm:$0xff]  }
 0x1a1   : > { %v1623_v55 = vadd.f32 %v3095_v5, %v1583_v22  ;;  %3378 = vmatpush3.bf16.msra.mxu1 %v3792_v48  ;;  %3409 = vmatprep.subr.bf16.mxu0 %v5597_v51  ;;  %v3797_v51 = vld [vmem:[%s5368_s1 + $0x268] sm:$0xff]   ;;  %v3869_v22 = vmov 0.0|0.0   ;;  %v2497_v48 = vld [vmem:[%s5370_s3 + $0x18] sm:$0xff] }
 0x1a2   : > { %3379 = vmatprep.subr.bf16.mxu1 %v3793_v58 }
 0x1a4   : > { %3410 = vmatpush3.bf16.msra.mxu0 %v5598_v53 }
 0x1a5   : > { %3380 = vmatpush3.bf16.msra.mxu1 %v3794_v18  ;;  %3529 = vmatprep.subr.bf16.mxu0 %v3869_v22  ;;  %v3533_v18 = vpack.c.bf16 %v2497_v48, %v2496_v44 }
 0x1a6   : > { %3381 = vmatprep.subr.bf16.mxu1 %v3795_v50  ;;  %v2498_v50 = vld [vmem:[%s5370_s3 + $0x20] sm:$0xff] }
 0x1a7   : > { %2427 = vmatmul.mubr.bf16.vlgmr.msra.gmra.mrb[48].mxu0 %v5114_v37 }
 0x1a8   : > { %3521 = vmatprep.mubr.msk.f32.mxu0 %vm3868_vm0, %v5577_v19 }
 0x1a9   : > { %3382 = vmatpush3.bf16.msra.mxu1 %v3796_v45  ;;  %v2499_v45 = vld [vmem:[%s5370_s3 + $0x28] sm:$0xff] }
 0x1aa   : > { %3383 = vmatprep.subr.bf16.mxu1 %v3797_v51  ;;  %v3137_v53 = vpop.f32.mrb[20].mxu0  ;;  %v3536_v51 = vpack.c.bf16 %v2499_v45, %v2498_v50 }
 0x1ab   : > { %v3138_v57 = vpop.f32.mrb[21].mxu0 }
 0x1ac   : > { %v3139_v61 = vadd.f32 %v3138_v57, %v3137_v53  ;;  %v3140_v36 = vpop.f32.mrb[22].mxu0 }
 0x1ad   : > { %3384 = vmatpush3.bf16.msra.mxu1 %v3798_v59  ;;  %v3141_v13 = vpop.f32.mrb[23].mxu0  ;;  %v2501_v36 = vld [vmem:[%s5370_s3 + $0x38] sm:$0xff] }
 0x1ae   : > { %3385 = vmatprep.subr.bf16.mxu1 %v3799_v63 }
 0x1b1   : > { %3386 = vmatpush3.bf16.msra.mxu1 %v3800_v34  ;;  %v2502_v34 = vld [vmem:[%s5370_s3 + $0x40] sm:$0xff] }
 0x1b2   : > { %3387 = vmatprep.subr.bf16.mxu1 %v3801_v56  ;;  %v2503_v56 = vld [vmem:[%s5370_s3 + $0x48] sm:$0xff] }
 0x1b5   : > { %3388 = vmatpush3.bf16.msra.mxu1 %v4535_v43 }
 0x1b6   : > { %3477 = vmatprep.subr.bf16.mxu1 %v5577_v19 }
 0x1b8   : > { %2387 = vmatmul.mubr.bf16.vlgmr.msra.gmra.mrb[52].mxu1 %v5169_v20 }
 0x1b9   : > { %3478 = vmatpush3.bf16.msra.mxu1 %v4551_v42  ;;  %3485 = vmatprep.mubr.msk.bf16.mxu1 %vm3868_vm0, %v5577_v19  ;;  %v2865_v42 = vld.sshfl [vmem:[%s4132_s30 + $0x66] sm:$0x3 pattern:$0x76325410] }
 0x1ba   : > { %3479 = vmatprep.subr.bf16.mxu1 %v5577_v19 }
 0x1bb   : > { %v3115_v60 = vpop.f32.mrb[24].mxu1 }
 0x1bc   : > { %v3116_v37 = vpop.f32.mrb[25].mxu1 }
 0x1bd   : > { %v3117_v40 = vadd.f32 %v3116_v37, %v3115_v60  ;;  %v3118_v46 = vpop.f32.mrb[26].mxu1  ;;  %3480 = vmatpush3.bf16.msra.mxu1 %v4560_v39  ;;  %v3542_v60 = vpack.c.bf16 %v2503_v56, %v2502_v34  ;;  %v2504_v37 = vld [vmem:[%s5370_s3 + $0x50] sm:$0xff] }
 0x1be   : > { %v3119_v16 = vpop.f32.mrb[27].mxu1  ;;  %3481 = vmatprep.subr.bf16.mxu1 %v5577_v19 }
 0x1bf   : > { %v1663_v43 = vadd.f32 %v3117_v40, %v1623_v55  ;;  %v3530_v55 = vpack.c.bf16 %v2495_v54, %v2494_v49  ;;  %v2505_v40 = vld [vmem:[%s5370_s3 + $0x58] sm:$0xff]  ;;  %v2506_v16 = vld [vmem:[%s5370_s3 + $0x60] sm:$0xff] }
 0x1c0   : > { %v3545_v46 = vpack.c.bf16 %v2505_v40, %v2504_v37 }
 0x1c1   : > { %3482 = vmatpush3.bf16.msra.mxu1 %v4571_v1  ;;  %v1703_v27 = vadd.f32 %v3139_v61, %v1663_v43  ;;  %3531 = vmatpush3.bf16.msra.mxu0 %v3530_v55  ;;  %v2500_v61 = vld [vmem:[%s5370_s3 + $0x30] sm:$0xff]  ;;  %v2507_v43 = vld [vmem:[%s5370_s3 + $0x68] sm:$0xff] }
 0x1c2   : > { %3483 = vmatprep.subr.bf16.mxu1 %v5577_v19  ;;  %3532 = vmatprep.subr.bf16.mxu0 %v3869_v22  ;;  %v3539_v13 = vpack.c.bf16 %v2501_v36, %v2500_v61 }
 0x1c5   : > { %3484 = vmatpush3.bf16.msra.mxu1 %v4580_v3  ;;  %3534 = vmatpush3.bf16.msra.mxu0 %v3533_v18 }
 0x1c6   : > { %3535 = vmatprep.subr.bf16.mxu0 %v3869_v22 }
 0x1c8   : > { %3486 = vmatmul.mubr.msk.bf16.vlgmr.msra.gmra.mrb[56].mxu1 %vm1102_vm1, %v2865_v42  ;;  %v3548_v42 = vpack.c.bf16 %v2507_v43, %v2506_v16 }
 0x1c9   : > { %3537 = vmatpush3.bf16.msra.mxu0 %v3536_v51 }
 0x1ca   : > { %v3164_v62 = vpop.f32.mrb[24].mxu0  ;;  %3538 = vmatprep.subr.bf16.mxu0 %v3869_v22 }
 0x1cb   : > { %v1742_v32 = vpop.f32.mrb[28].mxu1  ;;  %v3165_v39 = vpop.f32.mrb[25].mxu0 }
 0x1cc   : > { %v5255_v47 = vadd.f32 %v1742_v32, %v1703_v27  ;;  %v3463_v15 = vpop.f32.mrb[29].mxu1  ;;  %v3166_v14 = vadd.f32 %v3165_v39, %v3164_v62  ;;  %v3167_v23 = vpop.f32.mrb[26].mxu0  ;;  %v2508_v27 = vld [vmem:[%s5370_s3 + $0x70] sm:$0xff]  ;;  %v2509_v32 = vld [vmem:[%s5370_s3 + $0x78] sm:$0xff] }
 0x1cd   : > { %v1745_v33 = vpop.f32.mrb[30].mxu1  ;;  %v3168_v5 = vpop.f32.mrb[27].mxu0  ;;  %3540 = vmatpush3.bf16.msra.mxu0 %v3539_v13  ;;  %v3551_v39 = vpack.c.bf16 %v2509_v32, %v2508_v27 }
 0x1ce   : > { %v1748_v1 = vmax.f32 %v4997_v52, %v5255_v47  ;;  %v3464_v38 = vpop.f32.mrb[31].mxu1  ;;  %3541 = vmatprep.subr.bf16.mxu0 %v3869_v22 }
 0x1d1   : > { %3543 = vmatpush3.bf16.msra.mxu0 %v3542_v60 }
 0x1d2   : > { %3544 = vmatprep.subr.bf16.mxu0 %v3869_v22 }
 0x1d5   : > { %3546 = vmatpush3.bf16.msra.mxu0 %v3545_v46 }
 0x1d6   : > { %3547 = vmatprep.subr.bf16.mxu0 %v3869_v22 }
 0x1d9   : > { %3549 = vmatpush3.bf16.msra.mxu0 %v3548_v42  ;;  %v2581_v42 = vld [vmem:[%s5371_s4] sm:$0xff] }
 0x1da   : > { %3550 = vmatprep.subr.bf16.mxu0 %v3869_v22 }
 0x1dd   : > { %3552 = vmatpush3.bf16.msra.mxu0 %v3551_v39 }
 0x1de   : > { %3524 = vmatprep.subr.mxu0 %v5577_v19 }
 0x1ea   : > { %v3208_v11 = vpop.f32.mrb[28].mxu0 }
 0x1eb   : > { %v3186_v9 = vpop.f32.mrb[32].mxu1  ;;  %v3209_v0 = vpop.f32.mrb[29].mxu0 }
 0x1ec   : > { %v3187_v3 = vpop.f32.mrb[33].mxu1  ;;  %v3210_v25 = vadd.f32 %v3209_v0, %v3208_v11  ;;  %v3211_v10 = vpop.f32.mrb[30].mxu0 }
 0x1ed   : > { %v3188_v8 = vadd.f32 %v3187_v3, %v3186_v9  ;;  %v3189_v12 = vpop.f32.mrb[34].mxu1  ;;  %v3212_v17 = vpop.f32.mrb[31].mxu0 }
 0x1ee   : > { %v3190_v4 = vpop.f32.mrb[35].mxu1 }
 0x1ef   : > { %v1906_v20 = vadd.f32 %v3188_v8, %v3166_v14 }
 0x1f1   : > { %v1946_v2 = vadd.f32 %v3210_v25, %v1906_v20 }
 0x20a   : > { %v3252_v7 = vpop.f32.mrb[32].mxu0 }
 0x20b   : > { %v3230_v30 = vpop.f32.mrb[36].mxu1  ;;  %v3253_v21 = vpop.f32.mrb[33].mxu0 }
 0x20c   : > { %v3231_v41 = vpop.f32.mrb[37].mxu1  ;;  %v3254_v6 = vadd.f32 %v3253_v21, %v3252_v7  ;;  %v3255_v28 = vpop.f32.mrb[34].mxu0 }
 0x20d   : > { %v3232_v26 = vadd.f32 %v3231_v41, %v3230_v30  ;;  %v3233_v24 = vpop.f32.mrb[38].mxu1  ;;  %v3256_v31 = vpop.f32.mrb[35].mxu0 }
 0x20e   : > { %v3234_v29 = vpop.f32.mrb[39].mxu1 }
 0x20f   : > { %v1986_v35 = vadd.f32 %v3232_v26, %v1946_v2 }
 0x211   : > { %v2026_v58 = vadd.f32 %v3254_v6, %v1986_v35 }
 0x21a   : > { %v2105_v53 = vpop.f32.mrb[36].mxu0 }
 0x21b   : > { %v3475_v57 = vpop.f32.mrb[37].mxu0 }
 0x21c   : > { %v2108_v59 = vpop.f32.mrb[38].mxu0 }
 0x21d   : > { %v3476_v63 = vpop.f32.mrb[39].mxu0  ;;  %v2867_v59 = vld [vmem:[%s5369_s2] ss:$0 sm:$0xff] }
 0x22b   : > { %v3274_v62 = vpop.f32.mrb[40].mxu1 }
 0x22c   : > { %v3275_v15 = vpop.f32.mrb[41].mxu1 }
 0x22d   : > { %v3276_v33 = vadd.f32 %v3275_v15, %v3274_v62  ;;  %v3277_v14 = vpop.f32.mrb[42].mxu1 }
 0x22e   : > { %v3278_v23 = vpop.f32.mrb[43].mxu1 }
 0x22f   : > { %v2066_v38 = vadd.f32 %v3276_v33, %v2026_v58 }
 0x231   : > { %v2106_v5 = vadd.f32 %v2105_v53, %v2066_v38 }
 0x233   : > { %v2111_v9 = vmax.f32 %v1748_v1, %v2106_v5  ;;  %v5611_v5 = vld [vmem:[#allocation5_spill] sm:$0xff] }
 0x23a   : > { %v3323_v11 = vpop.f32.mrb[40].mxu0 }
 0x23b   : > { %v3324_v3 = vpop.f32.mrb[41].mxu0 }
 0x23c   : > { %v3325_v0 = vadd.f32 %v3324_v3, %v3323_v11  ;;  %v3326_v8 = vpop.f32.mrb[42].mxu0 }
 0x23d   : > { %v3327_v12 = vpop.f32.mrb[43].mxu0 }
 0x24b   : > { %v3301_v25 = vpop.f32.mrb[44].mxu1 }
 0x24c   : > { %v3302_v10 = vpop.f32.mrb[45].mxu1 }
 0x24d   : > { %v3303_v4 = vadd.f32 %v3302_v10, %v3301_v25  ;;  %v3304_v17 = vpop.f32.mrb[46].mxu1 }
 0x24e   : > { %v3305_v20 = vpop.f32.mrb[47].mxu1 }
 0x24f   : > { %v2269_v2 = vadd.f32 %v3325_v0, %v3303_v4 }
 0x25a   : > { %v3367_v30 = vpop.f32.mrb[44].mxu0 }
 0x25b   : > { %v3368_v7 = vpop.f32.mrb[45].mxu0 }
 0x25c   : > { %v3369_v41 = vadd.f32 %v3368_v7, %v3367_v30  ;;  %v3370_v21 = vpop.f32.mrb[46].mxu0 }
 0x25d   : > { %v3371_v26 = vpop.f32.mrb[47].mxu0 }
 0x26b   : > { %v3345_v24 = vpop.f32.mrb[48].mxu1 }
 0x26c   : > { %v3346_v6 = vpop.f32.mrb[49].mxu1 }
 0x26d   : > { %v3347_v52 = vadd.f32 %v3346_v6, %v3345_v24  ;;  %v3348_v47 = vpop.f32.mrb[50].mxu1 }
 0x26e   : > { %v3349_v1 = vpop.f32.mrb[51].mxu1 }
 0x26f   : > { %v2309_v28 = vadd.f32 %v3347_v52, %v2269_v2 }
 0x271   : > { %v2349_v29 = vadd.f32 %v3369_v41, %v2309_v28 }
 0x27a   : > { %v3411_v31 = vpop.f32.mrb[48].mxu0 }
 0x27b   : > { %v3412_v35 = vpop.f32.mrb[49].mxu0 }
 0x27c   : > { %v3413_v49 = vadd.f32 %v3412_v35, %v3411_v31  ;;  %v3414_v54 = vpop.f32.mrb[50].mxu0 }
 0x27d   : > { %v3415_v44 = vpop.f32.mrb[51].mxu0 }
 0x28b   : > { %v3389_v22 = vpop.f32.mrb[52].mxu1 }
 0x28c   : > { %v3390_v55 = vpop.f32.mrb[53].mxu1 }
 0x28d   : > { %v3391_v48 = vadd.f32 %v3390_v55, %v3389_v22  ;;  %v3392_v58 = vpop.f32.mrb[54].mxu1 }
 0x28e   : > { %v3393_v18 = vpop.f32.mrb[55].mxu1 }
 0x28f   : > { %v2389_v50 = vadd.f32 %v3391_v48, %v2349_v29 }
 0x291   : > { %v2429_v45 = vadd.f32 %v3413_v49, %v2389_v50 }
 0x29b   : > { %v2468_v51 = vpop.f32.mrb[56].mxu1 }
 0x29c   : > { %v2469_v53 = vadd.f32 %v2468_v51, %v2429_v45  ;;  %v3487_v57 = vpop.f32.mrb[57].mxu1 }
 0x29d   : > { %v2471_v61 = vpop.f32.mrb[58].mxu1 }
 0x29e   : > { %v2474_v36 = vmax.f32 %v2111_v9, %v2469_v53  ;;  %v3488_v63 = vpop.f32.mrb[59].mxu1  ;;  %v2664_v9 = vsub.s32 0, %v5611_v5 }
 0x2a0   : > { %v2482_v13 = vadd.f32 %v2867_v59, %v2474_v36 }
 0x2a2   : > { %v2483_v34 = vmax.f32 %v2482_v13, 0.0 }
 0x2a4   : > { %v2485_v56 = vsel %vm2484_vm2, %v2483_v34, 0.0 }
 0x2a5   : > { %v2486_v60 = vrot.slane %v2485_v56, 4 }
 0x2a7   : > { %v2487_v37 = vadd.f32 %v2486_v60, %v2485_v56 }
 0x2a9   : > { %v2488_v40 = vrot.slane %v2487_v37, 2 }
 0x2ab   : > { %v2489_v46 = vadd.f32 %v2488_v40, %v2487_v37 }
 0x2ad   : > { %v2490_v16 = vrot.slane %v2489_v46, 1 }
 0x2af   : > { %v2491_v43 = vadd.f32 %v2490_v16, %v2489_v46 }
 0x2b1   : > { %v2493_v27 = vmul.f32 0.25, %v2491_v43 }
 0x2b3   : > { %3522 = vmatmul.mubr.f32.vlgmr.msra.gmra.mrb[52].mxu0 %v2493_v27 }
 0x2b4   : > { %3525 = vmatpush3.msra.mxu0 %v2581_v42  ;;  %3526 = vmatprep.mubr.msk.f32.mxu0 %vm3868_vm0, %v5577_v19 }
 0x386   : > { %v2576_v32 = vpop.f32.mrb[52].mxu0 }
 0x387   : > { %v2580_v62 = vmax.f32 %v2576_v32, 0.0  ;;  %v3523_v15 = vpop.f32.mrb[53].mxu0 }
 0x389   : > { %3527 = vmatmul.mubr.msk.f32.vlgmr.msra.gmra.mrb[54].mxu0 %vm2582_vm3, %v2580_v62 }
 0x45c   : > { %v2652_v39 = vpop.f32.mrb[54].mxu0 }
 0x45d   : > { %v2869_v33 = vmul.f32 -1.442695, %v2652_v39  ;;  %v3528_v14 = vpop.f32.mrb[55].mxu0 }
 0x45f   : > { %3709 = vpow2.f32 %v2869_v33 }
 0x469   : > { %v3710_v23 = vpop.eup %3709 }
 0x46a   : > { %v2659_v38 = vadd.f32 1.0, %v3710_v23 }
 0x46c   : > { %3711 = vrcp.f32 %v2659_v38 }
 0x476   : > { %v3712_v11 = vpop.eup %3711 }
 0x477   : > { %v2665_v19 = vrot.slane %v3712_v11, %v2664_v9 }
 0x479   : > { %v2666_v3 = vmul.f32 %v2665_v19, %v2483_v34 }
 0x47b   : > { %2667 = vst [vmem:[%s217_s15] sm:$0xf] %v2666_v3 }
 0x47c   : > { %3815 = shalt.err (!%p3812_p3)
}
 0x47d   : > { %s3816_s30 = scalar_lea.hbm %s5325_s25, 64  ;;  %s3820_s11 = scalar_lea.hbm %s5372_s5, 128 }
 0x47e   : > { %p3817_p4 = scmp.ne.s32.totalorder %s5325_s25, %s3816_s30  ;;  %p3821_p9 = scmp.lt.u32.totalorder %s5325_s25, %s5372_s5 }
 0x47f   : > { %p3822_p10 = scmp.lt.u32.totalorder %s3820_s11, %s3816_s30  ;;  %p3824_p12 = scmp.lt.u32.totalorder %s3816_s30, %s5325_s25 }
 0x480   : > { %p3818_p7 = pnand %p3817_p4, %p3939_p5 }
 0x481   : > { %p3823_p11 = por %p3822_p10, %p3821_p9 }
 0x482   : > { %p3819_p8 = pneg %p3818_p7 }
 0x483   : > { %p3825_p13 = por %p3824_p12, %p3823_p11 }
 0x485   : > { %p3826_p0 = pnand %p3825_p13, %p3819_p8 }
 0x487   : > { %3829 = shalt.err (!%p3826_p0)
}
 0x488   : > { %3554 = dma.vmem_to_hbm [thread:$0]  (%p3939_p5), %s5327_s16, 64, %s5325_s25, %s2669_s26  }
 0x489 PF: > { %p3560_p1 = scmp.ge.s32.totalorder %s3864_s21, 2  ;;  %s2694_s14 = sand.u32 1, %s3852_s18  }
 0x48a   : > { %s2695_s15 = scalar_lea.sflag [#allocation3], %s2694_s14 }
 0x48b   : > { %p3557_p2 = pnand %p3560_p1, %p3943_p6 }
 0x48d   : > { %3847 = dma.done.wait (!%p3557_p2), %s2695_s15, 64  }
 0x48e   : > { %3849 = vsyncadd (!%p3557_p2), %s2695_s15, 4294967232  ;;  %p15_p3 = scmp.ge.s32.totalorder %s3926_s24, 4   ;;  %s5612_s18 = smov %s3856_s19 }
 0x48f   : > { %s5613_s19 = smov %s3860_s20  ;;  %s5614_s20 = smov %s3937_s27 }
 0x490   : > { %s5615_s21 = smov %s3926_s24  ;;  %17 = sbr.rel (!%p15_p3) target bundleno = 3 (0x3), region = 78 }
 0x497   :  { %2700 = vsyncpa [#allocation3], 1 }
 0x498   :  { %2702 = vsyncpa [#allocation3 + $0x1], 1 }

</bundles_post_ra>
